<compile_context>
chip_gen: v5e
topology: v5e:2x2
jax: 0.10.0
libtpu: 0.0.40
codegen_flags: <defaults>
</compile_context>

<pallas_src>
import functools
import numpy as np
import jax
import jax.numpy as jnp
from jax.experimental import pallas as pl
from jax.experimental.pallas import tpu as pltpu


_PARITIES = ((0, 0), (0, 1), (1, 0), (1, 1))
# ConvTranspose2d(k=4, s=2, p=1): output row 2*i + ry reads input rows i + sy with kernel
# row ky where  ry=0 -> (ky=1, sy=0), (ky=3, sy=-1)   ry=1 -> (ky=0, sy=+1), (ky=2, sy=0).
# Re-expressed per input shift sy -> {ry: ky} (identically for columns):
_ROW_TAPS = {-1: {0: 3}, 0: {0: 1, 1: 2}, 1: {1: 0}}
_SHIFTS = (-1, 0, 1)


def _pack_weights(Wt, Wf, C, Co):
    """Pack ConvTranspose2d (C,Co,4,4) + 1x1 Conv (Co,C,1,1) weights into (9, C, 5*Co).

    Per tap (sy, sx): column blocks 0..3 are the four output parities (ry, rx) (zero if the
    tap does not contribute to that parity), block 4 is the 1x1 branch (centre tap only).
    A single lane-dense 5*Co-wide accumulation then reproduces both branches.
    """
    zeros = jnp.zeros((C, Co), Wt.dtype)
    taps = []
    for sy in _SHIFTS:
        for sx in _SHIFTS:
            cols = []
            for ry, rx in _PARITIES:
                if ry in _ROW_TAPS[sy] and rx in _ROW_TAPS[sx]:
                    cols.append(Wt[:, :, _ROW_TAPS[sy][ry], _ROW_TAPS[sx][rx]])
                else:
                    cols.append(zeros)
            cols.append(jnp.transpose(Wf[:, :, 0, 0]) if (sy == 0 and sx == 0) else zeros)
            taps.append(jnp.concatenate(cols, axis=1))        # (C, 5*Co)
    return jnp.stack(taps, axis=0)                            # (9, C, 5*Co)


def _upres_kernel(x_ref, w_ref, b_ref, o_ref, *, TH, W, C, Co):
    # x_ref: (TH+2, W+2, C) bf16 halo'd rows; w_ref: (9, C, 5Co) bf16; b_ref: (1, 5Co) f32.
    acc = None
    t = 0
    for sy in _SHIFTS:
        for sx in _SHIFTS:
            # TODO(synk): the slice+collapse below still costs one sublane re-pack per tap;
            # a flattened-(W+2) pl.ds-offset LHS would remove it at the cost of junk columns.
            tap = x_ref[1 + sy:1 + sy + TH, 1 + sx:1 + sx + W, :].reshape(TH * W, C)
            part = jnp.dot(tap, w_ref[t], preferred_element_type=jnp.float32)
            acc = part if acc is None else acc + part
            t += 1
    acc = acc + b_ref[...]                        # single hoisted bias add ([bt x4 | bf])
    conv_t = jnp.maximum(acc[:, :4 * Co], 0.0)    # relu(ConvTranspose2d), parity-packed
    fc = acc[:, 4 * Co:]                          # 1x1 branch; nearest-up == copy to parities
    out = conv_t + jnp.concatenate([fc, fc, fc, fc], axis=-1)
    o_ref[...] = out.astype(o_ref.dtype)          # one lane-dense (TH*W, 4*Co) bf16 store


def _vmem_limit_bytes():
    try:
        cap = pltpu.get_tpu_info().vmem_capacity_bytes
    except Exception:
        cap = 128 * 1024 * 1024
    return min(int(cap * 3 // 4), 100 * 1024 * 1024)   # ~48 MiB on v7x, ~96 MiB on v5e/v6e


def _pick_tile_h(H, W, C, budget_bytes=20 * 1024 * 1024):
    """Largest divisor of H whose rough per-step VMEM footprint fits the budget."""
    per_row = 56 * W * C   # bytes: in(db,bf16) + 9 taps(bf16) + acc(f32,5Co) + out(f32 + db bf16)
    divs = sorted((d for d in range(1, H + 1) if H % d == 0), reverse=True)
    for th in divs:
        if th * per_row <= budget_bytes and (th == H or (th * W) % 8 == 0):
            return th
    for th in reversed(divs):                       # nothing fits: smallest layout-friendly tile
        if th == H or (th * W) % 8 == 0:
            return th
    return H


def upres_pallas(x, Wt, bt, Wf, bf):
    """x: (N, C, H, W) f32 -> (N, C//2, 2H, 2W) f32 (matches the PyTorch UpRes forward)."""
    N, C, H, W = x.shape
    Co = C // 2
    TH = _pick_tile_h(H, W, C)
    nt = H // TH

    # --- pre-pass (one fused XLA pass): NCHW->NHWC, zero pad, bf16 cast, halo'd row windows.
    # TODO(synk): if the upstream producer emits NHWC bf16, drop the transpose/cast and pad
    # in-kernel (edge masking) so no padded copy is ever written to HBM.
    x_nhwc = jnp.transpose(x, (0, 2, 3, 1))
    x_pad = jnp.pad(x_nhwc, ((0, 0), (1, 1), (1, 1), (0, 0))).astype(jnp.bfloat16)
    if nt == 1:
        x_tiles = x_pad[:, None]                                            # (N, 1, H+2, W+2, C)
    else:
        x_tiles = jnp.stack([x_pad[:, i * TH:i * TH + TH + 2] for i in range(nt)],
                            axis=1)                                         # (N, nt, TH+2, W+2, C)

    w_packed = _pack_weights(Wt, Wf, C, Co).astype(jnp.bfloat16)            # (9, C, 5Co)
    b_packed = jnp.concatenate([bt, bt, bt, bt, bf]).reshape(1, 5 * Co).astype(jnp.float32)

    kernel = functools.partial(_upres_kernel, TH=TH, W=W, C=C, Co=Co)
    out_flat = pl.pallas_call(
        kernel,
        out_shape=jax.ShapeDtypeStruct((N, H * W, 4 * Co), jnp.bfloat16),
        grid_spec=pltpu.PrefetchScalarGridSpec(
            num_scalar_prefetch=0,
            grid=(N, nt),
            in_specs=[
                pl.BlockSpec((None, None, TH + 2, W + 2, C), lambda n, i: (n, i, 0, 0, 0)),
                pl.BlockSpec((9, C, 5 * Co), lambda n, i: (0, 0, 0)),
                pl.BlockSpec((1, 5 * Co), lambda n, i: (0, 0)),
            ],
            out_specs=pl.BlockSpec((None, TH * W, 4 * Co), lambda n, i: (n, i, 0)),
        ),
        compiler_params=pltpu.CompilerParams(
            dimension_semantics=("parallel", "parallel"),
            vmem_limit_bytes=_vmem_limit_bytes()),
    )(x_tiles, w_packed, b_packed)

    # --- epilogue: single transpose interleaving parities, NCHW + f32 for PyTorch parity.
    # TODO(synk): downstream consumers could take the packed (N, H*W, 4*Co) bf16 slab directly
    # and skip this full-size pass.
    o = out_flat.reshape(N, H, W, 2, 2, Co)          # (n, h, w, ry, rx, co)
    o = jnp.transpose(o, (0, 5, 1, 3, 2, 4))         # (n, co, h, ry, w, rx)
    return o.reshape(N, Co, 2 * H, 2 * W).astype(jnp.float32)


def upres_reference(x, Wt, bt, Wf, bf):
    """Pure-numpy reference implementing the PyTorch forward exactly."""
    N, C, H, W = x.shape
    Co = Wt.shape[1]
    out_t = np.zeros((N, Co, 2 * H, 2 * W), np.float32) + bt.reshape(1, Co, 1, 1)
    iy = np.arange(H)
    ix = np.arange(W)
    for ky in range(4):
        oy = 2 * iy - 1 + ky
        vy = (oy >= 0) & (oy < 2 * H)
        for kx in range(4):
            ox = 2 * ix - 1 + kx
            vx = (ox >= 0) & (ox < 2 * W)
            contrib = np.einsum('nchw,cd->ndhw', x, Wt[:, :, ky, kx])
            out_t[np.ix_(np.arange(N), np.arange(Co), oy[vy], ox[vx])] += \
                contrib[np.ix_(np.arange(N), np.arange(Co), iy[vy], ix[vx])]
    fc = np.einsum('nchw,dc->ndhw', x, Wf[:, :, 0, 0]) + bf.reshape(1, Co, 1, 1)
    fc_up = np.repeat(np.repeat(fc, 2, axis=2), 2, axis=3)
    return fc_up + np.maximum(out_t, 0.0)


if __name__ == "__main__":
    # small shapes consistent with the module: out_c = 4, batch 2, 16x16 spatial
    N, C, H, W = 2, 4, 16, 16
    Co = C // 2

    kx, k1, k2, k3, k4 = jax.random.split(jax.random.PRNGKey(0), 5)
    x = jax.random.normal(kx, (N, C, H, W), jnp.float32)
    Wt = jax.random.normal(k1, (C, Co, 4, 4), jnp.float32) * 0.1   # ConvTranspose2d weight
    bt = jax.random.normal(k2, (Co,), jnp.float32) * 0.1           # ConvTranspose2d bias
    Wf = jax.random.normal(k3, (Co, C, 1, 1), jnp.float32) * 0.1   # Conv2d 1x1 weight
    bf = jax.random.normal(k4, (Co,), jnp.float32) * 0.1           # Conv2d 1x1 bias

    out = jax.jit(upres_pallas)(x, Wt, bt, Wf, bf)
    out = jax.block_until_ready(out)

    ref = upres_reference(np.asarray(x), np.asarray(Wt), np.asarray(bt),
                          np.asarray(Wf), np.asarray(bf))
    np.testing.assert_allclose(np.asarray(out), ref, rtol=3e-2, atol=3e-2)

    print("KERNEL_OK")
</pallas_src>

<mosaic_0001>
module attributes {stable_mosaic.version = 11 : i64} {
  func.func @_upres_kernel(%arg0: i32, %arg1: i32, %arg2: memref<1x1x18x18x4xbf16, #tpu.memory_space<vmem>>, %arg3: memref<9x4x10xbf16, #tpu.memory_space<vmem>>, %arg4: memref<1x10xf32, #tpu.memory_space<vmem>>, %arg5: memref<1x256x8xbf16, #tpu.memory_space<vmem>>) attributes {dimension_semantics = [#tpu.dimension_semantics<parallel>, #tpu.dimension_semantics<parallel>], iteration_bounds = array<i64: 2, 1>, scalar_prefetch = 0 : i64, scratch_operands = 0 : i64, tpu.core_type = #tpu.core_type<tc>, window_params = [{transform_indices = @transform_0, window_bounds = array<i64: 1, 1, 18, 18, 4>}, {pipeline_mode = #tpu.pipeline_mode<synchronous>, transform_indices = @transform_1, window_bounds = array<i64: 9, 4, 10>}, {pipeline_mode = #tpu.pipeline_mode<synchronous>, transform_indices = @transform_2, window_bounds = array<i64: 1, 10>}, {transform_indices = @transform_3, window_bounds = array<i64: 1, 256, 8>}]} {
    %c0 = arith.constant 0 : index
    %c0_0 = arith.constant 0 : index
    %c0_1 = arith.constant 0 : index
    %c0_2 = arith.constant 0 : index
    %c0_3 = arith.constant 0 : index
    %0 = vector.load %arg2[%c0, %c0_0, %c0_1, %c0_2, %c0_3] : memref<1x1x18x18x4xbf16, #tpu.memory_space<vmem>>, vector<1x1x16x16x4xbf16>
    %1 = vector.shape_cast %0 : vector<1x1x16x16x4xbf16> to vector<16x16x4xbf16>
    %2 = vector.shape_cast %1 : vector<16x16x4xbf16> to vector<256x4xbf16>
    %c0_4 = arith.constant 0 : index
    %c0_5 = arith.constant 0 : index
    %c0_6 = arith.constant 0 : index
    %3 = vector.load %arg3[%c0_4, %c0_5, %c0_6] : memref<9x4x10xbf16, #tpu.memory_space<vmem>>, vector<1x4x10xbf16>
    %4 = vector.shape_cast %3 : vector<1x4x10xbf16> to vector<4x10xbf16>
    %cst = arith.constant dense<0.000000e+00> : vector<256x10xf32>
    %5 = tpu.matmul %2, %4, %cst {dimension_numbers = #tpu.dot_dimension_numbers<[1], [0], [0], [1], [0, 0, 1, 1], [], []>} : vector<256x4xbf16>, vector<4x10xbf16>, vector<256x10xf32> -> vector<256x10xf32>
    %c0_7 = arith.constant 0 : index
    %c0_8 = arith.constant 0 : index
    %c0_9 = arith.constant 0 : index
    %c1 = arith.constant 1 : index
    %c0_10 = arith.constant 0 : index
    %6 = vector.load %arg2[%c0_7, %c0_8, %c0_9, %c1, %c0_10] : memref<1x1x18x18x4xbf16, #tpu.memory_space<vmem>>, vector<1x1x16x16x4xbf16>
    %7 = vector.shape_cast %6 : vector<1x1x16x16x4xbf16> to vector<16x16x4xbf16>
    %8 = vector.shape_cast %7 : vector<16x16x4xbf16> to vector<256x4xbf16>
    %c1_11 = arith.constant 1 : index
    %c0_12 = arith.constant 0 : index
    %c0_13 = arith.constant 0 : index
    %9 = vector.load %arg3[%c1_11, %c0_12, %c0_13] : memref<9x4x10xbf16, #tpu.memory_space<vmem>>, vector<1x4x10xbf16>
    %10 = vector.shape_cast %9 : vector<1x4x10xbf16> to vector<4x10xbf16>
    %cst_14 = arith.constant dense<0.000000e+00> : vector<256x10xf32>
    %11 = tpu.matmul %8, %10, %cst_14 {dimension_numbers = #tpu.dot_dimension_numbers<[1], [0], [0], [1], [0, 0, 1, 1], [], []>} : vector<256x4xbf16>, vector<4x10xbf16>, vector<256x10xf32> -> vector<256x10xf32>
    %12 = arith.addf %5, %11 : vector<256x10xf32>
    %c0_15 = arith.constant 0 : index
    %c0_16 = arith.constant 0 : index
    %c0_17 = arith.constant 0 : index
    %c2 = arith.constant 2 : index
    %c0_18 = arith.constant 0 : index
    %13 = vector.load %arg2[%c0_15, %c0_16, %c0_17, %c2, %c0_18] : memref<1x1x18x18x4xbf16, #tpu.memory_space<vmem>>, vector<1x1x16x16x4xbf16>
    %14 = vector.shape_cast %13 : vector<1x1x16x16x4xbf16> to vector<16x16x4xbf16>
    %15 = vector.shape_cast %14 : vector<16x16x4xbf16> to vector<256x4xbf16>
    %c2_19 = arith.constant 2 : index
    %c0_20 = arith.constant 0 : index
    %c0_21 = arith.constant 0 : index
    %16 = vector.load %arg3[%c2_19, %c0_20, %c0_21] : memref<9x4x10xbf16, #tpu.memory_space<vmem>>, vector<1x4x10xbf16>
    %17 = vector.shape_cast %16 : vector<1x4x10xbf16> to vector<4x10xbf16>
    %cst_22 = arith.constant dense<0.000000e+00> : vector<256x10xf32>
    %18 = tpu.matmul %15, %17, %cst_22 {dimension_numbers = #tpu.dot_dimension_numbers<[1], [0], [0], [1], [0, 0, 1, 1], [], []>} : vector<256x4xbf16>, vector<4x10xbf16>, vector<256x10xf32> -> vector<256x10xf32>
    %19 = arith.addf %12, %18 : vector<256x10xf32>
    %c0_23 = arith.constant 0 : index
    %c0_24 = arith.constant 0 : index
    %c1_25 = arith.constant 1 : index
    %c0_26 = arith.constant 0 : index
    %c0_27 = arith.constant 0 : index
    %20 = vector.load %arg2[%c0_23, %c0_24, %c1_25, %c0_26, %c0_27] : memref<1x1x18x18x4xbf16, #tpu.memory_space<vmem>>, vector<1x1x16x16x4xbf16>
    %21 = vector.shape_cast %20 : vector<1x1x16x16x4xbf16> to vector<16x16x4xbf16>
    %22 = vector.shape_cast %21 : vector<16x16x4xbf16> to vector<256x4xbf16>
    %c3 = arith.constant 3 : index
    %c0_28 = arith.constant 0 : index
    %c0_29 = arith.constant 0 : index
    %23 = vector.load %arg3[%c3, %c0_28, %c0_29] : memref<9x4x10xbf16, #tpu.memory_space<vmem>>, vector<1x4x10xbf16>
    %24 = vector.shape_cast %23 : vector<1x4x10xbf16> to vector<4x10xbf16>
    %cst_30 = arith.constant dense<0.000000e+00> : vector<256x10xf32>
    %25 = tpu.matmul %22, %24, %cst_30 {dimension_numbers = #tpu.dot_dimension_numbers<[1], [0], [0], [1], [0, 0, 1, 1], [], []>} : vector<256x4xbf16>, vector<4x10xbf16>, vector<256x10xf32> -> vector<256x10xf32>
    %26 = arith.addf %19, %25 : vector<256x10xf32>
    %c0_31 = arith.constant 0 : index
    %c0_32 = arith.constant 0 : index
    %c1_33 = arith.constant 1 : index
    %c1_34 = arith.constant 1 : index
    %c0_35 = arith.constant 0 : index
    %27 = vector.load %arg2[%c0_31, %c0_32, %c1_33, %c1_34, %c0_35] : memref<1x1x18x18x4xbf16, #tpu.memory_space<vmem>>, vector<1x1x16x16x4xbf16>
    %28 = vector.shape_cast %27 : vector<1x1x16x16x4xbf16> to vector<16x16x4xbf16>
    %29 = vector.shape_cast %28 : vector<16x16x4xbf16> to vector<256x4xbf16>
    %c4 = arith.constant 4 : index
    %c0_36 = arith.constant 0 : index
    %c0_37 = arith.constant 0 : index
    %30 = vector.load %arg3[%c4, %c0_36, %c0_37] : memref<9x4x10xbf16, #tpu.memory_space<vmem>>, vector<1x4x10xbf16>
    %31 = vector.shape_cast %30 : vector<1x4x10xbf16> to vector<4x10xbf16>
    %cst_38 = arith.constant dense<0.000000e+00> : vector<256x10xf32>
    %32 = tpu.matmul %29, %31, %cst_38 {dimension_numbers = #tpu.dot_dimension_numbers<[1], [0], [0], [1], [0, 0, 1, 1], [], []>} : vector<256x4xbf16>, vector<4x10xbf16>, vector<256x10xf32> -> vector<256x10xf32>
    %33 = arith.addf %26, %32 : vector<256x10xf32>
    %c0_39 = arith.constant 0 : index
    %c0_40 = arith.constant 0 : index
    %c1_41 = arith.constant 1 : index
    %c2_42 = arith.constant 2 : index
    %c0_43 = arith.constant 0 : index
    %34 = vector.load %arg2[%c0_39, %c0_40, %c1_41, %c2_42, %c0_43] : memref<1x1x18x18x4xbf16, #tpu.memory_space<vmem>>, vector<1x1x16x16x4xbf16>
    %35 = vector.shape_cast %34 : vector<1x1x16x16x4xbf16> to vector<16x16x4xbf16>
    %36 = vector.shape_cast %35 : vector<16x16x4xbf16> to vector<256x4xbf16>
    %c5 = arith.constant 5 : index
    %c0_44 = arith.constant 0 : index
    %c0_45 = arith.constant 0 : index
    %37 = vector.load %arg3[%c5, %c0_44, %c0_45] : memref<9x4x10xbf16, #tpu.memory_space<vmem>>, vector<1x4x10xbf16>
    %38 = vector.shape_cast %37 : vector<1x4x10xbf16> to vector<4x10xbf16>
    %cst_46 = arith.constant dense<0.000000e+00> : vector<256x10xf32>
    %39 = tpu.matmul %36, %38, %cst_46 {dimension_numbers = #tpu.dot_dimension_numbers<[1], [0], [0], [1], [0, 0, 1, 1], [], []>} : vector<256x4xbf16>, vector<4x10xbf16>, vector<256x10xf32> -> vector<256x10xf32>
    %40 = arith.addf %33, %39 : vector<256x10xf32>
    %c0_47 = arith.constant 0 : index
    %c0_48 = arith.constant 0 : index
    %c2_49 = arith.constant 2 : index
    %c0_50 = arith.constant 0 : index
    %c0_51 = arith.constant 0 : index
    %41 = vector.load %arg2[%c0_47, %c0_48, %c2_49, %c0_50, %c0_51] : memref<1x1x18x18x4xbf16, #tpu.memory_space<vmem>>, vector<1x1x16x16x4xbf16>
    %42 = vector.shape_cast %41 : vector<1x1x16x16x4xbf16> to vector<16x16x4xbf16>
    %43 = vector.shape_cast %42 : vector<16x16x4xbf16> to vector<256x4xbf16>
    %c6 = arith.constant 6 : index
    %c0_52 = arith.constant 0 : index
    %c0_53 = arith.constant 0 : index
    %44 = vector.load %arg3[%c6, %c0_52, %c0_53] : memref<9x4x10xbf16, #tpu.memory_space<vmem>>, vector<1x4x10xbf16>
    %45 = vector.shape_cast %44 : vector<1x4x10xbf16> to vector<4x10xbf16>
    %cst_54 = arith.constant dense<0.000000e+00> : vector<256x10xf32>
    %46 = tpu.matmul %43, %45, %cst_54 {dimension_numbers = #tpu.dot_dimension_numbers<[1], [0], [0], [1], [0, 0, 1, 1], [], []>} : vector<256x4xbf16>, vector<4x10xbf16>, vector<256x10xf32> -> vector<256x10xf32>
    %47 = arith.addf %40, %46 : vector<256x10xf32>
    %c0_55 = arith.constant 0 : index
    %c0_56 = arith.constant 0 : index
    %c2_57 = arith.constant 2 : index
    %c1_58 = arith.constant 1 : index
    %c0_59 = arith.constant 0 : index
    %48 = vector.load %arg2[%c0_55, %c0_56, %c2_57, %c1_58, %c0_59] : memref<1x1x18x18x4xbf16, #tpu.memory_space<vmem>>, vector<1x1x16x16x4xbf16>
    %49 = vector.shape_cast %48 : vector<1x1x16x16x4xbf16> to vector<16x16x4xbf16>
    %50 = vector.shape_cast %49 : vector<16x16x4xbf16> to vector<256x4xbf16>
    %c7 = arith.constant 7 : index
    %c0_60 = arith.constant 0 : index
    %c0_61 = arith.constant 0 : index
    %51 = vector.load %arg3[%c7, %c0_60, %c0_61] : memref<9x4x10xbf16, #tpu.memory_space<vmem>>, vector<1x4x10xbf16>
    %52 = vector.shape_cast %51 : vector<1x4x10xbf16> to vector<4x10xbf16>
    %cst_62 = arith.constant dense<0.000000e+00> : vector<256x10xf32>
    %53 = tpu.matmul %50, %52, %cst_62 {dimension_numbers = #tpu.dot_dimension_numbers<[1], [0], [0], [1], [0, 0, 1, 1], [], []>} : vector<256x4xbf16>, vector<4x10xbf16>, vector<256x10xf32> -> vector<256x10xf32>
    %54 = arith.addf %47, %53 : vector<256x10xf32>
    %c0_63 = arith.constant 0 : index
    %c0_64 = arith.constant 0 : index
    %c2_65 = arith.constant 2 : index
    %c2_66 = arith.constant 2 : index
    %c0_67 = arith.constant 0 : index
    %55 = vector.load %arg2[%c0_63, %c0_64, %c2_65, %c2_66, %c0_67] : memref<1x1x18x18x4xbf16, #tpu.memory_space<vmem>>, vector<1x1x16x16x4xbf16>
    %56 = vector.shape_cast %55 : vector<1x1x16x16x4xbf16> to vector<16x16x4xbf16>
    %57 = vector.shape_cast %56 : vector<16x16x4xbf16> to vector<256x4xbf16>
    %c8 = arith.constant 8 : index
    %c0_68 = arith.constant 0 : index
    %c0_69 = arith.constant 0 : index
    %58 = vector.load %arg3[%c8, %c0_68, %c0_69] : memref<9x4x10xbf16, #tpu.memory_space<vmem>>, vector<1x4x10xbf16>
    %59 = vector.shape_cast %58 : vector<1x4x10xbf16> to vector<4x10xbf16>
    %cst_70 = arith.constant dense<0.000000e+00> : vector<256x10xf32>
    %60 = tpu.matmul %57, %59, %cst_70 {dimension_numbers = #tpu.dot_dimension_numbers<[1], [0], [0], [1], [0, 0, 1, 1], [], []>} : vector<256x4xbf16>, vector<4x10xbf16>, vector<256x10xf32> -> vector<256x10xf32>
    %61 = arith.addf %54, %60 : vector<256x10xf32>
    %c0_71 = arith.constant 0 : index
    %c0_72 = arith.constant 0 : index
    %62 = vector.load %arg4[%c0_71, %c0_72] : memref<1x10xf32, #tpu.memory_space<vmem>>, vector<1x10xf32>
    %63 = vector.broadcast %62 : vector<1x10xf32> to vector<256x10xf32>
    %64 = arith.addf %61, %63 : vector<256x10xf32>
    %65 = vector.extract_strided_slice %64 {offsets = [0, 0], sizes = [256, 8], strides = [1, 1]} : vector<256x10xf32> to vector<256x8xf32>
    %cst_73 = arith.constant 0.000000e+00 : f32
    %66 = vector.broadcast %cst_73 : f32 to vector<256x8xf32>
    %67 = arith.maximumf %65, %66 : vector<256x8xf32>
    %68 = vector.extract_strided_slice %64 {offsets = [0, 8], sizes = [256, 2], strides = [1, 1]} : vector<256x10xf32> to vector<256x2xf32>
    %69 = tpu.concatenate %68, %68, %68, %68 in 1 : vector<256x2xf32>, vector<256x2xf32>, vector<256x2xf32>, vector<256x2xf32> -> vector<256x8xf32>
    %70 = arith.addf %67, %69 : vector<256x8xf32>
    %71 = arith.truncf %70 : vector<256x8xf32> to vector<256x8xbf16>
    %c0_74 = arith.constant 0 : index
    %c0_75 = arith.constant 0 : index
    %c0_76 = arith.constant 0 : index
    %72 = vector.load %arg5[%c0_74, %c0_75, %c0_76] : memref<1x256x8xbf16, #tpu.memory_space<vmem>>, vector<1x256x8xbf16>
    %73 = vector.shape_cast %72 : vector<1x256x8xbf16> to vector<256x8xbf16>
    %74 = vector.shape_cast %71 : vector<256x8xbf16> to vector<1x256x8xbf16>
    tpu.vector_store %arg5[%c0_74, %c0_75, %c0_76], %74 {strides = array<i32>} : memref<1x256x8xbf16, #tpu.memory_space<vmem>>, vector<1x256x8xbf16>,
    return
  }
  func.func @transform_0(%arg0: i32, %arg1: i32) -> (i32, i32, i32, i32, i32) {
    %c0_i32 = arith.constant 0 : i32
    %c0_i32_0 = arith.constant 0 : i32
    %c0_i32_1 = arith.constant 0 : i32
    %c0_i32_2 = arith.constant 0 : i32
    return %arg0, %arg1, %c0_i32, %c0_i32_0, %c0_i32_1 : i32, i32, i32, i32, i32
  }
  func.func @transform_1(%arg0: i32, %arg1: i32) -> (i32, i32, i32) {
    %c0_i32 = arith.constant 0 : i32
    %c0_i32_0 = arith.constant 0 : i32
    %c0_i32_1 = arith.constant 0 : i32
    %c0_i32_2 = arith.constant 0 : i32
    return %c0_i32, %c0_i32_0, %c0_i32_1 : i32, i32, i32
  }
  func.func @transform_2(%arg0: i32, %arg1: i32) -> (i32, i32) {
    %c0_i32 = arith.constant 0 : i32
    %c0_i32_0 = arith.constant 0 : i32
    %c0_i32_1 = arith.constant 0 : i32
    return %c0_i32, %c0_i32_0 : i32, i32
  }
  func.func @transform_3(%arg0: i32, %arg1: i32) -> (i32, i32, i32) {
    %c0_i32 = arith.constant 0 : i32
    %c0_i32_0 = arith.constant 0 : i32
    return %arg0, %arg1, %c0_i32 : i32, i32, i32
  }
}

</mosaic_0001>

<bundles_post_ra>
// kernel: upres_pallas.1
= control target key start
LH: loop header
LB: loop body
LE: loop exit
PB: predicated region body
PF: predicated region fallthrough
CT: control target
= control target key end

     0   :  { %s5664_s12 = smov 0   ;;  %s5666_s13 = smov 0   ;;  %s7622_s0 = inlined_call_operand.vmem [shape: bf16[2,1,18,18,4], index: 0, kind: input, shape index: {}]   ;;  %s7623_s1 = inlined_call_operand.vmem [shape: bf16[9,4,10], index: 1, kind: input, shape index: {}]   ;;  %s7624_s2 = inlined_call_operand.vmem [shape: f32[1,10], index: 2, kind: input, shape index: {}]   ;;  %s7625_s3 = inlined_call_operand.vmem [shape: bf16[2,256,8], index: 3, kind: output, shape index: {}]  }
   0x1   :  { %s5668_s14 = smov 0  }
   0x2 LB: > { %s25_s15 = sadd.s32 1, %s5634_s13  ;;  %p4893_p0 = scmp.ge.s32.totalorder %s5638_s14, 1  ;;  %s5638_s14 = sphi %s5668_s14, %s13_s14   ;;  %s5634_s13 = sphi %s5666_s13, %s7637_s13   ;;  %s5630_s12 = sphi %s5664_s12, %s7636_s12  }
   0x3   : > { %p27_p1 = scmp.ge.s32.totalorder %s25_s15, 2  ;;  %p157_p2 = scmp.lt.s32.totalorder %s5638_s14, 3 }
   0x5   : > { %s7639_s15 = smov (%p27_p1, %s25_s15), 0  ;;  %p158_p3 = pnand %p4893_p0, %p157_p2 }
   0x7   : > { %161 = sbr.rel (%p158_p3) target bundleno = 966 (0x3c6), region = 32 }
   0xc   : > { %v4897_v0 = vld [vmem:[%s7623_s1 + $0x2] sm:$0x3]  ;;  %vm744_vm0 = vcmask 1041408   ;;  %p189_p4 = scmp.lt.s32.totalorder %s5630_s12, 1  ;;  %v5010_v2 = vld [vmem:[%s7623_s1 + $0x4] sm:$0x3] }
   0xd   : > { %v746_v1 = vsel %vm744_vm0, %v4897_v0, 0  ;;  %v1319_v3 = vsel %vm744_vm0, %v5010_v2, 0  ;;  %v5059_v4 = vld [vmem:[%s7623_s1 + $0x6] sm:$0x3]  ;;  %v241_v5 = vld [vmem:[%s7623_s1] sm:$0x3] }
   0xe   : > { %5532 = vmatpush.bf16.msra.mxu1 %v746_v1  ;;  %5533 = vmatpush.bf16.msra.mxu2 %v746_v1  ;;  %s7641_s12 = smov (!%p189_p4, %s5630_s12), 1  ;;  %v5188_v6 = vld [vmem:[%s7623_s1 + $0x8] sm:$0x3]  ;;  %v1606_v7 = vsel %vm744_vm0, %v5059_v4, 0  ;;  %v966_v8 = vsel %vm744_vm0, %v241_v5, 0  ;;  %vm695_vm4 = vcmask 31744  }
   0xf   : > { %5534 = vmatpush.bf16.msra.mxu3 %v746_v1  ;;  %755 = vmatpush.bf16.msra.mxu0 %v746_v1  ;;  %s5535_s26 = smul.u32 216, %s7641_s12  ;;  %v2260_v9 = vsel %vm744_vm0, %v5188_v6, 0  ;;  %vm258_vm1 = vsmask.f32 3328  ;;  %vm259_vm2 = vsmask.f32 7440 }
  0x10   : > { %vm5720_vm3 = vmor %vm258_vm1, %vm259_vm2  ;;  %vm1105_vm5 = vcmask 1042432   ;;  %vm1106_vm6 = vcmask 1046532   ;;  %s5640_s17 = smov 124   ;;  %s5641_s18 = smov 122   ;;  %vm4604_vm8 = vcmask 15360   ;;  %vm4669_vm9 = vcmask 48128  }
  0x11   : > { %s5708_s29 = scalar_lea.vmem %s7622_s0, %s5535_s26  ;;  %vm5894_vm7 = vmor %vm1105_vm5, %vm1106_vm6  ;;  %s5642_s19 = smov 120   ;;  %vm4766_vm10 = vcmask 60416  }
  0x12   : > { %1328 = vmatpush.bf16.msrb.mxu2 %v1319_v3  ;;  %975 = vmatpush.bf16.msrb.mxu1 %v966_v8  ;;  %v217_v10 = vld [vmem:[%s5708_s29 + $0x30] sm:$0xf]  ;;  %v218_v11 = vld [vmem:[%s5708_s29 + $0x34] sm:$0xf]  ;;  %v246_v12 = vld [vmem:[%s5708_s29 + $0x38] sm:$0x1] }
  0x13   : > { %1615 = vmatpush.bf16.msrb.mxu3 %v1606_v7  ;;  %2269 = vmatpush.bf16.msrb.mxu0 %v2260_v9  ;;  %v358_v13 = vshrl.u32 %v217_v10, 16  ;;  %v361_v14 = vshll.u32 %v217_v10, 16  ;;  %v367_v15 = vshll.u32 %v218_v11, 16  ;;  %v371_v16 = vshrl.u32 %v218_v11, 16  ;;  %v225_v17 = vld [vmem:[%s5708_s29 + $0x60] sm:$0xf] }
  0x14   : > { %v377_v18 = vshll.u32 %v246_v12, 16  ;;  %v226_v19 = vld [vmem:[%s5708_s29 + $0x64] sm:$0xf]  ;;  %v250_v20 = vld [vmem:[%s5708_s29 + $0x68] sm:$0x1]  ;;  %v454_v21 = vshrl.u32 %v225_v17, 16 }
  0x15   : > { %v360_v22 = vrot.slane %v358_v13, 4  ;;  %v363_v23 = vrot.slane %v361_v14, 5  ;;  %v369_v24 = vrot.slane %v367_v15, 5  ;;  %v373_v25 = vrot.slane %v371_v16, 4  ;;  %v233_v26 = vld [vmem:[%s5708_s29 + $0x90] sm:$0xf] }
  0x16   : > { %v379_v27 = vrot.slane %v377_v18, 5  ;;  %v456_v28 = vrot.slane %v454_v21, 4  ;;  %v457_v29 = vshll.u32 %v225_v17, 16  ;;  %v463_v30 = vshll.u32 %v226_v19, 16  ;;  %v234_v35 = vld [vmem:[%s5708_s29 + $0x94] sm:$0xf] }
  0x17   : > { %v364_v31 = vor.u32 %v363_v23, %v360_v22  ;;  %v374_v32 = vor.u32 %v373_v25, %v369_v24  ;;  %v467_v33 = vshrl.u32 %v226_v19, 16  ;;  %v473_v34 = vshll.u32 %v250_v20, 16  ;;  %v254_v45 = vld [vmem:[%s5708_s29 + $0x98] sm:$0x1]  ;;  %v209_v61 = vld [vmem:[%s5708_s29] sm:$0xf] }
  0x18   : > { %v459_v37 = vrot.slane %v457_v29, 5  ;;  %v465_v38 = vrot.slane %v463_v30, 5  ;;  %v550_v39 = vshrl.u32 %v233_v26, 16  ;;  %v553_v47 = vshll.u32 %v233_v26, 16  ;;  %v5733_v1 = vld [vmem:[%s5708_s29 + $0x4] sm:$0xf] }
  0x19   : > { %v365_v40 = vrot.slane %v364_v31, 4  ;;  %v375_v41 = vrot.slane %v374_v32, 4  ;;  %v469_v42 = vrot.slane %v467_v33, 4  ;;  %v475_v43 = vrot.slane %v473_v34, 5  ;;  %v5736_v2 = vld [vmem:[%s5708_s29 + $0x8] sm:$0x1] }
  0x1a   : > { %v460_v44 = vor.u32 %v459_v37, %v456_v28  ;;  %v552_v46 = vrot.slane %v550_v39, 4  ;;  %v559_v48 = vshll.u32 %v234_v35, 16  ;;  %v563_v52 = vshrl.u32 %v234_v35, 16  ;;  %v219_v19 = vld [vmem:[%s5708_s29 + $0x3c] sm:$0xf]  ;;  %s5643_s20 = smov 126  }
  0x1b   : > { %v370_v49 = vsel %vm5720_vm3, %v365_v40, %v369_v24  ;;  %v380_v50 = vsel %vm5720_vm3, %v375_v41, %v379_v27  ;;  %v470_v51 = vor.u32 %v469_v42, %v465_v38  ;;  %v555_v56 = vrot.slane %v553_v47, 5  ;;  %v5748_v20 = vld [vmem:[%s5708_s29 + $0x40] sm:$0xf]  ;;  %v5753_v25 = vld [vmem:[%s5708_s29 + $0x44] sm:$0x1]  ;;  %s5483_s21 = sshll.u32 %s7641_s12, 7 }
  0x1c   : > { %v655_v53 = vunpack.c.l.b16 %v370_v49  ;;  %v656_v54 = vunpack.c.l.b16 %v380_v50  ;;  %v461_v55 = vrot.slane %v460_v44, 4  ;;  %v561_v58 = vrot.slane %v559_v48, 5  ;;  %v227_v33 = vld [vmem:[%s5708_s29 + $0x6c] sm:$0xf]  ;;  %v251_v47 = vld [vmem:[%s5708_s29 + $0x74] sm:$0x1]  ;;  %s7122_s24 = scalar_lea.vmem %s7625_s3, %s5483_s21 }
  0x1d   : > { %v471_v57 = vrot.slane %v470_v51, 4  ;;  %v565_v59 = vrot.slane %v563_v52, 4  ;;  %v569_v60 = vshll.u32 %v254_v45, 16  ;;  %v556_v0 = vor.u32 %v555_v56, %v552_v46 }
  0x1e   : > { %v683_v62 = vpack.c.b16 %v656_v54, %v655_v53  ;;  %v466_v63 = vsel %vm5720_vm3, %v461_v55, %v465_v38  ;;  %v262_v9 = vshrl.u32 %v209_v61, 16  ;;  %v265_v10 = vshll.u32 %v209_v61, 16  ;;  %v235_v61 = vld [vmem:[%s5708_s29 + $0x9c] sm:$0xf] }
  0x1f   : > { %v476_v3 = vsel %vm5720_vm3, %v471_v57, %v475_v43  ;;  %v663_v4 = vunpack.c.l.b16 %v466_v63  ;;  %v566_v5 = vor.u32 %v565_v59, %v561_v58  ;;  %v571_v6 = vrot.slane %v569_v60, 5  ;;  %v228_v43 = vld [vmem:[%s5708_s29 + $0x70] sm:$0xf] }
  0x20   : > { %4902 = vmatmul.msk.bf16.vlgmr.msra.gmra.mxu1 %vm695_vm4, %v683_v62  ;;  %v664_v7 = vunpack.c.l.b16 %v476_v3  ;;  %v557_v8 = vrot.slane %v556_v0, 4  ;;  %v271_v12 = vshll.u32 %v5733_v1, 16  ;;  %v275_v13 = vshrl.u32 %v5733_v1, 16  ;;  %v236_v3 = vld [vmem:[%s5708_s29 + $0xa0] sm:$0xf] }
  0x21   : > { %v567_v11 = vrot.slane %v566_v5, 4  ;;  %v281_v14 = vshll.u32 %v5736_v2, 16  ;;  %v264_v17 = vrot.slane %v262_v9, 4  ;;  %v267_v18 = vrot.slane %v265_v10, 5 }
  0x22   : > { %v687_v15 = vpack.c.b16 %v664_v7, %v663_v4  ;;  %v562_v16 = vsel %vm5720_vm3, %v557_v8, %v561_v58  ;;  %v273_v23 = vrot.slane %v271_v12, 5  ;;  %v277_v24 = vrot.slane %v275_v13, 4  ;;  %v255_v8 = vld [vmem:[%s5708_s29 + $0xa4] sm:$0x1] }
  0x23   : > { %v572_v21 = vsel %vm5720_vm3, %v567_v11, %v571_v6  ;;  %v671_v22 = vunpack.c.l.b16 %v562_v16  ;;  %v268_v27 = vor.u32 %v267_v18, %v264_v17  ;;  %v283_v28 = vrot.slane %v281_v14, 5 }
  0x24   : > { %4906 = vmatmul.msk.bf16.vlgmr.msra.gmra.mxu2 %vm695_vm4, %v687_v15  ;;  %v672_v26 = vunpack.c.l.b16 %v572_v21  ;;  %v278_v29 = vor.u32 %v277_v24, %v273_v23  ;;  %v382_v30 = vshrl.u32 %v219_v19, 16  ;;  %v385_v31 = vshll.u32 %v219_v19, 16 }
  0x25   : > { %v391_v32 = vshll.u32 %v5748_v20, 16  ;;  %v269_v35 = vrot.slane %v268_v27, 4  ;;  %v395_v37 = vshrl.u32 %v5748_v20, 16  ;;  %v401_v38 = vshll.u32 %v5753_v25, 16 }
  0x26   : > { %v691_v34 = vpack.c.b16 %v672_v26, %v671_v22  ;;  %v279_v39 = vrot.slane %v278_v29, 4  ;;  %v384_v40 = vrot.slane %v382_v30, 4  ;;  %v387_v41 = vrot.slane %v385_v31, 5  ;;  %v211_v22 = vld [vmem:[%s5708_s29 + $0xc] sm:$0xf] }
  0x27   : > { %v393_v42 = vrot.slane %v391_v32, 5  ;;  %v274_v44 = vsel %vm5720_vm3, %v269_v35, %v273_v23  ;;  %v397_v45 = vrot.slane %v395_v37, 4  ;;  %v403_v46 = vrot.slane %v401_v38, 5  ;;  %v5782_v32 = vld [vmem:[%s5708_s29 + $0x14] sm:$0x1] }
  0x28   : > { %4910 = vmatmul.msk.bf16.vlgmr.msra.gmra.mxu3 %vm695_vm4, %v691_v34  ;;  %v478_v48 = vshrl.u32 %v227_v33, 16  ;;  %v284_v49 = vsel %vm5720_vm3, %v279_v39, %v283_v28  ;;  %v647_v50 = vunpack.c.l.b16 %v274_v44  ;;  %v388_v51 = vor.u32 %v387_v41, %v384_v40  ;;  %v5779_v28 = vld [vmem:[%s5708_s29 + $0x10] sm:$0xf] }
  0x29   : > { %v481_v52 = vshll.u32 %v227_v33, 16  ;;  %v648_v53 = vunpack.c.l.b16 %v284_v49  ;;  %v398_v54 = vor.u32 %v397_v45, %v393_v42  ;;  %v487_v56 = vshll.u32 %v228_v43, 16 }
  0x2a   : > { %v480_v55 = vrot.slane %v478_v48, 4  ;;  %v389_v57 = vrot.slane %v388_v51, 4  ;;  %v491_v59 = vshrl.u32 %v228_v43, 16  ;;  %v497_v60 = vshll.u32 %v251_v47, 16  ;;  %v5792_v47 = vld [vmem:[%s5708_s29 + $0x4c] sm:$0xf] }
  0x2b   : > { %v483_v58 = vrot.slane %v481_v52, 5  ;;  %v679_v62 = vpack.c.b16 %v648_v53, %v647_v50  ;;  %v399_v63 = vrot.slane %v398_v54, 4  ;;  %v489_v0 = vrot.slane %v487_v56, 5  ;;  %v5797_v56 = vld [vmem:[%s5708_s29 + $0x50] sm:$0x1] }
  0x2c   : > { %v394_v4 = vsel %vm5720_vm3, %v389_v57, %v393_v42  ;;  %v493_v6 = vrot.slane %v491_v59, 4  ;;  %v499_v7 = vrot.slane %v497_v60, 5  ;;  %v574_v11 = vshrl.u32 %v235_v61, 16  ;;  %v221_v42 = vld [vmem:[%s5708_s29 + $0x48] sm:$0xf] }
  0x2d   : > { %v484_v5 = vor.u32 %v483_v58, %v480_v55  ;;  %4898 = vmatmul.msk.bf16.vlgmr.msra.gmra.mxu0 %vm695_vm4, %v679_v62  ;;  %v404_v9 = vsel %vm5720_vm3, %v399_v63, %v403_v46  ;;  %v657_v10 = vunpack.c.l.b16 %v394_v4  ;;  %v577_v12 = vshll.u32 %v235_v61, 16 }
  0x2e   : > { %v658_v13 = vunpack.c.l.b16 %v404_v9  ;;  %v494_v15 = vor.u32 %v493_v6, %v489_v0  ;;  %v583_v16 = vshll.u32 %v236_v3, 16  ;;  %v576_v17 = vrot.slane %v574_v11, 4 }
  0x2f   : > { %v485_v14 = vrot.slane %v484_v5, 4  ;;  %v579_v18 = vrot.slane %v577_v12, 5  ;;  %v587_v19 = vshrl.u32 %v236_v3, 16  ;;  %v593_v21 = vshll.u32 %v255_v8, 16  ;;  %v229_v3 = vld [vmem:[%s5708_s29 + $0x78] sm:$0xf] }
  0x30   : > { %v684_v23 = vpack.c.b16 %v658_v13, %v657_v10  ;;  %v495_v26 = vrot.slane %v494_v15, 4  ;;  %v585_v27 = vrot.slane %v583_v16, 5  ;;  %v286_v35 = vshrl.u32 %v211_v22, 16  ;;  %v230_v8 = vld [vmem:[%s5708_s29 + $0x7c] sm:$0xf] }
  0x31   : > { %v490_v24 = vsel %vm5720_vm3, %v485_v14, %v489_v0  ;;  %v580_v30 = vor.u32 %v579_v18, %v576_v17  ;;  %v589_v31 = vrot.slane %v587_v19, 4  ;;  %v595_v34 = vrot.slane %v593_v21, 5  ;;  %v252_v16 = vld [vmem:[%s5708_s29 + $0x80] sm:$0x1] }
  0x32   : > { %v665_v29 = vunpack.c.l.b16 %v490_v24  ;;  %4903 = vmatmul.msk.bf16.gmra.mxu1 %vm695_vm4, %v684_v23  ;;  %v500_v33 = vsel %vm5720_vm3, %v495_v26, %v499_v7  ;;  %v289_v37 = vshll.u32 %v211_v22, 16  ;;  %v295_v41 = vshll.u32 %v5779_v28, 16 }
  0x33   : > { %v666_v38 = vunpack.c.l.b16 %v500_v33  ;;  %v581_v39 = vrot.slane %v580_v30, 4  ;;  %v590_v40 = vor.u32 %v589_v31, %v585_v27  ;;  %v288_v43 = vrot.slane %v286_v35, 4 }
  0x34   : > { %v291_v44 = vrot.slane %v289_v37, 5  ;;  %v299_v45 = vshrl.u32 %v5779_v28, 16  ;;  %v305_v46 = vshll.u32 %v5782_v32, 16  ;;  %v297_v51 = vrot.slane %v295_v41, 5 }
  0x35   : > { %v688_v48 = vpack.c.b16 %v666_v38, %v665_v29  ;;  %v586_v49 = vsel %vm5720_vm3, %v581_v39, %v585_v27  ;;  %v591_v50 = vrot.slane %v590_v40, 4  ;;  %v406_v58 = vshrl.u32 %v221_v42, 16  ;;  %v238_v39 = vld [vmem:[%s5708_s29 + $0xac] sm:$0xf]  ;;  %v256_v40 = vld [vmem:[%s5708_s29 + $0xb0] sm:$0x1] }
  0x36   : > { %v673_v52 = vunpack.c.l.b16 %v586_v49  ;;  %v292_v53 = vor.u32 %v291_v44, %v288_v43  ;;  %v301_v54 = vrot.slane %v299_v45, 4  ;;  %v307_v55 = vrot.slane %v305_v46, 5 }
  0x37   : > { %4907 = vmatmul.msk.bf16.gmra.mxu2 %vm695_vm4, %v688_v48  ;;  %v596_v57 = vsel %vm5720_vm3, %v591_v50, %v595_v34  ;;  %v409_v59 = vshll.u32 %v221_v42, 16  ;;  %v415_v60 = vshll.u32 %v5792_v47, 16  ;;  %v419_v0 = vshrl.u32 %v5792_v47, 16  ;;  %v237_v34 = vld [vmem:[%s5708_s29 + $0xa8] sm:$0xf] }
  0x38   : > { %v674_v61 = vunpack.c.l.b16 %v596_v57  ;;  %v293_v62 = vrot.slane %v292_v53, 4  ;;  %v302_v63 = vor.u32 %v301_v54, %v297_v51  ;;  %v408_v4 = vrot.slane %v406_v58, 4 }
  0x39   : > { %v411_v5 = vrot.slane %v409_v59, 5  ;;  %v417_v6 = vrot.slane %v415_v60, 5  ;;  %v425_v7 = vshll.u32 %v5797_v56, 16  ;;  %v421_v12 = vrot.slane %v419_v0, 4  ;;  %v213_v59 = vld [vmem:[%s5708_s29 + $0x18] sm:$0xf] }
  0x3a   : > { %v692_v9 = vpack.c.b16 %v674_v61, %v673_v52  ;;  %v298_v10 = vsel %vm5720_vm3, %v293_v62, %v297_v51  ;;  %v303_v11 = vrot.slane %v302_v63, 4  ;;  %v502_v17 = vshrl.u32 %v229_v3, 16  ;;  %v5825_v63 = vld [vmem:[%s5708_s29 + $0x1c] sm:$0xf]  ;;  %v5828_v0 = vld [vmem:[%s5708_s29 + $0x20] sm:$0x1] }
  0x3b   : > { %v649_v13 = vunpack.c.l.b16 %v298_v10  ;;  %v412_v14 = vor.u32 %v411_v5, %v408_v4  ;;  %v427_v15 = vrot.slane %v425_v7, 5  ;;  %v422_v19 = vor.u32 %v421_v12, %v417_v6 }
  0x3c   : > { %4911 = vmatmul.msk.bf16.gmra.mxu3 %vm695_vm4, %v692_v9  ;;  %v308_v18 = vsel %vm5720_vm3, %v303_v11, %v307_v55  ;;  %v505_v21 = vshll.u32 %v229_v3, 16  ;;  %v511_v22 = vshll.u32 %v230_v8, 16  ;;  %v504_v26 = vrot.slane %v502_v17, 4 }
  0x3d   : > { %v650_v23 = vunpack.c.l.b16 %v308_v18  ;;  %v413_v24 = vrot.slane %v412_v14, 4  ;;  %v515_v27 = vshrl.u32 %v230_v8, 16  ;;  %v423_v29 = vrot.slane %v422_v19, 4 }
  0x3e   : > { %v507_v30 = vrot.slane %v505_v21, 5  ;;  %v513_v31 = vrot.slane %v511_v22, 5  ;;  %v521_v33 = vshll.u32 %v252_v16, 16  ;;  %v598_v48 = vshrl.u32 %v237_v34, 16  ;;  %v5838_v21 = vld [vmem:[%s5708_s29 + $0x58] sm:$0xf] }
  0x3f   : > { %v680_v35 = vpack.c.b16 %v650_v23, %v649_v13  ;;  %v418_v37 = vsel %vm5720_vm3, %v413_v24, %v417_v6  ;;  %v517_v38 = vrot.slane %v515_v27, 4  ;;  %v428_v41 = vsel %vm5720_vm3, %v423_v29, %v427_v15  ;;  %v223_v15 = vld [vmem:[%s5708_s29 + $0x54] sm:$0xf]  ;;  %v5843_v27 = vld [vmem:[%s5708_s29 + $0x5c] sm:$0x1] }
  0x40   : > { %v659_v42 = vunpack.c.l.b16 %v418_v37  ;;  %v508_v43 = vor.u32 %v507_v30, %v504_v26  ;;  %v523_v44 = vrot.slane %v521_v33, 5  ;;  %v660_v45 = vunpack.c.l.b16 %v428_v41 }
  0x41   : > { %4899 = vmatmul.msk.bf16.gmra.mxu0 %vm695_vm4, %v680_v35  ;;  %v518_v46 = vor.u32 %v517_v38, %v513_v31  ;;  %v601_v49 = vshll.u32 %v237_v34, 16  ;;  %v607_v51 = vshll.u32 %v238_v39, 16  ;;  %v611_v52 = vshrl.u32 %v238_v39, 16  ;;  %v231_v39 = vld [vmem:[%s5708_s29 + $0x84] sm:$0xf] }
  0x42   : > { %v509_v50 = vrot.slane %v508_v43, 4  ;;  %v617_v53 = vshll.u32 %v256_v40, 16  ;;  %v685_v54 = vpack.c.b16 %v660_v45, %v659_v42  ;;  %v600_v57 = vrot.slane %v598_v48, 4 }
  0x43   : > { %v519_v55 = vrot.slane %v518_v46, 4  ;;  %v603_v58 = vrot.slane %v601_v49, 5  ;;  %v609_v61 = vrot.slane %v607_v51, 5  ;;  %v613_v62 = vrot.slane %v611_v52, 4  ;;  %v232_v49 = vld [vmem:[%s5708_s29 + $0x88] sm:$0xf] }
  0x44   : > { %v514_v60 = vsel %vm5720_vm3, %v509_v50, %v513_v31  ;;  %4904 = vmatmul.msk.bf16.gmra.mxu1 %vm695_vm4, %v685_v54  ;;  %v619_v6 = vrot.slane %v617_v53, 5  ;;  %v310_v9 = vshrl.u32 %v213_v59, 16  ;;  %v313_v10 = vshll.u32 %v213_v59, 16  ;;  %v253_v53 = vld [vmem:[%s5708_s29 + $0x8c] sm:$0x1] }
  0x45   : > { %v524_v3 = vsel %vm5720_vm3, %v519_v55, %v523_v44  ;;  %v667_v4 = vunpack.c.l.b16 %v514_v60  ;;  %v604_v5 = vor.u32 %v603_v58, %v600_v57  ;;  %v614_v8 = vor.u32 %v613_v62, %v609_v61 }
  0x46   : > { %v668_v7 = vunpack.c.l.b16 %v524_v3  ;;  %v319_v12 = vshll.u32 %v5825_v63, 16  ;;  %v323_v13 = vshrl.u32 %v5825_v63, 16  ;;  %v329_v14 = vshll.u32 %v5828_v0, 16 }
  0x47   : > { %v605_v11 = vrot.slane %v604_v5, 4  ;;  %v615_v17 = vrot.slane %v614_v8, 4  ;;  %v312_v18 = vrot.slane %v310_v9, 4  ;;  %v315_v19 = vrot.slane %v313_v10, 5  ;;  %v239_v8 = vld [vmem:[%s5708_s29 + $0xb4] sm:$0xf] }
  0x48   : > { %v689_v16 = vpack.c.b16 %v668_v7, %v667_v4  ;;  %v321_v23 = vrot.slane %v319_v12, 5  ;;  %v325_v24 = vrot.slane %v323_v13, 4  ;;  %v331_v26 = vrot.slane %v329_v14, 5  ;;  %v240_v12 = vld [vmem:[%s5708_s29 + $0xb8] sm:$0xf] }
  0x49   : > { %v610_v22 = vsel %vm5720_vm3, %v605_v11, %v609_v61  ;;  %v620_v29 = vsel %vm5720_vm3, %v615_v17, %v619_v6  ;;  %v316_v31 = vor.u32 %v315_v19, %v312_v18  ;;  %v430_v33 = vshrl.u32 %v223_v15, 16  ;;  %v257_v17 = vld [vmem:[%s5708_s29 + $0xbc] sm:$0x1] }
  0x4a   : > { %4908 = vmatmul.msk.bf16.gmra.mxu2 %vm695_vm4, %v689_v16  ;;  %v675_v30 = vunpack.c.l.b16 %v610_v22  ;;  %v676_v34 = vunpack.c.l.b16 %v620_v29  ;;  %v326_v35 = vor.u32 %v325_v24, %v321_v23  ;;  %v433_v37 = vshll.u32 %v223_v15, 16 }
  0x4b   : > { %v439_v38 = vshll.u32 %v5838_v21, 16  ;;  %v317_v40 = vrot.slane %v316_v31, 4  ;;  %v432_v41 = vrot.slane %v430_v33, 4  ;;  %v443_v42 = vshrl.u32 %v5838_v21, 16 }
  0x4c   : > { %v449_v43 = vshll.u32 %v5843_v27, 16  ;;  %v693_v44 = vpack.c.b16 %v676_v34, %v675_v30  ;;  %v327_v45 = vrot.slane %v326_v35, 4  ;;  %v435_v46 = vrot.slane %v433_v37, 5  ;;  %v215_v37 = vld [vmem:[%s5708_s29 + $0x24] sm:$0xf] }
  0x4d   : > { %v441_v48 = vrot.slane %v439_v38, 5  ;;  %v322_v50 = vsel %vm5720_vm3, %v317_v40, %v321_v23  ;;  %v445_v51 = vrot.slane %v443_v42, 4  ;;  %v526_v54 = vshrl.u32 %v231_v39, 16  ;;  %v5871_v42 = vld [vmem:[%s5708_s29 + $0x28] sm:$0xf] }
  0x4e   : > { %v451_v52 = vrot.slane %v449_v43, 5  ;;  %4912 = vmatmul.msk.bf16.gmra.mxu3 %vm695_vm4, %v693_v44  ;;  %v332_v55 = vsel %vm5720_vm3, %v327_v45, %v331_v26  ;;  %v651_v57 = vunpack.c.l.b16 %v322_v50  ;;  %v436_v58 = vor.u32 %v435_v46, %v432_v41 }
  0x4f   : > { %v529_v59 = vshll.u32 %v231_v39, 16  ;;  %v652_v60 = vunpack.c.l.b16 %v332_v55  ;;  %v446_v61 = vor.u32 %v445_v51, %v441_v48  ;;  %v528_v62 = vrot.slane %v526_v54, 4 }
  0x50   : > { %v535_v3 = vshll.u32 %v232_v49, 16  ;;  %v437_v4 = vrot.slane %v436_v58, 4  ;;  %v539_v6 = vshrl.u32 %v232_v49, 16  ;;  %v545_v7 = vshll.u32 %v253_v53, 16 }
  0x51   : > { %v531_v5 = vrot.slane %v529_v59, 5  ;;  %v681_v9 = vpack.c.b16 %v652_v60, %v651_v57  ;;  %v447_v10 = vrot.slane %v446_v61, 4  ;;  %v622_v22 = vshrl.u32 %v239_v8, 16  ;;  %v1057_v61 = vld [vmem:[%s5708_s29] sm:$0xe] }
  0x52   : > { %v537_v11 = vrot.slane %v535_v3, 5  ;;  %v442_v13 = vsel %vm5720_vm3, %v437_v4, %v441_v48  ;;  %v541_v15 = vrot.slane %v539_v6, 4  ;;  %v547_v16 = vrot.slane %v545_v7, 5  ;;  %v5875_v48 = vld [vmem:[%s5708_s29 + $0x2c] sm:$0x1] }
  0x53   : > { %v532_v14 = vor.u32 %v531_v5, %v528_v62  ;;  %4900 = vmatmul.msk.bf16.gmra.mxu0 %vm695_vm4, %v681_v9  ;;  %v452_v18 = vsel %vm5720_vm3, %v447_v10, %v451_v52  ;;  %v661_v19 = vunpack.c.l.b16 %v442_v13  ;;  %v625_v23 = vshll.u32 %v239_v8, 16  ;;  %v5140_v6 = vld [vmem:[%s5708_s29 + $0xc] sm:$0xf] }
  0x54   : > { %v662_v24 = vunpack.c.l.b16 %v452_v18  ;;  %v542_v29 = vor.u32 %v541_v15, %v537_v11  ;;  %v631_v30 = vshll.u32 %v240_v12, 16  ;;  %v624_v31 = vrot.slane %v622_v22, 4 }
  0x55   : > { %v533_v26 = vrot.slane %v532_v14, 4  ;;  %v627_v33 = vrot.slane %v625_v23, 5  ;;  %v635_v34 = vshrl.u32 %v240_v12, 16  ;;  %v641_v35 = vshll.u32 %v257_v17, 16  ;;  %v5141_v12 = vld [vmem:[%s5708_s29 + $0x10] sm:$0xf] }
  0x56   : > { %v686_v38 = vpack.c.b16 %v662_v24, %v661_v19  ;;  %v543_v40 = vrot.slane %v542_v29, 4  ;;  %v633_v41 = vrot.slane %v631_v30, 5  ;;  %v1113_v43 = vrot.slane %v5736_v2, 5 }
  0x57   : > { %v538_v39 = vsel %vm5720_vm3, %v533_v26, %v537_v11  ;;  %v628_v45 = vor.u32 %v627_v33, %v624_v31  ;;  %v637_v46 = vrot.slane %v635_v34, 4  ;;  %v643_v50 = vrot.slane %v641_v35, 5  ;;  %v5286_v11 = vld [vmem:[%s7623_s1 + $0xc] sm:$0x3] }
  0x58   : > { %v669_v44 = vunpack.c.l.b16 %v538_v39  ;;  %4905 = vmatmul.msk.bf16.gmra.mxu1 %vm695_vm4, %v686_v38  ;;  %v548_v49 = vsel %vm5720_vm3, %v543_v40, %v547_v16  ;;  %v334_v51 = vshrl.u32 %v215_v37, 16  ;;  %v337_v52 = vshll.u32 %v215_v37, 16  ;;  %v5142_v38 = vld [vmem:[%s5708_s29 + $0x14] sm:$0x1] }
  0x59   : > { %v670_v53 = vunpack.c.l.b16 %v548_v49  ;;  %v629_v54 = vrot.slane %v628_v45, 4  ;;  %v638_v55 = vor.u32 %v637_v46, %v633_v41  ;;  %v343_v2 = vshll.u32 %v5871_v42, 16  ;;  %v5415_v45 = vld [vmem:[%s7623_s1 + $0xe] sm:$0x3] }
  0x5a   : > { %v336_v57 = vrot.slane %v334_v51, 4  ;;  %v339_v58 = vrot.slane %v337_v52, 5  ;;  %v347_v59 = vshrl.u32 %v5871_v42, 16  ;;  %v353_v60 = vshll.u32 %v5875_v48, 16  ;;  %v5484_v51 = vld [vmem:[%s5708_s29] sm:$0xff] }
  0x5b   : > { %v690_v62 = vpack.c.b16 %v670_v53, %v669_v44  ;;  %v634_v3 = vsel %vm5720_vm3, %v629_v54, %v633_v41  ;;  %v639_v4 = vrot.slane %v638_v55, 4  ;;  %v345_v5 = vrot.slane %v343_v2, 5  ;;  %v5464_v2 = vld [vmem:[%s7623_s1 + $0x10] sm:$0x3] }
  0x5c   : > { %v677_v7 = vunpack.c.l.b16 %v634_v3  ;;  %v340_v8 = vor.u32 %v339_v58, %v336_v57  ;;  %v349_v9 = vrot.slane %v347_v59, 4  ;;  %v355_v10 = vrot.slane %v353_v60, 5 }
  0x5d   : > { %4909 = vmatmul.msk.bf16.gmra.mxu2 %vm695_vm4, %v690_v62  ;;  %v644_v13 = vsel %vm5720_vm3, %v639_v4, %v643_v50  ;;  %v4994_v14 = vrot.slane %v1057_v61, 9  ;;  %v1110_v19 = vrot.slane %v5733_v1, 5  ;;  %v2945_v22 = vsel %vm744_vm0, %v5286_v11, 0  ;;  %v5237_v50 = vld [vmem:[%s7623_s1 + $0xa] sm:$0x3] }
  0x5e   : > { %v678_v15 = vunpack.c.l.b16 %v644_v13  ;;  %v341_v16 = vrot.slane %v340_v8, 4  ;;  %v350_v17 = vor.u32 %v349_v9, %v345_v5  ;;  %v1778_v23 = vshrl.u32 %v5140_v6, 16  ;;  %2954 = vmatpush.bf16.msra.mxu2 %v2945_v22  ;;  %v1058_v8 = vld [vmem:[%s5708_s29 + $0xc] sm:$0xe] }
  0x5f   : > { %v1781_v24 = vshll.u32 %v5140_v6, 16  ;;  %v1787_v26 = vshll.u32 %v5141_v12, 16  ;;  %v1111_v33 = vsel %vm5894_vm7, %v4994_v14, %v1110_v19  ;;  %v1112_v35 = vrot.slane %v1110_v19, 4  ;;  %v5144_v6 = vld [vmem:[%s5708_s29 + $0x1c] sm:$0xf] }
  0x60   : > { %v694_v29 = vpack.c.b16 %v678_v15, %v677_v7  ;;  %v346_v30 = vsel %vm5720_vm3, %v341_v16, %v345_v5  ;;  %v351_v31 = vrot.slane %v350_v17, 4  ;;  %v1222_v37 = vunpack.c.l.b16 %v1111_v33  ;;  %v5143_v5 = vld [vmem:[%s5708_s29 + $0x18] sm:$0xf]  ;;  %v5500_v15 = vld [vmem:[%s5708_s29 + $0xc] sm:$0xff] }
  0x61   : > { %v653_v34 = vunpack.c.l.b16 %v346_v30  ;;  %v1780_v1 = vrot.slane %v1778_v23, 4  ;;  %v1783_v40 = vrot.slane %v1781_v24, 5  ;;  %v1789_v41 = vrot.slane %v1787_v26, 5  ;;  %v5145_v30 = vld [vmem:[%s5708_s29 + $0x20] sm:$0x1] }
  0x62   : > { %4913 = vmatmul.msk.bf16.gmra.mxu3 %vm695_vm4, %v694_v29  ;;  %v356_v39 = vsel %vm5720_vm3, %v351_v31, %v355_v10  ;;  %v1791_v44 = vshrl.u32 %v5141_v12, 16  ;;  %v1114_v49 = vsel %vm5894_vm7, %v1112_v35, %v1113_v43  ;;  %v1797_v55 = vshll.u32 %v5142_v38, 16  ;;  %v5485_v35 = vld [vmem:[%s5708_s29 + $0xc] sm:$0xff] }
  0x63   : > { %v654_v46 = vunpack.c.l.b16 %v356_v39  ;;  %v1223_v52 = vunpack.c.l.b16 %v1114_v49  ;;  %v1784_v53 = vor.u32 %v1783_v40, %v1780_v1  ;;  %v3599_v58 = vsel %vm744_vm0, %v5415_v45, 0 }
  0x64   : > { %v1793_v54 = vrot.slane %v1791_v44, 4  ;;  %3608 = vmatpush.bf16.msra.mxu3 %v3599_v58  ;;  %v2658_v60 = vsel %vm744_vm0, %v5237_v50, 0  ;;  %v3997_v61 = vsel %vm744_vm0, %v5464_v2, 0  ;;  %v1799_v4 = vrot.slane %v1797_v55, 5  ;;  %v1059_v50 = vld [vmem:[%s5708_s29 + $0x18] sm:$0xe] }
  0x65   : > { %v682_v57 = vpack.c.b16 %v654_v46, %v653_v34  ;;  %v1254_v43 = vpack.c.b16 %v1223_v52, %v1222_v37  ;;  %2667 = vmatpush.bf16.msra.mxu1 %v2658_v60  ;;  %v1785_v62 = vrot.slane %v1784_v53, 4  ;;  %4006 = vmatpush.bf16.msra.mxu0 %v3997_v61  ;;  %v1117_v7 = vrot.slane %v5779_v28, 5  ;;  %v5147_v46 = vld [vmem:[%s5708_s29 + $0x28] sm:$0xf] }
  0x66   : > { %v1794_v59 = vor.u32 %v1793_v54, %v1789_v41  ;;  %v1802_v9 = vshrl.u32 %v5143_v5, 16  ;;  %v1805_v10 = vshll.u32 %v5143_v5, 16  ;;  %v1811_v13 = vshll.u32 %v5144_v6, 16 }
  0x67   : > { %4901 = vmatmul.msk.bf16.gmra.mxu0 %vm695_vm4, %v682_v57  ;;  %v1790_v11 = vsel %vm5720_vm3, %v1785_v62, %v1789_v41  ;;  %v1815_v14 = vshrl.u32 %v5144_v6, 16  ;;  %v4995_v16 = vrot.slane %v1058_v8, 9  ;;  %v1119_v17 = vrot.slane %v1117_v7, 4  ;;  %v5146_v41 = vld [vmem:[%s5708_s29 + $0x24] sm:$0xf] }
  0x68   : > { %4978 = vmatmul.msk.bf16.vlgmr.msrb.gmra.mxu1 %vm695_vm4, %v5484_v51  ;;  %v1795_v3 = vrot.slane %v1794_v59, 4  ;;  %v1120_v28 = vrot.slane %v5782_v32, 5  ;;  %v2163_v19 = vunpack.c.l.b16 %v1790_v11  ;;  %v1804_v23 = vrot.slane %v1802_v9, 4  ;;  %v5148_v6 = vld [vmem:[%s5708_s29 + $0x2c] sm:$0x1] }
  0x69   : > { %v1807_v24 = vrot.slane %v1805_v10, 5  ;;  %v1813_v26 = vrot.slane %v1811_v13, 5  ;;  %v1817_v29 = vrot.slane %v1815_v14, 4  ;;  %v1118_v31 = vsel %vm5894_vm7, %v4995_v16, %v1117_v7 }
  0x6a   : > { %v1800_v12 = vsel %vm5720_vm3, %v1795_v3, %v1799_v4  ;;  %v1121_v33 = vsel %vm5894_vm7, %v1119_v17, %v1120_v28  ;;  %v1821_v38 = vshll.u32 %v5145_v30, 16  ;;  %v1224_v1 = vunpack.c.l.b16 %v1118_v31 }
  0x6b   : > { %v2164_v22 = vunpack.c.l.b16 %v1800_v12  ;;  %v1808_v32 = vor.u32 %v1807_v24, %v1804_v23  ;;  %v1818_v37 = vor.u32 %v1817_v29, %v1813_v26  ;;  %v1225_v39 = vunpack.c.l.b16 %v1121_v33  ;;  %v5486_v12 = vld [vmem:[%s5708_s29 + $0x18] sm:$0xff]  ;;  %v1060_v29 = vld [vmem:[%s5708_s29 + $0x24] sm:$0xe] }
  0x6c   : > { %v1823_v45 = vrot.slane %v1821_v38, 5  ;;  %v1124_v51 = vrot.slane %v5825_v63, 5  ;;  %v1826_v52 = vshrl.u32 %v5146_v41, 16  ;;  %v1829_v54 = vshll.u32 %v5146_v41, 16 }
  0x6d   : > { %5011 = vmatmul.msk.bf16.vlgmr.msrb.gmra.mxu2 %vm695_vm4, %v1254_v43  ;;  %v2195_v34 = vpack.c.b16 %v2164_v22, %v2163_v19  ;;  %v1809_v40 = vrot.slane %v1808_v32, 4  ;;  %v1819_v44 = vrot.slane %v1818_v37, 4  ;;  %v1255_v49 = vpack.c.b16 %v1225_v39, %v1224_v1  ;;  %v5501_v43 = vld [vmem:[%s5708_s29 + $0x18] sm:$0xff]  ;;  %v5149_v19 = vld [vmem:[%s5708_s29 + $0x30] sm:$0xf]  ;;  %v5502_v32 = vld [vmem:[%s5708_s29 + $0x24] sm:$0xff] }
  0x6e   : > { %v1835_v55 = vshll.u32 %v5147_v46, 16  ;;  %v1839_v2 = vshrl.u32 %v5147_v46, 16  ;;  %v4996_v58 = vrot.slane %v1059_v50, 9  ;;  %v1126_v60 = vrot.slane %v1124_v51, 4  ;;  %v5150_v22 = vld [vmem:[%s5708_s29 + $0x34] sm:$0xf] }
  0x6f   : > { %v1814_v53 = vsel %vm5720_vm3, %v1809_v40, %v1813_v26  ;;  %v1824_v57 = vsel %vm5720_vm3, %v1819_v44, %v1823_v45  ;;  %v1127_v63 = vrot.slane %v5828_v0, 5  ;;  %v1828_v61 = vrot.slane %v1826_v52, 4  ;;  %v5151_v45 = vld [vmem:[%s5708_s29 + $0x38] sm:$0x1] }
  0x70   : > { %v2165_v59 = vunpack.c.l.b16 %v1814_v53  ;;  %v2166_v62 = vunpack.c.l.b16 %v1824_v57  ;;  %v1831_v3 = vrot.slane %v1829_v54, 5  ;;  %v1837_v4 = vrot.slane %v1835_v55, 5  ;;  %v5153_v57 = vld [vmem:[%s5708_s29 + $0x40] sm:$0xf] }
  0x71   : > { %v1841_v5 = vrot.slane %v1839_v2, 4  ;;  %v1125_v7 = vsel %vm5894_vm7, %v4996_v58, %v1124_v51  ;;  %v1128_v8 = vsel %vm5894_vm7, %v1126_v60, %v1127_v63  ;;  %v1845_v0 = vshll.u32 %v5148_v6, 16  ;;  %v5152_v2 = vld [vmem:[%s5708_s29 + $0x3c] sm:$0xf]  ;;  %v5565_v63 = vld [vmem:[%s5708_s29 + $0x34] sm:$0xf] }
  0x72   : > { %5124 = vmatmul.msk.bf16.vlgmr.msrb.gmra.mxu3 %vm695_vm4, %v5500_v15  ;;  %v2196_v9 = vpack.c.b16 %v2166_v62, %v2165_v59  ;;  %v1832_v10 = vor.u32 %v1831_v3, %v1828_v61  ;;  %v1226_v13 = vunpack.c.l.b16 %v1125_v7  ;;  %v1227_v14 = vunpack.c.l.b16 %v1128_v8  ;;  %v1061_v62 = vld [vmem:[%s5708_s29 + $0x30] sm:$0xe] }
  0x73   : > { %v1842_v11 = vor.u32 %v1841_v5, %v1837_v4  ;;  %v1847_v17 = vrot.slane %v1845_v0, 5  ;;  %v1131_v23 = vrot.slane %v5871_v42, 5  ;;  %v1850_v30 = vshrl.u32 %v5149_v19, 16  ;;  %v5566_v0 = vld [vmem:[%s5708_s29 + $0x38] sm:$0x1] }
  0x74   : > { %v1833_v15 = vrot.slane %v1832_v10, 4  ;;  %v1256_v28 = vpack.c.b16 %v1227_v14, %v1226_v13  ;;  %v1853_v31 = vshll.u32 %v5149_v19, 16  ;;  %v1859_v33 = vshll.u32 %v5150_v22, 16  ;;  %v5503_v13 = vld [vmem:[%s5708_s29 + $0x30] sm:$0xff] }
  0x75   : > { %v1843_v16 = vrot.slane %v1842_v11, 4  ;;  %v1133_v37 = vrot.slane %v1131_v23, 4  ;;  %v1134_v42 = vrot.slane %v5875_v48, 5  ;;  %v1852_v39 = vrot.slane %v1850_v30, 4  ;;  %v5487_v48 = vld [vmem:[%s5708_s29 + $0x24] sm:$0xff] }
  0x76   : > { %v1838_v24 = vsel %vm5720_vm3, %v1833_v15, %v1837_v4  ;;  %v1855_v40 = vrot.slane %v1853_v31, 5  ;;  %v1861_v41 = vrot.slane %v1859_v33, 5  ;;  %v1869_v53 = vshll.u32 %v5151_v45, 16  ;;  %v5488_v33 = vld [vmem:[%s5708_s29 + $0x30] sm:$0xff] }
  0x77   : > { %5189 = vmatmul.msk.bf16.vlgmr.msrb.gmra.mxu0 %vm695_vm4, %v2195_v34  ;;  %v1848_v26 = vsel %vm5720_vm3, %v1843_v16, %v1847_v17  ;;  %v1863_v34 = vshrl.u32 %v5150_v22, 16  ;;  %v2167_v38 = vunpack.c.l.b16 %v1838_v24  ;;  %v1138_v61 = vrot.slane %v5565_v63, 5  ;;  %v5154_v22 = vld [vmem:[%s5708_s29 + $0x44] sm:$0x1] }
  0x78   : > { %4979 = vmatmul.msk.bf16.gmra.mxu1 %vm695_vm4, %v5485_v35  ;;  %v4997_v35 = vrot.slane %v1060_v29, 9  ;;  %v2168_v1 = vunpack.c.l.b16 %v1848_v26  ;;  %v1856_v51 = vor.u32 %v1855_v40, %v1852_v39  ;;  %v1871_v59 = vrot.slane %v1869_v53, 5  ;;  %v5155_v39 = vld [vmem:[%s5708_s29 + $0x48] sm:$0xf]  ;;  %v5156_v40 = vld [vmem:[%s5708_s29 + $0x4c] sm:$0xf] }
  0x79   : > { %v1865_v44 = vrot.slane %v1863_v34, 4  ;;  %v1874_v3 = vshrl.u32 %v5152_v2, 16  ;;  %v1877_v4 = vshll.u32 %v5152_v2, 16  ;;  %v1883_v5 = vshll.u32 %v5153_v57, 16  ;;  %v5504_v2 = vld [vmem:[%s5708_s29 + $0x3c] sm:$0xff] }
  0x7a   : > { %v1132_v46 = vsel %vm5894_vm7, %v4997_v35, %v1131_v23  ;;  %v2197_v50 = vpack.c.b16 %v2168_v1, %v2167_v38  ;;  %v1857_v58 = vrot.slane %v1856_v51, 4  ;;  %v1887_v6 = vshrl.u32 %v5153_v57, 16 }
  0x7b   : > { %v1866_v52 = vor.u32 %v1865_v44, %v1861_v41  ;;  %v1228_v54 = vunpack.c.l.b16 %v1132_v46  ;;  %v4998_v10 = vrot.slane %v1061_v62, 9  ;;  %v1140_v11 = vrot.slane %v1138_v61, 4 }
  0x7c   : > { %v1862_v8 = vsel %vm5720_vm3, %v1857_v58, %v1861_v41  ;;  %v1876_v14 = vrot.slane %v1874_v3, 4  ;;  %v1879_v15 = vrot.slane %v1877_v4, 5  ;;  %v1885_v16 = vrot.slane %v1883_v5, 5  ;;  %v5157_v4 = vld [vmem:[%s5708_s29 + $0x50] sm:$0x1] }
  0x7d   : > { %5012 = vmatmul.msk.bf16.gmra.mxu2 %vm695_vm4, %v1255_v49  ;;  %v1135_v49 = vsel %vm5894_vm7, %v1133_v37, %v1134_v42  ;;  %v1889_v17 = vrot.slane %v1887_v6, 4  ;;  %v1139_v23 = vsel %vm5894_vm7, %v4998_v10, %v1138_v61  ;;  %v1893_v30 = vshll.u32 %v5154_v22, 16 }
  0x7e   : > { %v1229_v55 = vunpack.c.l.b16 %v1135_v49  ;;  %v1880_v26 = vor.u32 %v1879_v15, %v1876_v14  ;;  %v1898_v51 = vshrl.u32 %v5155_v39, 16  ;;  %v1907_v53 = vshll.u32 %v5156_v40, 16 }
  0x7f   : > { %v1890_v29 = vor.u32 %v1889_v17, %v1885_v16  ;;  %v1895_v1 = vrot.slane %v1893_v30, 5 }
  0x80   : > { %v1257_v60 = vpack.c.b16 %v1229_v55, %v1228_v54  ;;  %v1881_v42 = vrot.slane %v1880_v26, 4  ;;  %v1911_v54 = vshrl.u32 %v5156_v40, 16  ;;  %v1909_v62 = vrot.slane %v1907_v53, 5 }
  0x81   : > { %v1891_v38 = vrot.slane %v1890_v29, 4  ;;  %v1152_v26 = vrot.slane %v5792_v47, 5 }
  0x82   : > { %5125 = vmatmul.msk.bf16.gmra.mxu3 %vm695_vm4, %v5501_v43  ;;  %v1867_v43 = vrot.slane %v1866_v52, 4  ;;  %v1886_v45 = vsel %vm5720_vm3, %v1881_v42, %v1885_v16  ;;  %v1901_v52 = vshll.u32 %v5155_v39, 16  ;;  %v1913_v3 = vrot.slane %v1911_v54, 4  ;;  %v5160_v54 = vld [vmem:[%s5708_s29 + $0x5c] sm:$0x1] }
  0x83   : > { %v1896_v46 = vsel %vm5720_vm3, %v1891_v38, %v1895_v1  ;;  %v2171_v55 = vunpack.c.l.b16 %v1886_v45  ;;  %v5505_v1 = vld [vmem:[%s5708_s29 + $0x48] sm:$0xff]  ;;  %v1154_v40 = vrot.slane %v1152_v26, 4 }
  0x84   : > { %v2172_v57 = vunpack.c.l.b16 %v1896_v46  ;;  %v1903_v61 = vrot.slane %v1901_v52, 5  ;;  %v1914_v10 = vor.u32 %v1913_v3, %v1909_v62 }
  0x86   : > { %v1915_v16 = vrot.slane %v1914_v10, 4 }
  0x87   : > { %5190 = vmatmul.msk.bf16.gmra.mxu0 %vm695_vm4, %v2196_v9  ;;  %v1872_v9 = vsel %vm5720_vm3, %v1867_v43, %v1871_v59 }
  0x88   : > { %4980 = vmatmul.msk.bf16.gmra.mxu1 %vm695_vm4, %v5486_v12  ;;  %v1141_v12 = vrot.slane %v5566_v0, 5  ;;  %v2170_v19 = vunpack.c.l.b16 %v1872_v9 }
  0x8a   : > { %v1142_v24 = vsel %vm5894_vm7, %v1140_v11, %v1141_v12  ;;  %v1917_v11 = vshll.u32 %v5157_v4, 16  ;;  %v5489_v12 = vld [vmem:[%s5708_s29 + $0x3c] sm:$0xff] }
  0x8b   : > { %v1231_v35 = vunpack.c.l.b16 %v1142_v24  ;;  %v5159_v24 = vld [vmem:[%s5708_s29 + $0x58] sm:$0xf]  ;;  %v5161_v4 = vld [vmem:[%s5708_s29 + $0x60] sm:$0xf] }
  0x8c   : > { %v1919_v17 = vrot.slane %v1917_v11, 5  ;;  %v1935_v42 = vshrl.u32 %v5159_v24, 16 }
  0x8d   : > { %5013 = vmatmul.msk.bf16.gmra.mxu2 %vm695_vm4, %v1256_v28  ;;  %v2169_v28 = vunpack.c.l.b16 %v1862_v8  ;;  %v2199_v8 = vpack.c.b16 %v2172_v57, %v2171_v55 }
  0x8e   : > { %v1920_v30 = vsel %vm5720_vm3, %v1915_v16, %v1919_v17  ;;  %v1937_v52 = vrot.slane %v1935_v42, 4 }
  0x8f   : > { %v2198_v31 = vpack.c.b16 %v2170_v19, %v2169_v28  ;;  %v2174_v46 = vunpack.c.l.b16 %v1920_v30 }
  0x92   : > { %5126 = vmatmul.msk.bf16.gmra.mxu3 %vm695_vm4, %v5502_v32  ;;  %v1230_v32 = vunpack.c.l.b16 %v1139_v23  ;;  %v5158_v23 = vld [vmem:[%s5708_s29 + $0x54] sm:$0xf] }
  0x94   : > { %v1258_v44 = vpack.c.b16 %v1231_v35, %v1230_v32  ;;  %v1925_v32 = vshll.u32 %v5158_v23, 16  ;;  %v1931_v35 = vshll.u32 %v5159_v24, 16 }
  0x97   : > { %5191 = vmatmul.msk.bf16.gmra.mxu0 %vm695_vm4, %v2197_v50  ;;  %v1145_v50 = vrot.slane %v5748_v20, 5  ;;  %v1900_v20 = vrot.slane %v1898_v51, 4  ;;  %v1933_v51 = vrot.slane %v1931_v35, 5  ;;  %v1162_v35 = vrot.slane %v5843_v27, 5 }
  0x98   : > { %4981 = vmatmul.msk.bf16.gmra.mxu1 %vm695_vm4, %v5487_v48  ;;  %v1062_v48 = vld [vmem:[%s5708_s29 + $0x3c] sm:$0xe] }
  0x99   : > { %v4999_v43 = vrot.slane %v1062_v48, 9  ;;  %v1147_v59 = vrot.slane %v1145_v50, 4  ;;  %v1927_v48 = vrot.slane %v1925_v32, 5 }
  0x9b   : > { %v1146_v5 = vsel %vm5894_vm7, %v4999_v43, %v1145_v50  ;;  %v5490_v43 = vld [vmem:[%s5708_s29 + $0x48] sm:$0xff] }
  0x9d   : > { %v5989_v7 = vpop.f32.mrf.mxu1  ;;  %5014 = vmatmul.msk.bf16.gmra.mxu2 %vm695_vm4, %v1257_v60  ;;  %v1148_v60 = vrot.slane %v5753_v25, 5  ;;  %v1904_v25 = vor.u32 %v1903_v61, %v1900_v20  ;;  %v1941_v20 = vshll.u32 %v5160_v54, 16  ;;  %v5491_v54 = vld [vmem:[%s5708_s29 + $0x54] sm:$0xff] }
  0x9f   : > { %v1149_v6 = vsel %vm5894_vm7, %v1147_v59, %v1148_v60  ;;  %v1905_v15 = vrot.slane %v1904_v25, 4  ;;  %v1938_v60 = vor.u32 %v1937_v52, %v1933_v51  ;;  %v1943_v10 = vrot.slane %v1941_v20, 5 }
  0xa0   : > { %v1233_v14 = vunpack.c.l.b16 %v1149_v6 }
  0xa1   : > { %v1910_v29 = vsel %vm5720_vm3, %v1905_v15, %v1909_v62  ;;  %v1939_v25 = vrot.slane %v1938_v60, 4  ;;  %v1159_v15 = vrot.slane %v5838_v21, 5 }
  0xa2   : > { %5127 = vmatmul.msk.bf16.gmra.mxu3 %vm695_vm4, %v5503_v13  ;;  %v1232_v13 = vunpack.c.l.b16 %v1146_v5  ;;  %v2173_v45 = vunpack.c.l.b16 %v1910_v29  ;;  %v5162_v5 = vld [vmem:[%s5708_s29 + $0x64] sm:$0xf] }
  0xa3   : > { %v1959_v16 = vshrl.u32 %v5162_v5, 16  ;;  %v1944_v24 = vsel %vm5720_vm3, %v1939_v25, %v1943_v10  ;;  %v1161_v32 = vrot.slane %v1159_v15, 4  ;;  %v5567_v10 = vld [vmem:[%s5708_s29 + $0x64] sm:$0xf] }
  0xa4   : > { %v1259_v19 = vpack.c.b16 %v1233_v14, %v1232_v13  ;;  %v2200_v57 = vpack.c.b16 %v2174_v46, %v2173_v45  ;;  %v1949_v13 = vshll.u32 %v5161_v4, 16  ;;  %v1955_v14 = vshll.u32 %v5162_v5, 16 }
  0xa5   : > { %v6005_v34 = vpop.f32.mrf.mxu1  ;;  %v1961_v42 = vrot.slane %v1959_v16, 4 }
  0xa6   : > { %v1951_v30 = vrot.slane %v1949_v13, 5  ;;  %v1065_v13 = vld [vmem:[%s5708_s29 + $0x60] sm:$0xe] }
  0xa7   : > { %v6007_v37 = vpop.f32.mrf.mxu2  ;;  %5192 = vmatmul.msk.bf16.gmra.mxu0 %vm695_vm4, %v2198_v31  ;;  %v1063_v31 = vld [vmem:[%s5708_s29 + $0x48] sm:$0xe] }
  0xa8   : > { %4982 = vmatmul.msk.bf16.gmra.mxu1 %vm695_vm4, %v5488_v33  ;;  %v1922_v33 = vshrl.u32 %v5158_v23, 16  ;;  %v5000_v47 = vrot.slane %v1063_v31, 9  ;;  %v1957_v31 = vrot.slane %v1955_v14, 5 }
  0xaa   : > { %v6013_v41 = vpop.f32.mrf.mxu0  ;;  %v1924_v50 = vrot.slane %v1922_v33, 4  ;;  %v5506_v33 = vld [vmem:[%s5708_s29 + $0x54] sm:$0xff]  ;;  %v1962_v27 = vor.u32 %v1961_v42, %v1957_v31 }
  0xab   : > { %v6019_v49 = vpop.f32.mrf.mxu3 }
  0xac   : > { %v1928_v59 = vor.u32 %v1927_v48, %v1924_v50  ;;  %v1163_v48 = vsel %vm5894_vm7, %v1161_v32, %v1162_v35  ;;  %v1963_v60 = vrot.slane %v1962_v27, 4 }
  0xad   : > { %5015 = vmatmul.msk.bf16.gmra.mxu2 %vm695_vm4, %v1258_v44  ;;  %v1155_v44 = vrot.slane %v5797_v56, 5 }
  0xaf   : > { %v6025_v58 = vpop.f32.mrf.mxu1  ;;  %v6028_v63 = vpop.f32.mrf.mxu2  ;;  %v1156_v56 = vsel %vm5894_vm7, %v1154_v40, %v1155_v44  ;;  %v5163_v40 = vld [vmem:[%s5708_s29 + $0x68] sm:$0x1] }
  0xb0   : > { %v1235_v62 = vunpack.c.l.b16 %v1156_v56 }
  0xb2   : > { %5128 = vmatmul.msk.bf16.gmra.mxu3 %vm695_vm4, %v5504_v2  ;;  %v6036_v9 = vpop.f32.mrf.mxu0  ;;  %v1153_v2 = vsel %vm5894_vm7, %v5000_v47, %v1152_v26  ;;  %v2176_v47 = vunpack.c.l.b16 %v1944_v24 }
  0xb3   : > { %v6038_v0 = vpop.f32.mrf.mxu3  ;;  %v1234_v61 = vunpack.c.l.b16 %v1153_v2 }
  0xb5   : > { %v1260_v11 = vpack.c.b16 %v1235_v62, %v1234_v61  ;;  %v5164_v61 = vld [vmem:[%s5708_s29 + $0x6c] sm:$0xf]  ;;  %v5165_v62 = vld [vmem:[%s5708_s29 + $0x70] sm:$0xf] }
  0xb6   : > { %v1970_v14 = vshrl.u32 %v5164_v61, 16  ;;  %v1979_v16 = vshll.u32 %v5165_v62, 16 }
  0xb7   : > { %5193 = vmatmul.msk.bf16.gmra.mxu0 %vm695_vm4, %v2199_v8  ;;  %v6042_v28 = vpop.f32.mrf.mxu1  ;;  %v1929_v8 = vrot.slane %v1928_v59, 4 }
  0xb8   : > { %4983 = vmatmul.msk.bf16.gmra.mxu1 %vm695_vm4, %v5489_v12  ;;  %v1946_v12 = vshrl.u32 %v5161_v4, 16  ;;  %v1972_v35 = vrot.slane %v1970_v14, 4  ;;  %v5168_v14 = vld [vmem:[%s5708_s29 + $0x7c] sm:$0xf] }
  0xb9   : > { %v1934_v23 = vsel %vm5720_vm3, %v1929_v8, %v1933_v51  ;;  %v1965_v51 = vshll.u32 %v5163_v40, 16 }
  0xba   : > { %v6045_v22 = vpop.f32.mrf.mxu2  ;;  %v1948_v29 = vrot.slane %v1946_v12, 4 }
  0xbb   : > { %v1967_v20 = vrot.slane %v1965_v51, 5 }
  0xbc   : > { %v1952_v46 = vor.u32 %v1951_v30, %v1948_v29  ;;  %v5507_v30 = vld [vmem:[%s5708_s29 + $0x60] sm:$0xff] }
  0xbd   : > { %5016 = vmatmul.msk.bf16.gmra.mxu2 %vm695_vm4, %v1259_v19  ;;  %v1064_v19 = vld [vmem:[%s5708_s29 + $0x54] sm:$0xe]  ;;  %v1968_v25 = vsel %vm5720_vm3, %v1963_v60, %v1967_v20 }
  0xbe   : > { %v6055_v38 = vpop.f32.mrf.mxu0  ;;  %v5001_v21 = vrot.slane %v1064_v19, 9  ;;  %v1953_v59 = vrot.slane %v1952_v46, 4  ;;  %v1983_v19 = vshrl.u32 %v5165_v62, 16  ;;  %v5166_v46 = vld [vmem:[%s5708_s29 + $0x74] sm:$0x1] }
  0xbf   : > { %v6059_v39 = vpop.f32.mrf.mxu3 }
  0xc0   : > { %v1160_v50 = vsel %vm5894_vm7, %v5001_v21, %v1159_v15  ;;  %v1958_v8 = vsel %vm5720_vm3, %v1953_v59, %v1957_v31  ;;  %v1973_v15 = vshll.u32 %v5164_v61, 16  ;;  %v5002_v21 = vrot.slane %v1065_v13, 9  ;;  %v5167_v13 = vld [vmem:[%s5708_s29 + $0x78] sm:$0xf] }
  0xc1   : > { %v6062_v53 = vpop.f32.mrf.mxu1  ;;  %v1236_v56 = vunpack.c.l.b16 %v1160_v50  ;;  %v2177_v31 = vunpack.c.l.b16 %v1958_v8 }
  0xc2   : > { %5129 = vmatmul.msk.bf16.gmra.mxu3 %vm695_vm4, %v5505_v1  ;;  %v6066_v55 = vpop.f32.mrf.mxu2  ;;  %v2175_v1 = vunpack.c.l.b16 %v1934_v23  ;;  %v5568_v23 = vld [vmem:[%s5708_s29 + $0x68] sm:$0x1]  ;;  %v1975_v42 = vrot.slane %v1973_v15, 5  ;;  %v5569_v15 = vld [vmem:[%s5708_s29 + $0x70] sm:$0xf] }
  0xc3   : > { %v1169_v24 = vrot.slane %v5568_v23, 5  ;;  %v1066_v23 = vld [vmem:[%s5708_s29 + $0x6c] sm:$0xe] }
  0xc4   : > { %v2201_v52 = vpack.c.b16 %v2176_v47, %v2175_v1  ;;  %v1981_v1 = vrot.slane %v1979_v16, 5  ;;  %v1985_v47 = vrot.slane %v1983_v19, 4  ;;  %v1976_v51 = vor.u32 %v1975_v42, %v1972_v35  ;;  %v5570_v42 = vld [vmem:[%s5708_s29 + $0x74] sm:$0x1] }
  0xc5   : > { %v1173_v16 = vrot.slane %v5569_v15, 5 }
  0xc6   : > { %v6073_v3 = vpop.f32.mrf.mxu0 }
  0xc7   : > { %5194 = vmatmul.msk.bf16.gmra.mxu0 %vm695_vm4, %v2200_v57  ;;  %v6078_v6 = vpop.f32.mrf.mxu3  ;;  %v1237_v57 = vunpack.c.l.b16 %v1163_v48 }
  0xc8   : > { %4984 = vmatmul.msk.bf16.gmra.mxu1 %vm695_vm4, %v5490_v43 }
  0xc9   : > { %v6082_v17 = vpop.f32.mrf.mxu1  ;;  %v1261_v4 = vpack.c.b16 %v1237_v57, %v1236_v56  ;;  %v5492_v57 = vld [vmem:[%s5708_s29 + $0x60] sm:$0xff] }
  0xcd   : > { %v6089_v26 = vpop.f32.mrf.mxu2  ;;  %5017 = vmatmul.msk.bf16.gmra.mxu2 %vm695_vm4, %v1260_v11  ;;  %v1166_v11 = vrot.slane %v5567_v10, 5 }
  0xcf   : > { %v1168_v32 = vrot.slane %v1166_v11, 4  ;;  %v1167_v50 = vsel %vm5894_vm7, %v5002_v21, %v1166_v11  ;;  %v2007_v21 = vshrl.u32 %v5168_v14, 16 }
  0xd0   : > { %v6095_v44 = vpop.f32.mrf.mxu0  ;;  %v1238_v20 = vunpack.c.l.b16 %v1167_v50  ;;  %v5003_v50 = vrot.slane %v1066_v23, 9 }
  0xd1   : > { %v6097_v45 = vpop.f32.mrf.mxu3  ;;  %v1170_v48 = vsel %vm5894_vm7, %v1168_v32, %v1169_v24 }
  0xd2   : > { %5130 = vmatmul.msk.bf16.gmra.mxu3 %vm695_vm4, %v5506_v33  ;;  %v2178_v33 = vunpack.c.l.b16 %v1968_v25  ;;  %v1239_v61 = vunpack.c.l.b16 %v1170_v48  ;;  %v1175_v48 = vrot.slane %v1173_v16, 4 }
  0xd4   : > { %v2202_v27 = vpack.c.b16 %v2178_v33, %v2177_v31  ;;  %v1262_v11 = vpack.c.b16 %v1239_v61, %v1238_v20  ;;  %v1997_v31 = vshll.u32 %v5167_v13, 16  ;;  %v2003_v33 = vshll.u32 %v5168_v14, 16 }
  0xd5   : > { %v6105_v2 = vpop.f32.mrf.mxu1  ;;  %v6107_v43 = vpop.f32.mrf.mxu2  ;;  %v2009_v20 = vrot.slane %v2007_v21, 4 }
  0xd7   : > { %5195 = vmatmul.msk.bf16.gmra.mxu0 %vm695_vm4, %v2201_v52  ;;  %v1986_v52 = vor.u32 %v1985_v47, %v1981_v1  ;;  %v1176_v47 = vrot.slane %v5570_v42, 5 }
  0xd8   : > { %4985 = vmatmul.msk.bf16.gmra.mxu1 %vm695_vm4, %v5491_v54  ;;  %v6113_v5 = vpop.f32.mrf.mxu0  ;;  %v1989_v54 = vshll.u32 %v5166_v46, 16  ;;  %v5508_v46 = vld [vmem:[%s5708_s29 + $0x6c] sm:$0xff] }
  0xd9   : > { %v6120_v12 = vpop.f32.mrf.mxu3  ;;  %v1987_v8 = vrot.slane %v1986_v52, 4 }
  0xda   : > { %v1991_v25 = vrot.slane %v1989_v54, 5 }
  0xdd   : > { %5018 = vmatmul.msk.bf16.gmra.mxu2 %vm695_vm4, %v1261_v4  ;;  %v6125_v29 = vpop.f32.mrf.mxu1  ;;  %v1977_v4 = vrot.slane %v1976_v51, 4 }
  0xdf   : > { %v1982_v19 = vsel %vm5720_vm3, %v1977_v4, %v1981_v1  ;;  %v5169_v4 = vld [vmem:[%s5708_s29 + $0x80] sm:$0x1] }
  0xe0   : > { %v6128_v40 = vpop.f32.mrf.mxu2 }
  0xe2   : > { %5131 = vmatmul.msk.bf16.gmra.mxu3 %vm695_vm4, %v5507_v30  ;;  %v1994_v30 = vshrl.u32 %v5167_v13, 16  ;;  %v5493_v13 = vld [vmem:[%s5708_s29 + $0x6c] sm:$0xff] }
  0xe4   : > { %v6136_v56 = vpop.f32.mrf.mxu0  ;;  %v1996_v54 = vrot.slane %v1994_v30, 4 }
  0xe5   : > { %v6139_v59 = vpop.f32.mrf.mxu3  ;;  %v977_v60 = vpop.f32.mrf.mxu1 }
  0xe6   : > { %v978_v62 = vadd.f32 %v977_v60, %v6013_v41  ;;  %v1992_v41 = vsel %vm5720_vm3, %v1987_v8, %v1991_v25  ;;  %v2005_v60 = vrot.slane %v2003_v33, 5  ;;  %v1174_v8 = vsel %vm5894_vm7, %v5003_v50, %v1173_v16 }
  0xe7   : > { %5196 = vmatmul.msk.bf16.gmra.mxu0 %vm695_vm4, %v2202_v27  ;;  %v2179_v27 = vunpack.c.l.b16 %v1982_v19  ;;  %v2180_v51 = vunpack.c.l.b16 %v1992_v41  ;;  %v2013_v19 = vshll.u32 %v5169_v4, 16 }
  0xe8   : > { %v6143_v10 = vpop.f32.mrf.mxu2  ;;  %4986 = vmatmul.msk.bf16.gmra.mxu1 %vm695_vm4, %v5492_v57  ;;  %v1999_v57 = vrot.slane %v1997_v31, 5  ;;  %v2010_v15 = vor.u32 %v2009_v20, %v2005_v60 }
  0xe9   : > { %v2203_v25 = vpack.c.b16 %v2180_v51, %v2179_v27  ;;  %v2015_v42 = vrot.slane %v2013_v19, 5  ;;  %v5171_v27 = vld [vmem:[%s5708_s29 + $0x88] sm:$0xf]  ;;  %v5571_v51 = vld [vmem:[%s5708_s29 + $0x7c] sm:$0xf] }
  0xea   : > { %v2000_v14 = vor.u32 %v1999_v57, %v1996_v54  ;;  %v1067_v54 = vld [vmem:[%s5708_s29 + $0x78] sm:$0xe] }
  0xec   : > { %v6154_v24 = vpop.f32.mrf.mxu0  ;;  %v2001_v21 = vrot.slane %v2000_v14, 4 }
  0xed   : > { %v6156_v32 = vpop.f32.mrf.mxu3  ;;  %5019 = vmatmul.msk.bf16.gmra.mxu2 %vm695_vm4, %v1262_v11  ;;  %v979_v35 = vpop.f32.mrf.mxu1 }
  0xee   : > { %v980_v1 = vadd.f32 %v979_v35, %v6036_v9  ;;  %v1177_v9 = vsel %vm5894_vm7, %v1175_v48, %v1176_v47  ;;  %v2011_v35 = vrot.slane %v2010_v15, 4  ;;  %v5170_v47 = vld [vmem:[%s5708_s29 + $0x84] sm:$0xf]  ;;  %v5509_v15 = vld [vmem:[%s5708_s29 + $0x78] sm:$0xff] }
  0xef   : > { %v1241_v30 = vunpack.c.l.b16 %v1177_v9  ;;  %v2021_v57 = vshll.u32 %v5170_v47, 16  ;;  %v2031_v9 = vshrl.u32 %v5171_v27, 16 }
  0xf0   : > { %v1330_v52 = vpop.f32.mrf.mxu2  ;;  %v2016_v4 = vsel %vm5720_vm3, %v2011_v35, %v2015_v42 }
  0xf1   : > { %v1410_v61 = vadd.f32 %v1330_v52, %v978_v62  ;;  %v1240_v62 = vunpack.c.l.b16 %v1174_v8  ;;  %v1180_v52 = vrot.slane %v5571_v51, 5  ;;  %v2027_v8 = vshll.u32 %v5171_v27, 16 }
  0xf2   : > { %5132 = vmatmul.msk.bf16.gmra.mxu3 %vm695_vm4, %v5508_v46  ;;  %v2033_v35 = vrot.slane %v2031_v9, 4 }
  0xf3   : > { %v1263_v48 = vpack.c.b16 %v1241_v30, %v1240_v62 }
  0xf4   : > { %v2271_v11 = vpop.f32.mrf.mxu0 }
  0xf5   : > { %v1617_v41 = vpop.f32.mrf.mxu3  ;;  %v982_v23 = vpop.f32.mrf.mxu1 }
  0xf6   : > { %v1697_v31 = vadd.f32 %v1617_v41, %v1410_v61  ;;  %v983_v16 = vadd.f32 %v982_v23, %v6055_v38  ;;  %v2018_v38 = vshrl.u32 %v5170_v47, 16  ;;  %v2006_v61 = vsel %vm5720_vm3, %v2001_v21, %v2005_v60 }
  0xf7   : > { %5197 = vmatmul.msk.bf16.gmra.mxu0 %vm695_vm4, %v2203_v25  ;;  %v5572_v25 = vld [vmem:[%s5708_s29 + $0x80] sm:$0x1]  ;;  %v5004_v41 = vrot.slane %v1067_v54, 9  ;;  %v1182_v23 = vrot.slane %v1180_v52, 4  ;;  %v2181_v62 = vunpack.c.l.b16 %v2006_v61  ;;  %v2182_v60 = vunpack.c.l.b16 %v2016_v4 }
  0xf8   : > { %v1332_v33 = vpop.f32.mrf.mxu2  ;;  %4987 = vmatmul.msk.bf16.gmra.mxu1 %vm695_vm4, %v5493_v13  ;;  %v6173_v46 = vadd.f32 %v2271_v11, %v1697_v31  ;;  %v1183_v11 = vrot.slane %v5572_v25, 5  ;;  %v2020_v30 = vrot.slane %v2018_v38, 4  ;;  %v2023_v31 = vrot.slane %v2021_v57, 5  ;;  %v5494_v38 = vld [vmem:[%s5708_s29 + $0x78] sm:$0xff] }
  0xf9   : > { %v1411_v50 = vadd.f32 %v1332_v33, %v980_v1  ;;  %v2029_v21 = vrot.slane %v2027_v8, 5  ;;  %v2204_v27 = vpack.c.b16 %v2182_v60, %v2181_v62  ;;  %v5174_v62 = vld [vmem:[%s5708_s29 + $0x94] sm:$0xf]  ;;  %v5573_v60 = vld [vmem:[%s5708_s29 + $0x88] sm:$0xf] }
  0xfa   : > { %v2024_v51 = vor.u32 %v2023_v31, %v2020_v30  ;;  %v1187_v30 = vrot.slane %v5573_v60, 5  ;;  %v1068_v31 = vld [vmem:[%s5708_s29 + $0x84] sm:$0xe] }
  0xfb   : > { %v2034_v57 = vor.u32 %v2033_v35, %v2029_v21 }
  0xfc   : > { %v2273_v20 = vpop.f32.mrf.mxu0  ;;  %v2025_v25 = vrot.slane %v2024_v51, 4 }
  0xfd   : > { %v1619_v1 = vpop.f32.mrf.mxu3  ;;  %5020 = vmatmul.msk.bf16.gmra.mxu2 %vm695_vm4, %v1263_v48  ;;  %v984_v13 = vpop.f32.mrf.mxu1  ;;  %v5172_v48 = vld [vmem:[%s5708_s29 + $0x8c] sm:$0x1] }
  0xfe   : > { %v1698_v14 = vadd.f32 %v1619_v1, %v1411_v50  ;;  %v985_v19 = vadd.f32 %v984_v13, %v6073_v3  ;;  %v1181_v50 = vsel %vm5894_vm7, %v5004_v41, %v1180_v52  ;;  %v1184_v3 = vsel %vm5894_vm7, %v1182_v23, %v1183_v11 }
  0xff   : > { %v2037_v61 = vshll.u32 %v5172_v48, 16  ;;  %v1243_v8 = vunpack.c.l.b16 %v1184_v3  ;;  %v2035_v1 = vrot.slane %v2034_v57, 4  ;;  %v2055_v3 = vshrl.u32 %v5174_v62, 16  ;;  %v5510_v57 = vld [vmem:[%s5708_s29 + $0x84] sm:$0xff] }
 0x100   : > { %v1335_v33 = vpop.f32.mrf.mxu2  ;;  %v6186_v42 = vadd.f32 %v2273_v20, %v1698_v14  ;;  %v5173_v14 = vld [vmem:[%s5708_s29 + $0x90] sm:$0xf] }
 0x101   : > { %v1412_v47 = vadd.f32 %v1335_v33, %v983_v16  ;;  %v1242_v16 = vunpack.c.l.b16 %v1181_v50  ;;  %v2039_v13 = vrot.slane %v2037_v61, 5  ;;  %v2042_v33 = vshrl.u32 %v5173_v14, 16 }
 0x102   : > { %5133 = vmatmul.msk.bf16.gmra.mxu3 %vm695_vm4, %v5509_v15  ;;  %v2045_v48 = vshll.u32 %v5173_v14, 16  ;;  %v2051_v50 = vshll.u32 %v5174_v62, 16  ;;  %v5005_v61 = vrot.slane %v1068_v31, 9 }
 0x103   : > { %v1264_v23 = vpack.c.b16 %v1243_v8, %v1242_v16  ;;  %v2044_v8 = vrot.slane %v2042_v33, 4 }
 0x104   : > { %v2276_v54 = vpop.f32.mrf.mxu0 }
 0x105   : > { %v1622_v4 = vpop.f32.mrf.mxu3  ;;  %v987_v20 = vpop.f32.mrf.mxu1 }
 0x106   : > { %v1699_v9 = vadd.f32 %v1622_v4, %v1412_v47  ;;  %v988_v52 = vadd.f32 %v987_v20, %v6095_v44  ;;  %v2030_v44 = vsel %vm5720_vm3, %v2025_v25, %v2029_v21  ;;  %v2040_v47 = vsel %vm5720_vm3, %v2035_v1, %v2039_v13 }
 0x107   : > { %5198 = vmatmul.msk.bf16.gmra.mxu0 %vm695_vm4, %v2204_v27  ;;  %v5574_v27 = vld [vmem:[%s5708_s29 + $0x8c] sm:$0x1]  ;;  %v1189_v4 = vrot.slane %v1187_v30, 4  ;;  %v2183_v20 = vunpack.c.l.b16 %v2030_v44  ;;  %v2184_v16 = vunpack.c.l.b16 %v2040_v47  ;;  %v2047_v25 = vrot.slane %v2045_v48, 5  ;;  %v5495_v44 = vld [vmem:[%s5708_s29 + $0x84] sm:$0xff] }
 0x108   : > { %v1337_v11 = vpop.f32.mrf.mxu2  ;;  %4988 = vmatmul.msk.bf16.gmra.mxu1 %vm695_vm4, %v5494_v38  ;;  %v6199_v15 = vadd.f32 %v2276_v54, %v1699_v9  ;;  %v1190_v51 = vrot.slane %v5574_v27, 5  ;;  %v2057_v1 = vrot.slane %v2055_v3, 4 }
 0x109   : > { %v1413_v41 = vadd.f32 %v1337_v11, %v985_v19  ;;  %v2053_v11 = vrot.slane %v2051_v50, 5  ;;  %v2205_v62 = vpack.c.b16 %v2184_v16, %v2183_v20  ;;  %v2048_v31 = vor.u32 %v2047_v25, %v2044_v8  ;;  %v5177_v20 = vld [vmem:[%s5708_s29 + $0xa0] sm:$0xf]  ;;  %v5575_v16 = vld [vmem:[%s5708_s29 + $0x94] sm:$0xf] }
 0x10a   : > { %v1194_v8 = vrot.slane %v5575_v16, 5 }
 0x10b   : > { %v2058_v33 = vor.u32 %v2057_v1, %v2053_v11 }
 0x10c   : > { %v2278_v35 = vpop.f32.mrf.mxu0 }
 0x10d   : > { %v1624_v19 = vpop.f32.mrf.mxu3  ;;  %5021 = vmatmul.msk.bf16.gmra.mxu2 %vm695_vm4, %v1264_v23  ;;  %v989_v54 = vpop.f32.mrf.mxu1  ;;  %v5175_v23 = vld [vmem:[%s5708_s29 + $0x98] sm:$0x1] }
 0x10e   : > { %v1700_v38 = vadd.f32 %v1624_v19, %v1413_v41  ;;  %v990_v21 = vadd.f32 %v989_v54, %v6113_v5  ;;  %v1188_v41 = vsel %vm5894_vm7, %v5005_v61, %v1187_v30  ;;  %v1191_v5 = vsel %vm5894_vm7, %v1189_v4, %v1190_v51 }
 0x10f   : > { %v2061_v47 = vshll.u32 %v5175_v23, 16  ;;  %v1245_v50 = vunpack.c.l.b16 %v1191_v5  ;;  %v2049_v51 = vrot.slane %v2048_v31, 4  ;;  %v2059_v19 = vrot.slane %v2058_v33, 4  ;;  %v5511_v33 = vld [vmem:[%s5708_s29 + $0x90] sm:$0xff] }
 0x110   : > { %v1340_v9 = vpop.f32.mrf.mxu2  ;;  %v6212_v13 = vadd.f32 %v2278_v35, %v1700_v38  ;;  %v5176_v38 = vld [vmem:[%s5708_s29 + $0x9c] sm:$0xf]  ;;  %v2079_v5 = vshrl.u32 %v5177_v20, 16 }
 0x111   : > { %v1414_v14 = vadd.f32 %v1340_v9, %v988_v52  ;;  %v1244_v52 = vunpack.c.l.b16 %v1188_v41  ;;  %v2063_v54 = vrot.slane %v2061_v47, 5  ;;  %v1069_v9 = vld [vmem:[%s5708_s29 + $0x90] sm:$0xe]  ;;  %v2069_v25 = vshll.u32 %v5176_v38, 16 }
 0x112   : > { %5134 = vmatmul.msk.bf16.gmra.mxu3 %vm695_vm4, %v5510_v57  ;;  %v2075_v41 = vshll.u32 %v5177_v20, 16 }
 0x113   : > { %v1265_v4 = vpack.c.b16 %v1245_v50, %v1244_v52  ;;  %v2064_v23 = vsel %vm5720_vm3, %v2059_v19, %v2063_v54  ;;  %v2081_v19 = vrot.slane %v2079_v5, 4 }
 0x114   : > { %v2281_v60 = vpop.f32.mrf.mxu0 }
 0x115   : > { %v1627_v48 = vpop.f32.mrf.mxu3  ;;  %v992_v35 = vpop.f32.mrf.mxu1 }
 0x116   : > { %v1701_v3 = vadd.f32 %v1627_v48, %v1414_v14  ;;  %v993_v30 = vadd.f32 %v992_v35, %v6136_v56  ;;  %v2066_v56 = vshrl.u32 %v5176_v38, 16  ;;  %v2054_v14 = vsel %vm5720_vm3, %v2049_v51, %v2053_v11 }
 0x117   : > { %5199 = vmatmul.msk.bf16.gmra.mxu0 %vm695_vm4, %v2205_v62  ;;  %v5576_v62 = vld [vmem:[%s5708_s29 + $0x98] sm:$0x1]  ;;  %v5006_v48 = vrot.slane %v1069_v9, 9  ;;  %v1196_v35 = vrot.slane %v1194_v8, 4  ;;  %v2185_v52 = vunpack.c.l.b16 %v2054_v14  ;;  %v2186_v11 = vunpack.c.l.b16 %v2064_v23 }
 0x118   : > { %v1342_v27 = vpop.f32.mrf.mxu2  ;;  %4989 = vmatmul.msk.bf16.gmra.mxu1 %vm695_vm4, %v5495_v44  ;;  %v6225_v57 = vadd.f32 %v2281_v60, %v1701_v3  ;;  %v1197_v60 = vrot.slane %v5576_v62, 5  ;;  %v2068_v50 = vrot.slane %v2066_v56, 4  ;;  %v2071_v3 = vrot.slane %v2069_v25, 5  ;;  %v5496_v56 = vld [vmem:[%s5708_s29 + $0x90] sm:$0xff] }
 0x119   : > { %v1415_v61 = vadd.f32 %v1342_v27, %v990_v21  ;;  %v2077_v51 = vrot.slane %v2075_v41, 5  ;;  %v2206_v20 = vpack.c.b16 %v2186_v11, %v2185_v52  ;;  %v5180_v11 = vld [vmem:[%s5708_s29 + $0xac] sm:$0xf] }
 0x11a   : > { %v2072_v16 = vor.u32 %v2071_v3, %v2068_v50  ;;  %v1070_v50 = vld [vmem:[%s5708_s29 + $0x9c] sm:$0xe] }
 0x11b   : > { %v2082_v25 = vor.u32 %v2081_v19, %v2077_v51 }
 0x11c   : > { %v2283_v1 = vpop.f32.mrf.mxu0 }
 0x11d   : > { %v1629_v21 = vpop.f32.mrf.mxu3  ;;  %5022 = vmatmul.msk.bf16.gmra.mxu2 %vm695_vm4, %v1265_v4  ;;  %v994_v44 = vpop.f32.mrf.mxu1  ;;  %v5178_v4 = vld [vmem:[%s5708_s29 + $0xa4] sm:$0x1] }
 0x11e   : > { %v1702_v31 = vadd.f32 %v1629_v21, %v1415_v61  ;;  %v995_v47 = vadd.f32 %v994_v44, %v6154_v24  ;;  %v1195_v61 = vsel %vm5894_vm7, %v5006_v48, %v1194_v8  ;;  %v1198_v24 = vsel %vm5894_vm7, %v1196_v35, %v1197_v60  ;;  %v5179_v44 = vld [vmem:[%s5708_s29 + $0xa8] sm:$0xf]  ;;  %v5577_v35 = vld [vmem:[%s5708_s29 + $0xa0] sm:$0xf] }
 0x11f   : > { %v2085_v14 = vshll.u32 %v5178_v4, 16  ;;  %v1247_v41 = vunpack.c.l.b16 %v1198_v24  ;;  %v2073_v8 = vrot.slane %v2072_v16, 4  ;;  %v2083_v60 = vrot.slane %v2082_v25, 4 }
 0x120   : > { %v1345_v27 = vpop.f32.mrf.mxu2  ;;  %v6238_v54 = vadd.f32 %v2283_v1, %v1702_v31  ;;  %v1201_v52 = vrot.slane %v5577_v35, 5  ;;  %v2093_v19 = vshll.u32 %v5179_v44, 16  ;;  %v2103_v24 = vshrl.u32 %v5180_v11, 16 }
 0x121   : > { %v1416_v38 = vadd.f32 %v1345_v27, %v993_v30  ;;  %v1246_v30 = vunpack.c.l.b16 %v1195_v61  ;;  %v2087_v21 = vrot.slane %v2085_v14, 5  ;;  %v2078_v3 = vsel %vm5720_vm3, %v2073_v8, %v2077_v51 }
 0x122   : > { %5135 = vmatmul.msk.bf16.gmra.mxu3 %vm695_vm4, %v5511_v33  ;;  %v2090_v27 = vshrl.u32 %v5179_v44, 16  ;;  %v2099_v61 = vshll.u32 %v5180_v11, 16  ;;  %v1203_v25 = vrot.slane %v1201_v52, 4  ;;  %v2187_v51 = vunpack.c.l.b16 %v2078_v3  ;;  %v5181_v11 = vld [vmem:[%s5708_s29 + $0xb0] sm:$0x1]  ;;  %v5497_v3 = vld [vmem:[%s5708_s29 + $0x9c] sm:$0xff] }
 0x123   : > { %v1266_v48 = vpack.c.b16 %v1247_v41, %v1246_v30  ;;  %v2088_v4 = vsel %vm5720_vm3, %v2083_v60, %v2087_v21  ;;  %v2095_v8 = vrot.slane %v2093_v19, 5  ;;  %v2105_v21 = vrot.slane %v2103_v24, 4 }
 0x124   : > { %v2286_v9 = vpop.f32.mrf.mxu0  ;;  %v2188_v41 = vunpack.c.l.b16 %v2088_v4  ;;  %v2101_v60 = vrot.slane %v2099_v61, 5  ;;  %v2109_v4 = vshll.u32 %v5181_v11, 16 }
 0x125   : > { %v1632_v1 = vpop.f32.mrf.mxu3  ;;  %v997_v23 = vpop.f32.mrf.mxu1 }
 0x126   : > { %v1703_v5 = vadd.f32 %v1632_v1, %v1416_v38  ;;  %v5512_v1 = vld [vmem:[%s5708_s29 + $0x9c] sm:$0xff]  ;;  %v998_v30 = vadd.f32 %v997_v23, %v5989_v7  ;;  %v2207_v7 = vpack.c.b16 %v2188_v41, %v2187_v51  ;;  %v2111_v51 = vrot.slane %v2109_v4, 5 }
 0x127   : > { %5200 = vmatmul.msk.bf16.gmra.mxu0 %vm695_vm4, %v2206_v20  ;;  %v5578_v20 = vld [vmem:[%s5708_s29 + $0xa4] sm:$0x1] }
 0x128   : > { %v1347_v62 = vpop.f32.mrf.mxu2  ;;  %4990 = vmatmul.msk.bf16.gmra.mxu1 %vm695_vm4, %v5496_v56  ;;  %v6250_v31 = vadd.f32 %v2286_v9, %v1703_v5  ;;  %v1204_v16 = vrot.slane %v5578_v20, 5  ;;  %v5007_v56 = vrot.slane %v1070_v50, 9  ;;  %v2092_v5 = vrot.slane %v2090_v27, 4 }
 0x129   : > { %v1417_v33 = vadd.f32 %v1347_v62, %v995_v47 }
 0x12a   : > { %v2096_v23 = vor.u32 %v2095_v8, %v2092_v5 }
 0x12c   : > { %v2288_v38 = vpop.f32.mrf.mxu0 }
 0x12d   : > { %v1634_v47 = vpop.f32.mrf.mxu3  ;;  %5023 = vmatmul.msk.bf16.gmra.mxu2 %vm695_vm4, %v1266_v48  ;;  %v999_v9 = vpop.f32.mrf.mxu1  ;;  %v1202_v48 = vsel %vm5894_vm7, %v5007_v56, %v1201_v52  ;;  %v5182_v52 = vld [vmem:[%s5708_s29 + $0xb4] sm:$0xf]  ;;  %v2097_v56 = vrot.slane %v2096_v23, 4 }
 0x12e   : > { %v1704_v14 = vadd.f32 %v1634_v47, %v1417_v33  ;;  %v1205_v33 = vsel %vm5894_vm7, %v1203_v25, %v1204_v16  ;;  %v1248_v27 = vunpack.c.l.b16 %v1202_v48  ;;  %v5183_v47 = vld [vmem:[%s5708_s29 + $0xb8] sm:$0xf]  ;;  %v1000_v16 = vadd.f32 %v999_v9, %v6005_v34 }
 0x12f   : > { %v1249_v19 = vunpack.c.l.b16 %v1205_v33  ;;  %v2114_v5 = vshrl.u32 %v5182_v52, 16  ;;  %v2117_v8 = vshll.u32 %v5182_v52, 16  ;;  %v2127_v48 = vshrl.u32 %v5183_v47, 16  ;;  %v1071_v33 = vld [vmem:[%s5708_s29 + $0xa8] sm:$0xe] }
 0x130   : > { %v1350_v62 = vpop.f32.mrf.mxu2  ;;  %v6263_v44 = vadd.f32 %v2288_v38, %v1704_v14  ;;  %v2106_v38 = vor.u32 %v2105_v21, %v2101_v60  ;;  %v5579_v21 = vld [vmem:[%s5708_s29 + $0xac] sm:$0xf]  ;;  %v2102_v9 = vsel %vm5720_vm3, %v2097_v56, %v2101_v60 }
 0x131   : > { %v1418_v35 = vadd.f32 %v1350_v62, %v998_v30  ;;  %v1267_v14 = vpack.c.b16 %v1249_v19, %v1248_v27  ;;  %v2123_v62 = vshll.u32 %v5183_v47, 16  ;;  %v2116_v27 = vrot.slane %v2114_v5, 4 }
 0x132   : > { %5136 = vmatmul.msk.bf16.gmra.mxu3 %vm695_vm4, %v5512_v1  ;;  %v2107_v1 = vrot.slane %v2106_v38, 4  ;;  %v2119_v19 = vrot.slane %v2117_v8, 5  ;;  %v2129_v47 = vrot.slane %v2127_v48, 4  ;;  %v5498_v48 = vld [vmem:[%s5708_s29 + $0xa8] sm:$0xff] }
 0x133   : > { %v2125_v38 = vrot.slane %v2123_v62, 5 }
 0x134   : > { %v2291_v50 = vpop.f32.mrf.mxu0  ;;  %v2112_v11 = vsel %vm5720_vm3, %v2107_v1, %v2111_v51 }
 0x135   : > { %v1637_v61 = vpop.f32.mrf.mxu3  ;;  %v1002_v24 = vpop.f32.mrf.mxu1  ;;  %v2190_v56 = vunpack.c.l.b16 %v2112_v11  ;;  %v2130_v8 = vor.u32 %v2129_v47, %v2125_v38 }
 0x136   : > { %v1705_v20 = vadd.f32 %v1637_v61, %v1418_v35  ;;  %v1208_v35 = vrot.slane %v5579_v21, 5  ;;  %v5513_v61 = vld [vmem:[%s5708_s29 + $0xa8] sm:$0xff]  ;;  %v1003_v60 = vadd.f32 %v1002_v24, %v6025_v58 }
 0x137   : > { %5201 = vmatmul.msk.bf16.gmra.mxu0 %vm695_vm4, %v2207_v7  ;;  %v5580_v7 = vld [vmem:[%s5708_s29 + $0xb0] sm:$0x1] }
 0x138   : > { %v1352_v25 = vpop.f32.mrf.mxu2  ;;  %4991 = vmatmul.msk.bf16.gmra.mxu1 %vm695_vm4, %v5497_v3  ;;  %v6277_v30 = vadd.f32 %v2291_v50, %v1705_v20  ;;  %v1211_v23 = vrot.slane %v5580_v7, 5  ;;  %v5008_v20 = vrot.slane %v1071_v33, 9  ;;  %v1210_v52 = vrot.slane %v1208_v35, 4 }
 0x139   : > { %v1419_v41 = vadd.f32 %v1352_v25, %v1000_v16  ;;  %v2189_v16 = vunpack.c.l.b16 %v2102_v9  ;;  %v5184_v25 = vld [vmem:[%s5708_s29 + $0xbc] sm:$0x1] }
 0x13a   : > { %v1212_v5 = vsel %vm5894_vm7, %v1210_v52, %v1211_v23  ;;  %v2133_v58 = vshll.u32 %v5184_v25, 16  ;;  %v5186_v52 = vld [vmem:[%s5708_s29 + $0xc4] sm:$0xf] }
 0x13b   : > { %v2208_v24 = vpack.c.b16 %v2190_v56, %v2189_v16  ;;  %v1251_v11 = vunpack.c.l.b16 %v1212_v5  ;;  %v1072_v16 = vld [vmem:[%s5708_s29 + $0xb4] sm:$0xe]  ;;  %v5582_v56 = vld [vmem:[%s5708_s29 + $0xb8] sm:$0xf]  ;;  %v2151_v5 = vshrl.u32 %v5186_v52, 16 }
 0x13c   : > { %v2293_v34 = vpop.f32.mrf.mxu0  ;;  %v1215_v25 = vrot.slane %v5582_v56, 5 }
 0x13d   : > { %v1639_v50 = vpop.f32.mrf.mxu3  ;;  %5024 = vmatmul.msk.bf16.gmra.mxu2 %vm695_vm4, %v1267_v14  ;;  %v1004_v3 = vpop.f32.mrf.mxu1  ;;  %v2120_v14 = vor.u32 %v2119_v19, %v2116_v27  ;;  %v2135_v27 = vrot.slane %v2133_v58, 5  ;;  %v5185_v19 = vld [vmem:[%s5708_s29 + $0xc0] sm:$0xf]  ;;  %v5583_v58 = vld [vmem:[%s5708_s29 + $0x14] sm:$0x1] }
 0x13e   : > { %v1706_v4 = vadd.f32 %v1639_v50, %v1419_v41  ;;  %v1209_v41 = vsel %vm5894_vm7, %v5008_v20, %v1208_v35  ;;  %v2131_v35 = vrot.slane %v2130_v8, 4  ;;  %v1005_v23 = vadd.f32 %v1004_v3, %v6042_v28 }
 0x13f   : > { %v1250_v9 = vunpack.c.l.b16 %v1209_v41  ;;  %v2121_v50 = vrot.slane %v2120_v14, 4  ;;  %v2138_v3 = vshrl.u32 %v5185_v19, 16  ;;  %v2141_v14 = vshll.u32 %v5185_v19, 16  ;;  %v5514_v19 = vld [vmem:[%s5708_s29 + $0xb4] sm:$0xff] }
 0x140   : > { %v1355_v1 = vpop.f32.mrf.mxu2  ;;  %v6290_v51 = vadd.f32 %v2293_v34, %v1706_v4  ;;  %v5581_v4 = vld [vmem:[%s5708_s29 + $0x10] sm:$0xf]  ;;  %v2136_v28 = vsel %vm5720_vm3, %v2131_v35, %v2135_v27  ;;  %v2147_v41 = vshll.u32 %v5186_v52, 16  ;;  %v1217_v35 = vrot.slane %v1215_v25, 4  ;;  %v5205_v27 = vld [vmem:[%s5708_s29 + $0xc] sm:$0xe] }
 0x141   : > { %v1420_v21 = vadd.f32 %v1355_v1, %v1003_v60  ;;  %v1268_v60 = vpack.c.b16 %v1251_v11, %v1250_v9  ;;  %v5584_v9 = vld [vmem:[%s5708_s29 + $0xbc] sm:$0x1]  ;;  %v5221_v52 = vrot.slane %v5205_v27, 9 }
 0x142   : > { %5137 = vmatmul.msk.bf16.gmra.mxu3 %vm695_vm4, %v5513_v61  ;;  %v2449_v61 = vrot.slane %v5581_v4, 5  ;;  %v2140_v4 = vrot.slane %v2138_v3, 4 }
 0x144   : > { %v2296_v62 = vpop.f32.mrf.mxu0  ;;  %v2451_v8 = vrot.slane %v2449_v61, 4 }
 0x145   : > { %v1642_v33 = vpop.f32.mrf.mxu3  ;;  %v1007_v34 = vpop.f32.mrf.mxu1 }
 0x146   : > { %v1707_v7 = vadd.f32 %v1642_v33, %v1420_v21  ;;  %v2126_v21 = vsel %vm5720_vm3, %v2121_v50, %v2125_v38  ;;  %v5009_v33 = vrot.slane %v1072_v16, 9  ;;  %v1008_v56 = vadd.f32 %v1007_v34, %v6062_v53 }
 0x147   : > { %5202 = vmatmul.msk.bf16.gmra.mxu0 %vm695_vm4, %v2208_v24  ;;  %v2452_v24 = vrot.slane %v5583_v58, 5  ;;  %v2191_v38 = vunpack.c.l.b16 %v2126_v21  ;;  %v2149_v16 = vrot.slane %v2147_v41, 5  ;;  %v2153_v58 = vrot.slane %v2151_v5, 4  ;;  %v5187_v21 = vld [vmem:[%s5708_s29 + $0xc8] sm:$0x1] }
 0x148   : > { %v1357_v20 = vpop.f32.mrf.mxu2  ;;  %4992 = vmatmul.msk.bf16.gmra.mxu1 %vm695_vm4, %v5498_v48  ;;  %v6306_v1 = vadd.f32 %v2296_v62, %v1707_v7  ;;  %v1218_v62 = vrot.slane %v5584_v9, 5  ;;  %v2192_v7 = vunpack.c.l.b16 %v2136_v28  ;;  %v2450_v28 = vsel %vm5894_vm7, %v5221_v52, %v2449_v61  ;;  %v5367_v41 = vld [vmem:[%s5708_s29 + $0x18] sm:$0xf] }
 0x149   : > { %v1421_v47 = vadd.f32 %v1357_v20, %v1005_v23  ;;  %v2143_v20 = vrot.slane %v2141_v14, 5  ;;  %v2561_v53 = vunpack.c.l.b16 %v2450_v28  ;;  %v2157_v27 = vshll.u32 %v5187_v21, 16 }
 0x14a   : > { %v1219_v14 = vsel %vm5894_vm7, %v1217_v35, %v1218_v62  ;;  %v2209_v5 = vpack.c.b16 %v2192_v7, %v2191_v38  ;;  %v3117_v62 = vshrl.u32 %v5367_v41, 16  ;;  %v3120_v35 = vshll.u32 %v5367_v41, 16 }
 0x14c   : > { %v2298_v48 = vpop.f32.mrf.mxu0  ;;  %v3119_v21 = vrot.slane %v3117_v62, 4 }
 0x14d   : > { %v1644_v11 = vpop.f32.mrf.mxu3  ;;  %5025 = vmatmul.msk.bf16.gmra.mxu2 %vm695_vm4, %v1268_v60  ;;  %v1009_v50 = vpop.f32.mrf.mxu1  ;;  %v1216_v60 = vsel %vm5894_vm7, %v5009_v33, %v1215_v25  ;;  %v6330_v25 = vld [vmem:[%s5708_s29 + $0x1c] sm:$0xf]  ;;  %v2154_v33 = vor.u32 %v2153_v58, %v2149_v16 }
 0x14e   : > { %v1708_v23 = vadd.f32 %v1644_v11, %v1421_v47  ;;  %v2453_v47 = vsel %vm5894_vm7, %v2451_v8, %v2452_v24  ;;  %v2144_v11 = vor.u32 %v2143_v20, %v2140_v4  ;;  %v5499_v24 = vld [vmem:[%s5708_s29 + $0xb4] sm:$0xff]  ;;  %v3130_v38 = vshrl.u32 %v6330_v25, 16 }
 0x14f   : > { %v2562_v34 = vunpack.c.l.b16 %v2453_v47  ;;  %v1010_v4 = vadd.f32 %v1009_v50, %v6082_v17 }
 0x150   : > { %v1360_v9 = vpop.f32.mrf.mxu2  ;;  %v6334_v52 = vadd.f32 %v2298_v48, %v1708_v23  ;;  %v2145_v48 = vrot.slane %v2144_v11, 4  ;;  %v2155_v23 = vrot.slane %v2154_v33, 4  ;;  %v3132_v41 = vrot.slane %v3130_v38, 4 }
 0x151   : > { %v1422_v3 = vadd.f32 %v1360_v9, %v1008_v56  ;;  %v6332_v61 = vpack.c.b16 %v2562_v34, %v2561_v53  ;;  %v1252_v56 = vunpack.c.l.b16 %v1216_v60  ;;  %v1253_v9 = vunpack.c.l.b16 %v1219_v14 }
 0x152   : > { %5138 = vmatmul.msk.bf16.gmra.mxu3 %vm695_vm4, %v5514_v19  ;;  %7630 = vst [vmem:[#allocation2_spill] sm:$0xff] %v6334_v52  ;;  %v3126_v19 = vshll.u32 %v6330_v25, 16  ;;  %v2159_v60 = vrot.slane %v2157_v27, 5  ;;  %v3122_v14 = vrot.slane %v3120_v35, 5  ;;  %v2150_v17 = vsel %vm5720_vm3, %v2145_v48, %v2149_v16  ;;  %v5432_v48 = vld [vmem:[%s5708_s29 + $0x18] sm:$0xe] }
 0x153   : > { %v1269_v58 = vpack.c.b16 %v1253_v9, %v1252_v56  ;;  %v2193_v62 = vunpack.c.l.b16 %v2150_v17  ;;  %v5448_v17 = vrot.slane %v5432_v48, 9 }
 0x154   : > { %v2301_v8 = vpop.f32.mrf.mxu0  ;;  %v3128_v34 = vrot.slane %v3126_v19, 5  ;;  %v2160_v50 = vsel %vm5720_vm3, %v2155_v23, %v2159_v60  ;;  %v3123_v33 = vor.u32 %v3122_v14, %v3119_v21  ;;  %v3788_v23 = vrot.slane %v6330_v25, 5 }
 0x155   : > { %v1647_v28 = vpop.f32.mrf.mxu3  ;;  %v1012_v47 = vpop.f32.mrf.mxu1  ;;  %v2194_v35 = vunpack.c.l.b16 %v2160_v50  ;;  %v5585_v50 = vld [vmem:[%s5708_s29 + $0x1c] sm:$0xf] }
 0x156   : > { %v1709_v7 = vadd.f32 %v1647_v28, %v1422_v3  ;;  %v5369_v3 = vld [vmem:[%s5708_s29 + $0x20] sm:$0x1]  ;;  %v3133_v27 = vor.u32 %v3132_v41, %v3128_v34  ;;  %v1013_v9 = vadd.f32 %v1012_v47, %v6105_v2  ;;  %v3124_v38 = vrot.slane %v3123_v33, 4  ;;  %v6359_v2 = vld [vmem:[%s5708_s29 + $0x28] sm:$0xf] }
 0x157   : > { %5203 = vmatmul.msk.bf16.gmra.mxu0 %vm695_vm4, %v2209_v5  ;;  %v2456_v25 = vrot.slane %v5585_v50, 5  ;;  %v3790_v33 = vrot.slane %v3788_v23, 4 }
 0x158   : > { %v1362_v20 = vpop.f32.mrf.mxu2  ;;  %4993 = vmatmul.msk.bf16.gmra.mxu1 %vm695_vm4, %v5499_v24  ;;  %v6342_v52 = vadd.f32 %v2301_v8, %v1709_v7  ;;  %v3136_v24 = vshll.u32 %v5369_v3, 16  ;;  %v5515_v8 = vld [vmem:[%s5708_s29 + $0xc0] sm:$0xff]  ;;  %v3134_v7 = vrot.slane %v3133_v27, 4  ;;  %v5206_v27 = vld [vmem:[%s5708_s29 + $0x18] sm:$0xe] }
 0x159   : > { %v1423_v53 = vadd.f32 %v1362_v20, %v1010_v4  ;;  %v2210_v20 = vpack.c.b16 %v2194_v35, %v2193_v62 }
 0x15a   : > { %v3138_v4 = vrot.slane %v3136_v24, 5 }
 0x15c   : > { %v2303_v28 = vpop.f32.mrf.mxu0  ;;  %v3139_v41 = vsel %vm5720_vm3, %v3134_v7, %v3138_v4  ;;  %v5222_v7 = vrot.slane %v5206_v27, 9  ;;  %v2458_v4 = vrot.slane %v2456_v25, 4 }
 0x15d   : > { %v1649_v5 = vpop.f32.mrf.mxu3  ;;  %5026 = vmatmul.msk.bf16.gmra.mxu2 %vm695_vm4, %v1269_v58  ;;  %v1014_v11 = vpop.f32.mrf.mxu1  ;;  %v5370_v58 = vld [vmem:[%s5708_s29 + $0x24] sm:$0xf] }
 0x15e   : > { %v1710_v56 = vadd.f32 %v1649_v5, %v1423_v53  ;;  %v3129_v53 = vsel %vm5720_vm3, %v3124_v38, %v3128_v34  ;;  %v3141_v24 = vshrl.u32 %v5370_v58, 16  ;;  %v3150_v34 = vshll.u32 %v6359_v2, 16  ;;  %v5516_v38 = vld [vmem:[%s5708_s29 + $0x18] sm:$0xff] }
 0x15f   : > { %v3502_v48 = vunpack.c.l.b16 %v3129_v53  ;;  %v2457_v53 = vsel %vm5894_vm7, %v5222_v7, %v2456_v25 }
 0x160   : > { %v1365_v16 = vpop.f32.mrf.mxu2  ;;  %v6356_v60 = vadd.f32 %v2303_v28, %v1710_v56  ;;  %v3791_v28 = vrot.slane %v5369_v3, 5  ;;  %v1015_v56 = vadd.f32 %v1014_v11, %v6125_v29  ;;  %v3503_v29 = vunpack.c.l.b16 %v3139_v41 }
 0x161   : > { %v1424_v19 = vadd.f32 %v1365_v16, %v1013_v9  ;;  %v3154_v9 = vshrl.u32 %v6359_v2, 16  ;;  %v5586_v16 = vld [vmem:[%s5708_s29 + $0x20] sm:$0x1]  ;;  %v3789_v11 = vsel %vm5894_vm7, %v5448_v17, %v3788_v23 }
 0x162   : > { %5139 = vmatmul.msk.bf16.gmra.mxu3 %vm695_vm4, %v5515_v8  ;;  %v3144_v8 = vshll.u32 %v5370_v58, 16  ;;  %v2459_v3 = vrot.slane %v5586_v16, 5  ;;  %v3143_v58 = vrot.slane %v3141_v24, 4  ;;  %v3534_v17 = vpack.c.b16 %v3503_v29, %v3502_v48  ;;  %v5433_v48 = vld [vmem:[%s5708_s29 + $0x24] sm:$0xe] }
 0x163   : > { %v2563_v16 = vunpack.c.l.b16 %v2457_v53  ;;  %v3795_v29 = vrot.slane %v6359_v2, 5  ;;  %v5587_v53 = vld [vmem:[%s5708_s29 + $0x28] sm:$0xf] }
 0x164   : > { %v2306_v21 = vpop.f32.mrf.mxu0  ;;  %v2460_v23 = vsel %vm5894_vm7, %v2458_v4, %v2459_v3  ;;  %v6398_v3 = vld [vmem:[%s5708_s29 + $0x34] sm:$0xf] }
 0x165   : > { %v1652_v47 = vpop.f32.mrf.mxu3  ;;  %v1017_v14 = vpop.f32.mrf.mxu1 }
 0x166   : > { %v1711_v5 = vadd.f32 %v1652_v47, %v1424_v19  ;;  %v3146_v47 = vrot.slane %v3144_v8, 5  ;;  %v1018_v24 = vadd.f32 %v1017_v14, %v6007_v37 }
 0x167   : > { %5204 = vmatmul.msk.bf16.gmra.mxu0 %vm695_vm4, %v2210_v20  ;;  %v3792_v20 = vsel %vm5894_vm7, %v3790_v33, %v3791_v28  ;;  %v3900_v33 = vunpack.c.l.b16 %v3789_v11 }
 0x168   : > { %v1367_v62 = vpop.f32.mrf.mxu2  ;;  %5238 = vmatmul.msk.bf16.vlgmr.msra.gmra.mxu1 %vm695_vm4, %v6332_v61  ;;  %v6373_v35 = vadd.f32 %v2306_v21, %v1711_v5  ;;  %v6381_v61 = vrot.slane %v3150_v34, 5  ;;  %v3156_v21 = vrot.slane %v3154_v9, 4  ;;  %v6384_v5 = vld [vmem:[%s5708_s29 + $0x2c] sm:$0x1]  ;;  %v3901_v28 = vunpack.c.l.b16 %v3792_v20 }
 0x169   : > { %v1425_v19 = vadd.f32 %v1367_v62, %v1015_v56  ;;  %v3147_v8 = vor.u32 %v3146_v47, %v3143_v58  ;;  %v3160_v9 = vshll.u32 %v6384_v5, 16  ;;  %v3798_v2 = vrot.slane %v6384_v5, 5 }
 0x16a   : > { %7631 = vst [vmem:[#allocation3_spill] sm:$0xff] %v6373_v35  ;;  %v3157_v34 = vor.u32 %v3156_v21, %v6381_v61  ;;  %v5373_v35 = vld [vmem:[%s5708_s29 + $0x30] sm:$0xf]  ;;  %v3174_v21 = vshll.u32 %v6398_v3, 16 }
 0x16b   : > { %v3148_v37 = vrot.slane %v3147_v8, 4  ;;  %v3162_v4 = vrot.slane %v3160_v9, 5  ;;  %v3165_v58 = vshrl.u32 %v5373_v35, 16  ;;  %v3168_v47 = vshll.u32 %v5373_v35, 16  ;;  %v5207_v8 = vld [vmem:[%s5708_s29 + $0x24] sm:$0xe] }
 0x16c   : > { %v2308_v50 = vpop.f32.mrf.mxu0  ;;  %v3158_v14 = vrot.slane %v3157_v34, 4  ;;  %v3176_v5 = vrot.slane %v3174_v21, 5 }
 0x16d   : > { %v1654_v56 = vpop.f32.mrf.mxu3  ;;  %5351 = vmatmul.msk.bf16.vlgmr.msra.gmra.mxu2 %vm695_vm4, %v5516_v38  ;;  %v1019_v27 = vpop.f32.mrf.mxu1  ;;  %v2564_v38 = vunpack.c.l.b16 %v2460_v23  ;;  %v2463_v23 = vrot.slane %v5587_v53, 5  ;;  %v3153_v34 = vsel %vm5720_vm3, %v3148_v37, %v6381_v61  ;;  %v6421_v37 = vld [vmem:[%s5708_s29 + $0x38] sm:$0x1] }
 0x16e   : > { %v1712_v41 = vadd.f32 %v1654_v56, %v1425_v19  ;;  %v3932_v19 = vpack.c.b16 %v3901_v28, %v3900_v33  ;;  %v1020_v35 = vadd.f32 %v1019_v27, %v6028_v63  ;;  %v3163_v9 = vsel %vm5720_vm3, %v3158_v14, %v3162_v4 }
 0x16f   : > { %v2594_v20 = vpack.c.b16 %v2564_v38, %v2563_v16  ;;  %v3167_v38 = vrot.slane %v3165_v58, 4  ;;  %v5223_v63 = vrot.slane %v5207_v8, 9  ;;  %v2465_v27 = vrot.slane %v2463_v23, 4 }
 0x170   : > { %v1370_v62 = vpop.f32.mrf.mxu2  ;;  %v6394_v25 = vadd.f32 %v2308_v50, %v1712_v41  ;;  %v3178_v41 = vshrl.u32 %v6398_v3, 16  ;;  %v3505_v61 = vunpack.c.l.b16 %v3163_v9 }
 0x171   : > { %v1426_v7 = vadd.f32 %v1370_v62, %v1018_v24  ;;  %v5449_v24 = vrot.slane %v5433_v48, 9  ;;  %v3797_v62 = vrot.slane %v3795_v29, 4 }
 0x172   : > { %7632 = vst [vmem:[#allocation4_spill] sm:$0xff] %v6394_v25  ;;  %5416 = vmatmul.msk.bf16.vlgmr.msra.gmra.mxu3 %vm695_vm4, %v3534_v17  ;;  %v5588_v17 = vld [vmem:[%s5708_s29 + $0x2c] sm:$0x1]  ;;  %v3180_v53 = vrot.slane %v3178_v41, 4 }
 0x173   : > { %v2466_v33 = vrot.slane %v5588_v17, 5  ;;  %v3504_v17 = vunpack.c.l.b16 %v3153_v34  ;;  %v3796_v14 = vsel %vm5894_vm7, %v5449_v24, %v3795_v29  ;;  %v3799_v4 = vsel %vm5894_vm7, %v3797_v62, %v3798_v2 }
 0x174   : > { %v2311_v11 = vpop.f32.mrf.mxu0  ;;  %v3181_v41 = vor.u32 %v3180_v53, %v3176_v5  ;;  %v3902_v2 = vunpack.c.l.b16 %v3796_v14  ;;  %v5434_v14 = vld [vmem:[%s5708_s29 + $0x30] sm:$0xe] }
 0x175   : > { %v1657_v50 = vpop.f32.mrf.mxu3  ;;  %v1022_v56 = vpop.f32.mrf.mxu1  ;;  %v2467_v21 = vsel %vm5894_vm7, %v2465_v27, %v2466_v33  ;;  %v3535_v29 = vpack.c.b16 %v3505_v61, %v3504_v17 }
 0x176   : > { %v1713_v28 = vadd.f32 %v1657_v50, %v1426_v7  ;;  %v3170_v7 = vrot.slane %v3168_v47, 5  ;;  %v5517_v50 = vld [vmem:[%s5708_s29 + $0x24] sm:$0xff]  ;;  %v2464_v47 = vsel %vm5894_vm7, %v5223_v63, %v2463_v23  ;;  %v1023_v24 = vadd.f32 %v1022_v56, %v6045_v22  ;;  %v6439_v63 = vld [vmem:[%s5708_s29 + $0x40] sm:$0xf] }
 0x177   : > { %5465 = vmatmul.msk.bf16.vlgmr.msra.gmra.mxu0 %vm695_vm4, %v3932_v19  ;;  %v2565_v9 = vunpack.c.l.b16 %v2464_v47  ;;  %v2566_v62 = vunpack.c.l.b16 %v2467_v21  ;;  %v5208_v21 = vld [vmem:[%s5708_s29 + $0x30] sm:$0xe] }
 0x178   : > { %v1372_v16 = vpop.f32.mrf.mxu2  ;;  %5239 = vmatmul.msk.bf16.gmra.mxu1 %vm695_vm4, %v2594_v20  ;;  %v6417_v48 = vadd.f32 %v2311_v11, %v1713_v28  ;;  %v3171_v20 = vor.u32 %v3170_v7, %v3167_v38  ;;  %v3184_v28 = vshll.u32 %v6421_v37, 16  ;;  %v3182_v38 = vrot.slane %v3181_v41, 4 }
 0x179   : > { %v1427_v19 = vadd.f32 %v1372_v16, %v1020_v35  ;;  %v3903_v35 = vunpack.c.l.b16 %v3799_v4  ;;  %v2595_v56 = vpack.c.b16 %v2566_v62, %v2565_v9  ;;  %v5589_v4 = vld [vmem:[%s5708_s29 + $0x34] sm:$0xf]  ;;  %v3805_v9 = vrot.slane %v6421_v37, 5 }
 0x17a   : > { %v3172_v16 = vrot.slane %v3171_v20, 4  ;;  %v3186_v7 = vrot.slane %v3184_v28, 5  ;;  %v2470_v20 = vrot.slane %v5589_v4, 5  ;;  %v3198_v28 = vshll.u32 %v6439_v63, 16 }
 0x17c   : > { %v2313_v25 = vpop.f32.mrf.mxu0  ;;  %v3177_v27 = vsel %vm5720_vm3, %v3172_v16, %v3176_v5  ;;  %v3187_v61 = vsel %vm5720_vm3, %v3182_v38, %v3186_v7  ;;  %v5590_v5 = vld [vmem:[%s5708_s29 + $0x38] sm:$0x1]  ;;  %v5224_v7 = vrot.slane %v5208_v21, 9  ;;  %v6459_v4 = vrot.slane %v3198_v28, 5 }
 0x17d   : > { %v1659_v58 = vpop.f32.mrf.mxu3  ;;  %5352 = vmatmul.msk.bf16.gmra.mxu2 %vm695_vm4, %v5517_v50  ;;  %v1024_v11 = vpop.f32.mrf.mxu1  ;;  %v3933_v50 = vpack.c.b16 %v3903_v35, %v3902_v2  ;;  %v5450_v35 = vrot.slane %v5434_v14, 9  ;;  %v3507_v38 = vunpack.c.l.b16 %v3187_v61 }
 0x17e   : > { %v1714_v8 = vadd.f32 %v1659_v58, %v1427_v19  ;;  %v5376_v19 = vld [vmem:[%s5708_s29 + $0x3c] sm:$0xf] }
 0x17f   : > { %v3189_v58 = vshrl.u32 %v5376_v19, 16  ;;  %v3192_v41 = vshll.u32 %v5376_v19, 16  ;;  %v2472_v19 = vrot.slane %v2470_v20, 4 }
 0x180   : > { %v1375_v34 = vpop.f32.mrf.mxu2  ;;  %v6434_v23 = vadd.f32 %v2313_v25, %v1714_v8  ;;  %v3802_v25 = vrot.slane %v6398_v3, 5  ;;  %v3202_v8 = vshrl.u32 %v6439_v63, 16  ;;  %v1025_v3 = vadd.f32 %v1024_v11, %v6066_v55  ;;  %v6462_v11 = vld [vmem:[%s5708_s29 + $0x44] sm:$0x1] }
 0x181   : > { %v1428_v33 = vadd.f32 %v1375_v34, %v1023_v24  ;;  %v3506_v24 = vunpack.c.l.b16 %v3177_v27  ;;  %v3208_v28 = vshll.u32 %v6462_v11, 16 }
 0x182   : > { %5417 = vmatmul.msk.bf16.gmra.mxu3 %vm695_vm4, %v3535_v29  ;;  %v2473_v29 = vrot.slane %v5590_v5, 5  ;;  %v3804_v34 = vrot.slane %v3802_v25, 4  ;;  %v3204_v55 = vrot.slane %v3202_v8, 4 }
 0x183   : > { %v3536_v61 = vpack.c.b16 %v3507_v38, %v3506_v24  ;;  %v3210_v38 = vrot.slane %v3208_v28, 5  ;;  %v5209_v28 = vld [vmem:[%s5708_s29 + $0x3c] sm:$0xe] }
 0x184   : > { %v2316_v22 = vpop.f32.mrf.mxu0  ;;  %v3806_v37 = vsel %vm5894_vm7, %v3804_v34, %v3805_v9  ;;  %v5379_v9 = vld [vmem:[%s5708_s29 + $0x48] sm:$0xf] }
 0x185   : > { %v1662_v53 = vpop.f32.mrf.mxu3  ;;  %v1027_v17 = vpop.f32.mrf.mxu1 }
 0x186   : > { %v1715_v47 = vadd.f32 %v1662_v53, %v1428_v33  ;;  %v5518_v33 = vld [vmem:[%s5708_s29 + $0x30] sm:$0xff]  ;;  %v3191_v53 = vrot.slane %v3189_v58, 4  ;;  %v2471_v58 = vsel %vm5894_vm7, %v5224_v7, %v2470_v20  ;;  %v1028_v8 = vadd.f32 %v1027_v17, %v6089_v26 }
 0x187   : > { %5466 = vmatmul.msk.bf16.gmra.mxu0 %vm695_vm4, %v3933_v50  ;;  %v3194_v50 = vrot.slane %v3192_v41, 5  ;;  %v3809_v17 = vrot.slane %v6439_v63, 5 }
 0x188   : > { %v1377_v2 = vpop.f32.mrf.mxu2  ;;  %5240 = vmatmul.msk.bf16.gmra.mxu1 %vm695_vm4, %v2595_v56  ;;  %v6456_v62 = vadd.f32 %v2316_v22, %v1715_v47  ;;  %v3803_v56 = vsel %vm5894_vm7, %v5450_v35, %v3802_v25  ;;  %v2474_v47 = vsel %vm5894_vm7, %v2472_v19, %v2473_v29  ;;  %v3205_v25 = vor.u32 %v3204_v55, %v6459_v4  ;;  %v6480_v29 = vld [vmem:[%s5708_s29 + $0x4c] sm:$0xf] }
 0x189   : > { %v1429_v16 = vadd.f32 %v1377_v2, %v1025_v3  ;;  %v3195_v41 = vor.u32 %v3194_v50, %v3191_v53  ;;  %v3904_v5 = vunpack.c.l.b16 %v3803_v56  ;;  %v3905_v3 = vunpack.c.l.b16 %v3806_v37  ;;  %v5435_v53 = vld [vmem:[%s5708_s29 + $0x3c] sm:$0xe] }
 0x18a   : > { %v2567_v2 = vunpack.c.l.b16 %v2471_v58  ;;  %v2568_v35 = vunpack.c.l.b16 %v2474_v47  ;;  %v3213_v50 = vshrl.u32 %v5379_v9, 16  ;;  %v3216_v55 = vshll.u32 %v5379_v9, 16  ;;  %v5592_v47 = vld [vmem:[%s5708_s29 + $0x44] sm:$0x1] }
 0x18b   : > { %v3934_v26 = vpack.c.b16 %v3905_v3, %v3904_v5  ;;  %v5451_v5 = vrot.slane %v5435_v53, 9  ;;  %v3811_v3 = vrot.slane %v3809_v17, 4  ;;  %v6503_v53 = vld [vmem:[%s5708_s29 + $0x50] sm:$0x1] }
 0x18c   : > { %v2318_v27 = vpop.f32.mrf.mxu0  ;;  %v2596_v19 = vpack.c.b16 %v2568_v35, %v2567_v2  ;;  %v3215_v35 = vrot.slane %v3213_v50, 4 }
 0x18d   : > { %v1664_v22 = vpop.f32.mrf.mxu3  ;;  %5353 = vmatmul.msk.bf16.gmra.mxu2 %vm695_vm4, %v5518_v33  ;;  %v1029_v14 = vpop.f32.mrf.mxu1  ;;  %v3206_v33 = vrot.slane %v3205_v25, 4 }
 0x18e   : > { %v1716_v21 = vadd.f32 %v1664_v22, %v1429_v16  ;;  %v3196_v16 = vrot.slane %v3195_v41, 4  ;;  %v5591_v22 = vld [vmem:[%s5708_s29 + $0x40] sm:$0xf] }
 0x18f   : > { %v2477_v58 = vrot.slane %v5591_v22, 5  ;;  %v3211_v25 = vsel %vm5720_vm3, %v3206_v33, %v3210_v38  ;;  %v5519_v33 = vld [vmem:[%s5708_s29 + $0x3c] sm:$0xff]  ;;  %v5225_v38 = vrot.slane %v5209_v28, 9 }
 0x190   : > { %v1380_v24 = vpop.f32.mrf.mxu2  ;;  %v6476_v34 = vadd.f32 %v2318_v27, %v1716_v21  ;;  %v3222_v27 = vshll.u32 %v6480_v29, 16  ;;  %v2480_v21 = vrot.slane %v5592_v47, 5  ;;  %v3201_v63 = vsel %vm5720_vm3, %v3196_v16, %v6459_v4 }
 0x191   : > { %v1430_v20 = vadd.f32 %v1380_v24, %v1028_v8  ;;  %v1030_v8 = vadd.f32 %v1029_v14, %v6107_v43  ;;  %v3812_v24 = vrot.slane %v6462_v11, 5  ;;  %v3508_v14 = vunpack.c.l.b16 %v3201_v63 }
 0x192   : > { %5418 = vmatmul.msk.bf16.gmra.mxu3 %vm695_vm4, %v3536_v61  ;;  %v3226_v61 = vshrl.u32 %v6480_v29, 16  ;;  %v3224_v9 = vrot.slane %v3222_v27, 5  ;;  %v3810_v11 = vsel %vm5894_vm7, %v5451_v5, %v3809_v17  ;;  %v2478_v27 = vsel %vm5894_vm7, %v5225_v38, %v2477_v58  ;;  %v6521_v38 = vld [vmem:[%s5708_s29 + $0x58] sm:$0xf] }
 0x193   : > { %v3906_v28 = vunpack.c.l.b16 %v3810_v11  ;;  %v5436_v11 = vld [vmem:[%s5708_s29 + $0x48] sm:$0xe] }
 0x194   : > { %v2321_v7 = vpop.f32.mrf.mxu0  ;;  %v3228_v43 = vrot.slane %v3226_v61, 4 }
 0x195   : > { %v1667_v56 = vpop.f32.mrf.mxu3  ;;  %v1032_v37 = vpop.f32.mrf.mxu1 }
 0x196   : > { %v1717_v41 = vadd.f32 %v1667_v56, %v1430_v20  ;;  %v3218_v20 = vrot.slane %v3216_v55, 5  ;;  %v2479_v56 = vrot.slane %v2477_v58, 4  ;;  %v3229_v47 = vor.u32 %v3228_v43, %v3224_v9 }
 0x197   : > { %5467 = vmatmul.msk.bf16.gmra.mxu0 %vm695_vm4, %v3934_v26  ;;  %v3509_v26 = vunpack.c.l.b16 %v3211_v25  ;;  %v1033_v25 = vadd.f32 %v1032_v37, %v6128_v40  ;;  %v3816_v43 = vrot.slane %v6480_v29, 5 }
 0x198   : > { %v1382_v2 = vpop.f32.mrf.mxu2  ;;  %5241 = vmatmul.msk.bf16.gmra.mxu1 %vm695_vm4, %v2596_v19  ;;  %v6499_v4 = vadd.f32 %v2321_v7, %v1717_v41  ;;  %v3813_v19 = vsel %vm5894_vm7, %v3811_v3, %v3812_v24  ;;  %v3219_v50 = vor.u32 %v3218_v20, %v3215_v35  ;;  %v2481_v61 = vsel %vm5894_vm7, %v2479_v56, %v2480_v21 }
 0x199   : > { %v1431_v16 = vadd.f32 %v1382_v2, %v1030_v8  ;;  %v3232_v41 = vshll.u32 %v6503_v53, 16  ;;  %v3537_v17 = vpack.c.b16 %v3509_v26, %v3508_v14  ;;  %v3907_v8 = vunpack.c.l.b16 %v3813_v19  ;;  %v5593_v19 = vld [vmem:[%s5708_s29 + $0x4c] sm:$0xf] }
 0x19a   : > { %v2569_v3 = vunpack.c.l.b16 %v2478_v27  ;;  %v2570_v24 = vunpack.c.l.b16 %v2481_v61  ;;  %v3220_v2 = vrot.slane %v3219_v50, 4  ;;  %v3230_v35 = vrot.slane %v3229_v47, 4  ;;  %v5210_v61 = vld [vmem:[%s5708_s29 + $0x48] sm:$0xe] }
 0x19b   : > { %v3234_v20 = vrot.slane %v3232_v41, 5  ;;  %v2484_v50 = vrot.slane %v5593_v19, 5  ;;  %v3246_v41 = vshll.u32 %v6521_v38, 16 }
 0x19c   : > { %v2323_v22 = vpop.f32.mrf.mxu0  ;;  %v2597_v37 = vpack.c.b16 %v2570_v24, %v2569_v3  ;;  %v3225_v56 = vsel %vm5720_vm3, %v3220_v2, %v3224_v9  ;;  %v5594_v9 = vld [vmem:[%s5708_s29 + $0x50] sm:$0x1]  ;;  %v3819_v3 = vrot.slane %v6503_v53, 5 }
 0x19d   : > { %v1669_v55 = vpop.f32.mrf.mxu3  ;;  %5354 = vmatmul.msk.bf16.gmra.mxu2 %vm695_vm4, %v5519_v33  ;;  %v1034_v7 = vpop.f32.mrf.mxu1  ;;  %v3935_v33 = vpack.c.b16 %v3907_v8, %v3906_v28  ;;  %v5452_v8 = vrot.slane %v5436_v11, 9 }
 0x19e   : > { %v1718_v63 = vadd.f32 %v1669_v55, %v1431_v16  ;;  %v5382_v16 = vld [vmem:[%s5708_s29 + $0x54] sm:$0xf]  ;;  %v1035_v29 = vadd.f32 %v1034_v7, %v6143_v10  ;;  %v6541_v7 = vrot.slane %v3246_v41, 5 }
 0x19f   : > { %v3237_v55 = vshrl.u32 %v5382_v16, 16  ;;  %v3240_v47 = vshll.u32 %v5382_v16, 16  ;;  %v2486_v16 = vrot.slane %v2484_v50, 4 }
 0x1a0   : > { %v1385_v5 = vpop.f32.mrf.mxu2  ;;  %v6516_v58 = vadd.f32 %v2323_v22, %v1718_v63  ;;  %v3235_v22 = vsel %vm5720_vm3, %v3230_v35, %v3234_v20  ;;  %v3250_v63 = vshrl.u32 %v6521_v38, 16  ;;  %v5226_v20 = vrot.slane %v5210_v61, 9 }
 0x1a1   : > { %v1432_v21 = vadd.f32 %v1385_v5, %v1033_v25  ;;  %v3510_v25 = vunpack.c.l.b16 %v3225_v56  ;;  %v3818_v5 = vrot.slane %v3816_v43, 4  ;;  %v3511_v35 = vunpack.c.l.b16 %v3235_v22  ;;  %v6544_v56 = vld [vmem:[%s5708_s29 + $0x5c] sm:$0x1] }
 0x1a2   : > { %5419 = vmatmul.msk.bf16.gmra.mxu3 %vm695_vm4, %v3537_v17  ;;  %v2487_v17 = vrot.slane %v5594_v9, 5  ;;  %v3242_v10 = vrot.slane %v3240_v47, 5  ;;  %v3256_v41 = vshll.u32 %v6544_v56, 16 }
 0x1a3   : > { %v3820_v53 = vsel %vm5894_vm7, %v3818_v5, %v3819_v3  ;;  %v3538_v22 = vpack.c.b16 %v3511_v35, %v3510_v25  ;;  %v5385_v3 = vld [vmem:[%s5708_s29 + $0x60] sm:$0xf] }
 0x1a4   : > { %v2326_v40 = vpop.f32.mrf.mxu0  ;;  %v3258_v35 = vrot.slane %v3256_v41, 5  ;;  %v5211_v41 = vld [vmem:[%s5708_s29 + $0x54] sm:$0xe] }
 0x1a5   : > { %v1672_v14 = vpop.f32.mrf.mxu3  ;;  %v1037_v26 = vpop.f32.mrf.mxu1 }
 0x1a6   : > { %v1719_v27 = vadd.f32 %v1672_v14, %v1432_v21  ;;  %v5520_v21 = vld [vmem:[%s5708_s29 + $0x48] sm:$0xff]  ;;  %v3239_v14 = vrot.slane %v3237_v55, 4  ;;  %v2485_v55 = vsel %vm5894_vm7, %v5226_v20, %v2484_v50 }
 0x1a7   : > { %5468 = vmatmul.msk.bf16.gmra.mxu0 %vm695_vm4, %v3935_v33  ;;  %v3252_v33 = vrot.slane %v3250_v63, 4  ;;  %v1038_v63 = vadd.f32 %v1037_v26, %v6019_v49  ;;  %v3823_v26 = vrot.slane %v6521_v38, 5 }
 0x1a8   : > { %v1387_v28 = vpop.f32.mrf.mxu2  ;;  %5242 = vmatmul.msk.bf16.gmra.mxu1 %vm695_vm4, %v2597_v37  ;;  %v6538_v24 = vadd.f32 %v2326_v40, %v1719_v27  ;;  %v3817_v37 = vsel %vm5894_vm7, %v5452_v8, %v3816_v43  ;;  %v2488_v27 = vsel %vm5894_vm7, %v2486_v16, %v2487_v17  ;;  %v3243_v47 = vor.u32 %v3242_v10, %v3239_v14  ;;  %v6562_v17 = vld [vmem:[%s5708_s29 + $0x64] sm:$0xf]  ;;  %v5437_v14 = vld [vmem:[%s5708_s29 + $0x54] sm:$0xe] }
 0x1a9   : > { %v1433_v2 = vadd.f32 %v1387_v28, %v1035_v29  ;;  %v3253_v43 = vor.u32 %v3252_v33, %v6541_v7  ;;  %v3908_v9 = vunpack.c.l.b16 %v3817_v37  ;;  %v3909_v29 = vunpack.c.l.b16 %v3820_v53 }
 0x1aa   : > { %v2571_v28 = vunpack.c.l.b16 %v2485_v55  ;;  %v2572_v8 = vunpack.c.l.b16 %v2488_v27  ;;  %v3261_v10 = vshrl.u32 %v5385_v3, 16  ;;  %v3264_v33 = vshll.u32 %v5385_v3, 16  ;;  %v5596_v27 = vld [vmem:[%s5708_s29 + $0x5c] sm:$0x1] }
 0x1ab   : > { %v3936_v49 = vpack.c.b16 %v3909_v29, %v3908_v9  ;;  %v5453_v9 = vrot.slane %v5437_v14, 9  ;;  %v3825_v29 = vrot.slane %v3823_v26, 4  ;;  %v6585_v14 = vld [vmem:[%s5708_s29 + $0x68] sm:$0x1] }
 0x1ac   : > { %v2328_v19 = vpop.f32.mrf.mxu0  ;;  %v2598_v16 = vpack.c.b16 %v2572_v8, %v2571_v28  ;;  %v3263_v8 = vrot.slane %v3261_v10, 4 }
 0x1ad   : > { %v1674_v40 = vpop.f32.mrf.mxu3  ;;  %5355 = vmatmul.msk.bf16.gmra.mxu2 %vm695_vm4, %v5520_v21  ;;  %v1039_v11 = vpop.f32.mrf.mxu1  ;;  %v3254_v21 = vrot.slane %v3253_v43, 4 }
 0x1ae   : > { %v1720_v61 = vadd.f32 %v1674_v40, %v1433_v2  ;;  %v3244_v2 = vrot.slane %v3243_v47, 4  ;;  %v5595_v40 = vld [vmem:[%s5708_s29 + $0x58] sm:$0xf] }
 0x1af   : > { %v2491_v55 = vrot.slane %v5595_v40, 5  ;;  %v3259_v43 = vsel %vm5720_vm3, %v3254_v21, %v3258_v35  ;;  %v5521_v21 = vld [vmem:[%s5708_s29 + $0x54] sm:$0xff]  ;;  %v5227_v35 = vrot.slane %v5211_v41, 9 }
 0x1b0   : > { %v1390_v25 = vpop.f32.mrf.mxu2  ;;  %v6558_v5 = vadd.f32 %v2328_v19, %v1720_v61  ;;  %v3270_v19 = vshll.u32 %v6562_v17, 16  ;;  %v2494_v61 = vrot.slane %v5596_v27, 5  ;;  %v3249_v38 = vsel %vm5720_vm3, %v3244_v2, %v6541_v7 }
 0x1b1   : > { %v1434_v50 = vadd.f32 %v1390_v25, %v1038_v63  ;;  %v1040_v63 = vadd.f32 %v1039_v11, %v6038_v0  ;;  %v3826_v25 = vrot.slane %v6544_v56, 5  ;;  %v3512_v11 = vunpack.c.l.b16 %v3249_v38 }
 0x1b2   : > { %5420 = vmatmul.msk.bf16.gmra.mxu3 %vm695_vm4, %v3538_v22  ;;  %v3274_v22 = vshrl.u32 %v6562_v17, 16  ;;  %v3272_v3 = vrot.slane %v3270_v19, 5  ;;  %v3824_v56 = vsel %vm5894_vm7, %v5453_v9, %v3823_v26  ;;  %v2492_v19 = vsel %vm5894_vm7, %v5227_v35, %v2491_v55  ;;  %v6603_v35 = vld [vmem:[%s5708_s29 + $0x70] sm:$0xf] }
 0x1b3   : > { %v3910_v41 = vunpack.c.l.b16 %v3824_v56  ;;  %v5438_v56 = vld [vmem:[%s5708_s29 + $0x60] sm:$0xe] }
 0x1b4   : > { %v2331_v20 = vpop.f32.mrf.mxu0  ;;  %v3276_v0 = vrot.slane %v3274_v22, 4 }
 0x1b5   : > { %v1677_v37 = vpop.f32.mrf.mxu3  ;;  %v1042_v53 = vpop.f32.mrf.mxu1 }
 0x1b6   : > { %v1721_v47 = vadd.f32 %v1677_v37, %v1434_v50  ;;  %v3266_v50 = vrot.slane %v3264_v33, 5  ;;  %v2493_v37 = vrot.slane %v2491_v55, 4  ;;  %v3277_v27 = vor.u32 %v3276_v0, %v3272_v3 }
 0x1b7   : > { %5469 = vmatmul.msk.bf16.gmra.mxu0 %vm695_vm4, %v3936_v49  ;;  %v3513_v49 = vunpack.c.l.b16 %v3259_v43  ;;  %v1043_v43 = vadd.f32 %v1042_v53, %v6059_v39  ;;  %v3830_v0 = vrot.slane %v6562_v17, 5 }
 0x1b8   : > { %v1392_v28 = vpop.f32.mrf.mxu2  ;;  %5243 = vmatmul.msk.bf16.gmra.mxu1 %vm695_vm4, %v2598_v16  ;;  %v6581_v7 = vadd.f32 %v2331_v20, %v1721_v47  ;;  %v3827_v16 = vsel %vm5894_vm7, %v3825_v29, %v3826_v25  ;;  %v3267_v10 = vor.u32 %v3266_v50, %v3263_v8  ;;  %v2495_v22 = vsel %vm5894_vm7, %v2493_v37, %v2494_v61 }
 0x1b9   : > { %v1435_v2 = vadd.f32 %v1392_v28, %v1040_v63  ;;  %v3280_v47 = vshll.u32 %v6585_v14, 16  ;;  %v3539_v26 = vpack.c.b16 %v3513_v49, %v3512_v11  ;;  %v3911_v63 = vunpack.c.l.b16 %v3827_v16  ;;  %v5597_v16 = vld [vmem:[%s5708_s29 + $0x64] sm:$0xf] }
 0x1ba   : > { %v2573_v29 = vunpack.c.l.b16 %v2492_v19  ;;  %v2574_v25 = vunpack.c.l.b16 %v2495_v22  ;;  %v3268_v28 = vrot.slane %v3267_v10, 4  ;;  %v3278_v8 = vrot.slane %v3277_v27, 4  ;;  %v5212_v22 = vld [vmem:[%s5708_s29 + $0x60] sm:$0xe] }
 0x1bb   : > { %v3282_v50 = vrot.slane %v3280_v47, 5  ;;  %v2498_v10 = vrot.slane %v5597_v16, 5  ;;  %v3294_v47 = vshll.u32 %v6603_v35, 16 }
 0x1bc   : > { %v2333_v40 = vpop.f32.mrf.mxu0  ;;  %v2599_v53 = vpack.c.b16 %v2574_v25, %v2573_v29  ;;  %v3273_v37 = vsel %vm5720_vm3, %v3268_v28, %v3272_v3  ;;  %v5598_v3 = vld [vmem:[%s5708_s29 + $0x68] sm:$0x1]  ;;  %v3833_v29 = vrot.slane %v6585_v14, 5 }
 0x1bd   : > { %v1679_v33 = vpop.f32.mrf.mxu3  ;;  %5356 = vmatmul.msk.bf16.gmra.mxu2 %vm695_vm4, %v5521_v21  ;;  %v1044_v20 = vpop.f32.mrf.mxu1  ;;  %v3937_v21 = vpack.c.b16 %v3911_v63, %v3910_v41  ;;  %v5454_v63 = vrot.slane %v5438_v56, 9 }
 0x1be   : > { %v1722_v38 = vadd.f32 %v1679_v33, %v1435_v2  ;;  %v5388_v2 = vld [vmem:[%s5708_s29 + $0x6c] sm:$0xf]  ;;  %v1045_v17 = vadd.f32 %v1044_v20, %v6078_v6  ;;  %v6623_v20 = vrot.slane %v3294_v47, 5 }
 0x1bf   : > { %v3285_v33 = vshrl.u32 %v5388_v2, 16  ;;  %v3288_v27 = vshll.u32 %v5388_v2, 16  ;;  %v2500_v2 = vrot.slane %v2498_v10, 4 }
 0x1c0   : > { %v1395_v9 = vpop.f32.mrf.mxu2  ;;  %v6598_v55 = vadd.f32 %v2333_v40, %v1722_v38  ;;  %v3283_v40 = vsel %vm5720_vm3, %v3278_v8, %v3282_v50  ;;  %v3298_v38 = vshrl.u32 %v6603_v35, 16  ;;  %v5228_v50 = vrot.slane %v5212_v22, 9 }
 0x1c1   : > { %v1436_v61 = vadd.f32 %v1395_v9, %v1043_v43  ;;  %v3514_v43 = vunpack.c.l.b16 %v3273_v37  ;;  %v3832_v9 = vrot.slane %v3830_v0, 4  ;;  %v3515_v8 = vunpack.c.l.b16 %v3283_v40  ;;  %v6626_v37 = vld [vmem:[%s5708_s29 + $0x74] sm:$0x1] }
 0x1c2   : > { %5421 = vmatmul.msk.bf16.gmra.mxu3 %vm695_vm4, %v3539_v26  ;;  %v2501_v26 = vrot.slane %v5598_v3, 5  ;;  %v3290_v6 = vrot.slane %v3288_v27, 5  ;;  %v3304_v47 = vshll.u32 %v6626_v37, 16 }
 0x1c3   : > { %v3834_v14 = vsel %vm5894_vm7, %v3832_v9, %v3833_v29  ;;  %v3540_v40 = vpack.c.b16 %v3515_v8, %v3514_v43  ;;  %v5391_v9 = vld [vmem:[%s5708_s29 + $0x78] sm:$0xf] }
 0x1c4   : > { %v2336_v39 = vpop.f32.mrf.mxu0  ;;  %v3306_v8 = vrot.slane %v3304_v47, 5 }
 0x1c5   : > { %v1682_v11 = vpop.f32.mrf.mxu3  ;;  %v1047_v49 = vpop.f32.mrf.mxu1 }
 0x1c6   : > { %v1723_v19 = vadd.f32 %v1682_v11, %v1436_v61  ;;  %v5522_v61 = vld [vmem:[%s5708_s29 + $0x60] sm:$0xff]  ;;  %v3287_v11 = vrot.slane %v3285_v33, 4  ;;  %v2499_v33 = vsel %vm5894_vm7, %v5228_v50, %v2498_v10 }
 0x1c7   : > { %5470 = vmatmul.msk.bf16.gmra.mxu0 %vm695_vm4, %v3937_v21  ;;  %v3300_v21 = vrot.slane %v3298_v38, 4  ;;  %v1048_v38 = vadd.f32 %v1047_v49, %v6097_v45  ;;  %v3837_v45 = vrot.slane %v6603_v35, 5  ;;  %v3309_v49 = vshrl.u32 %v5391_v9, 16 }
 0x1c8   : > { %v1397_v41 = vpop.f32.mrf.mxu2  ;;  %5244 = vmatmul.msk.bf16.gmra.mxu1 %vm695_vm4, %v2599_v53  ;;  %v6620_v25 = vadd.f32 %v2336_v39, %v1723_v19  ;;  %v3831_v53 = vsel %vm5894_vm7, %v5454_v63, %v3830_v0  ;;  %v2502_v19 = vsel %vm5894_vm7, %v2500_v2, %v2501_v26  ;;  %v3291_v27 = vor.u32 %v3290_v6, %v3287_v11  ;;  %v5439_v2 = vld [vmem:[%s5708_s29 + $0x6c] sm:$0xe] }
 0x1c9   : > { %v1437_v28 = vadd.f32 %v1397_v41, %v1045_v17  ;;  %v3301_v0 = vor.u32 %v3300_v21, %v6623_v20  ;;  %v3912_v3 = vunpack.c.l.b16 %v3831_v53  ;;  %v3913_v17 = vunpack.c.l.b16 %v3834_v14 }
 0x1ca   : > { %v2575_v41 = vunpack.c.l.b16 %v2499_v33  ;;  %v2576_v63 = vunpack.c.l.b16 %v2502_v19  ;;  %v3292_v26 = vrot.slane %v3291_v27, 4  ;;  %v3312_v21 = vshll.u32 %v5391_v9, 16  ;;  %v5599_v33 = vld [vmem:[%s5708_s29 + $0x70] sm:$0xf] }
 0x1cb   : > { %v3938_v50 = vpack.c.b16 %v3913_v17, %v3912_v3  ;;  %v5455_v27 = vrot.slane %v5439_v2, 9  ;;  %v3840_v3 = vrot.slane %v6626_v37, 5  ;;  %v3311_v17 = vrot.slane %v3309_v49, 4  ;;  %v6669_v37 = vld [vmem:[%s5708_s29 + $0x80] sm:$0x1] }
 0x1cc   : > { %v2338_v16 = vpop.f32.mrf.mxu0  ;;  %v2600_v6 = vpack.c.b16 %v2576_v63, %v2575_v41 }
 0x1cd   : > { %v1684_v39 = vpop.f32.mrf.mxu3  ;;  %5357 = vmatmul.msk.bf16.gmra.mxu2 %vm695_vm4, %v5522_v61  ;;  %v1049_v56 = vpop.f32.mrf.mxu1  ;;  %v6644_v61 = vld [vmem:[%s5708_s29 + $0x7c] sm:$0xf] }
 0x1ce   : > { %v1724_v22 = vadd.f32 %v1684_v39, %v1437_v28  ;;  %v3302_v28 = vrot.slane %v3301_v0, 4  ;;  %v3322_v53 = vshrl.u32 %v6644_v61, 16  ;;  %v5213_v0 = vld [vmem:[%s5708_s29 + $0x6c] sm:$0xe]  ;;  %v1050_v47 = vadd.f32 %v1049_v56, %v6120_v12  ;;  %v5600_v56 = vld [vmem:[%s5708_s29 + $0x74] sm:$0x1] }
 0x1d0   : > { %v1400_v43 = vpop.f32.mrf.mxu2  ;;  %v6641_v29 = vadd.f32 %v2338_v16, %v1724_v22  ;;  %v3318_v16 = vshll.u32 %v6644_v61, 16  ;;  %v3297_v22 = vsel %vm5720_vm3, %v3292_v26, %v6623_v20  ;;  %v3307_v35 = vsel %vm5720_vm3, %v3302_v28, %v3306_v8  ;;  %v5523_v26 = vld [vmem:[%s5708_s29 + $0x6c] sm:$0xff] }
 0x1d1   : > { %v1438_v10 = vadd.f32 %v1400_v43, %v1048_v38  ;;  %v3839_v38 = vrot.slane %v3837_v45, 4  ;;  %v3314_v20 = vrot.slane %v3312_v21, 5  ;;  %v3324_v63 = vrot.slane %v3322_v53, 4 }
 0x1d2   : > { %5422 = vmatmul.msk.bf16.gmra.mxu3 %vm695_vm4, %v3540_v40  ;;  %v2505_v40 = vrot.slane %v5599_v33, 5  ;;  %v6662_v41 = vrot.slane %v3318_v16, 5  ;;  %v5229_v28 = vrot.slane %v5213_v0, 9  ;;  %v2508_v8 = vrot.slane %v5600_v56, 5 }
 0x1d3   : > { %v3517_v2 = vunpack.c.l.b16 %v3307_v35  ;;  %v3841_v21 = vsel %vm5894_vm7, %v3839_v38, %v3840_v3  ;;  %v5394_v38 = vld [vmem:[%s5708_s29 + $0x84] sm:$0xf] }
 0x1d4   : > { %v2341_v11 = vpop.f32.mrf.mxu0  ;;  %v2507_v12 = vrot.slane %v2505_v40, 4 }
 0x1d5   : > { %v1687_v14 = vpop.f32.mrf.mxu3  ;;  %v1052_v39 = vpop.f32.mrf.mxu1 }
 0x1d6   : > { %v1725_v19 = vadd.f32 %v1687_v14, %v1438_v10  ;;  %v2506_v14 = vsel %vm5894_vm7, %v5229_v28, %v2505_v40  ;;  %v2509_v33 = vsel %vm5894_vm7, %v2507_v12, %v2508_v8  ;;  %v3336_v8 = vshll.u32 %v5394_v38, 16 }
 0x1d7   : > { %5471 = vmatmul.msk.bf16.gmra.mxu0 %vm695_vm4, %v3938_v50  ;;  %v3516_v50 = vunpack.c.l.b16 %v3297_v22  ;;  %v3328_v22 = vshll.u32 %v6669_v37, 16 }
 0x1d8   : > { %v1402_v43 = vpop.f32.mrf.mxu2  ;;  %5245 = vmatmul.msk.bf16.gmra.mxu1 %vm695_vm4, %v2600_v6  ;;  %v6664_v9 = vadd.f32 %v2341_v11, %v1725_v19  ;;  %v3838_v6 = vsel %vm5894_vm7, %v5455_v27, %v3837_v45  ;;  %v3315_v11 = vor.u32 %v3314_v20, %v3311_v17  ;;  %v3325_v19 = vor.u32 %v3324_v63, %v6662_v41  ;;  %v6685_v20 = vld [vmem:[%s5708_s29 + $0x88] sm:$0xf] }
 0x1d9   : > { %v1439_v10 = vadd.f32 %v1402_v43, %v1050_v47  ;;  %v3541_v35 = vpack.c.b16 %v3517_v2, %v3516_v50  ;;  %v1053_v27 = vadd.f32 %v1052_v39, %v6139_v59  ;;  %v3914_v0 = vunpack.c.l.b16 %v3838_v6 }
 0x1da   : > { %v3915_v47 = vunpack.c.l.b16 %v3841_v21  ;;  %v2577_v17 = vunpack.c.l.b16 %v2506_v14  ;;  %v2578_v43 = vunpack.c.l.b16 %v2509_v33  ;;  %v3316_v63 = vrot.slane %v3315_v11, 4  ;;  %v5601_v21 = vld [vmem:[%s5708_s29 + $0x7c] sm:$0xf] }
 0x1db   : > { %v3326_v28 = vrot.slane %v3325_v19, 4  ;;  %v3330_v12 = vrot.slane %v3328_v22, 5  ;;  %v3844_v59 = vrot.slane %v6644_v61, 5  ;;  %v3333_v39 = vshrl.u32 %v5394_v38, 16  ;;  %v5214_v22 = vld [vmem:[%s5708_s29 + $0x78] sm:$0xe] }
 0x1dc   : > { %v2343_v49 = vpop.f32.mrf.mxu0  ;;  %v3939_v56 = vpack.c.b16 %v3915_v47, %v3914_v0  ;;  %v3342_v50 = vshll.u32 %v6685_v20, 16  ;;  %v3346_v2 = vshrl.u32 %v6685_v20, 16  ;;  %v3321_v33 = vsel %vm5720_vm3, %v3316_v63, %v6662_v41 }
 0x1dd   : > { %v1689_v16 = vpop.f32.mrf.mxu3  ;;  %5358 = vmatmul.msk.bf16.gmra.mxu2 %vm695_vm4, %v5523_v26  ;;  %v1054_v53 = vpop.f32.mrf.mxu1  ;;  %v3331_v61 = vsel %vm5720_vm3, %v3326_v28, %v3330_v12  ;;  %v3335_v0 = vrot.slane %v3333_v39, 4  ;;  %v3338_v38 = vrot.slane %v3336_v8, 5  ;;  %v5602_v28 = vld [vmem:[%s5708_s29 + $0x80] sm:$0x1]  ;;  %v3518_v39 = vunpack.c.l.b16 %v3321_v33 }
 0x1de   : > { %v1726_v45 = vadd.f32 %v1689_v16, %v1439_v10  ;;  %v5440_v10 = vld [vmem:[%s5708_s29 + $0x78] sm:$0xe]  ;;  %v2512_v16 = vrot.slane %v5601_v21, 5  ;;  %v1055_v47 = vadd.f32 %v1054_v53, %v6156_v32  ;;  %v3348_v41 = vrot.slane %v3346_v2, 4  ;;  %v6710_v21 = vld [vmem:[%s5708_s29 + $0x8c] sm:$0x1] }
 0x1df   : > { %v5456_v19 = vrot.slane %v5440_v10, 9  ;;  %v3519_v32 = vunpack.c.l.b16 %v3331_v61  ;;  %v3339_v8 = vor.u32 %v3338_v38, %v3335_v0 }
 0x1e0   : > { %v1405_v3 = vpop.f32.mrf.mxu2  ;;  %v6687_v40 = vadd.f32 %v2343_v49, %v1726_v45  ;;  %v2601_v49 = vpack.c.b16 %v2578_v43, %v2577_v17  ;;  %v5230_v43 = vrot.slane %v5214_v22, 9  ;;  %v2514_v63 = vrot.slane %v2512_v16, 4 }
 0x1e1   : > { %v1440_v26 = vadd.f32 %v1405_v3, %v1053_v27  ;;  %v3847_v27 = vrot.slane %v6669_v37, 5  ;;  %v3344_v3 = vrot.slane %v3342_v50, 5  ;;  %v5524_v37 = vld [vmem:[%s5708_s29 + $0x78] sm:$0xff]  ;;  %v3845_v53 = vsel %vm5894_vm7, %v5456_v19, %v3844_v59 }
 0x1e2   : > { %5423 = vmatmul.msk.bf16.gmra.mxu3 %vm695_vm4, %v3541_v35  ;;  %v3846_v35 = vrot.slane %v3844_v59, 4  ;;  %v2513_v2 = vsel %vm5894_vm7, %v5230_v43, %v2512_v16  ;;  %v3542_v59 = vpack.c.b16 %v3519_v32, %v3518_v39  ;;  %v3916_v22 = vunpack.c.l.b16 %v3845_v53  ;;  %v5397_v43 = vld [vmem:[%s5708_s29 + $0x90] sm:$0xf]  ;;  %v5441_v32 = vld [vmem:[%s5708_s29 + $0x84] sm:$0xe] }
 0x1e3   : > { %v3340_v0 = vrot.slane %v3339_v8, 4  ;;  %v3357_v53 = vshrl.u32 %v5397_v43, 16  ;;  %v5603_v8 = vld [vmem:[%s5708_s29 + $0x88] sm:$0xf] }
 0x1e4   : > { %v2346_v6 = vpop.f32.mrf.mxu0 }
 0x1e5   : > { %v1692_v11 = vpop.f32.mrf.mxu3  ;;  %v2669_v14 = vpop.f32.mrf.mxu1 }
 0x1e6   : > { %v1727_v45 = vadd.f32 %v1692_v11, %v1440_v26  ;;  %v2515_v26 = vrot.slane %v5602_v28, 5  ;;  %v3352_v11 = vshll.u32 %v6710_v21, 16  ;;  %v2749_v16 = vadd.f32 %v2669_v14, %v6173_v46 }
 0x1e7   : > { %5472 = vmatmul.msk.bf16.gmra.mxu0 %vm695_vm4, %v3939_v56  ;;  %v3848_v56 = vsel %vm5894_vm7, %v3846_v35, %v3847_v27  ;;  %v2579_v35 = vunpack.c.l.b16 %v2513_v2  ;;  %v3345_v46 = vsel %vm5720_vm3, %v3340_v0, %v3344_v3  ;;  %v3360_v2 = vshll.u32 %v5397_v43, 16 }
 0x1e8   : > { %v1407_v17 = vpop.f32.mrf.mxu2  ;;  %5246 = vmatmul.msk.bf16.gmra.mxu1 %vm695_vm4, %v2601_v49  ;;  %v6706_v12 = vadd.f32 %v2346_v6, %v1727_v45  ;;  %v2516_v6 = vsel %vm5894_vm7, %v2514_v63, %v2515_v26  ;;  %v3349_v49 = vor.u32 %v3348_v41, %v3344_v3  ;;  %v3917_v45 = vunpack.c.l.b16 %v3848_v56 }
 0x1e9   : > { %v1441_v10 = vadd.f32 %v1407_v17, %v1055_v47  ;;  %v2580_v27 = vunpack.c.l.b16 %v2516_v6  ;;  %v3354_v41 = vrot.slane %v3352_v11, 5  ;;  %v3851_v26 = vrot.slane %v6685_v20, 5  ;;  %v6740_v20 = vld [vmem:[%s7624_s2] ss:$0 sm:$0xff] }
 0x1ea   : > { %v3350_v38 = vrot.slane %v3349_v49, 4  ;;  %v3940_v28 = vpack.c.b16 %v3917_v45, %v3916_v22  ;;  %v5215_v49 = vld [vmem:[%s5708_s29 + $0x84] sm:$0xe] }
 0x1eb   : > { %v2602_v39 = vpack.c.b16 %v2580_v27, %v2579_v35  ;;  %v3853_v22 = vrot.slane %v3851_v26, 4 }
 0x1ec   : > { %v2348_v50 = vpop.f32.mrf.mxu0  ;;  %v3355_v14 = vsel %vm5720_vm3, %v3350_v38, %v3354_v41  ;;  %v5525_v38 = vld [vmem:[%s5708_s29 + $0x84] sm:$0xff]  ;;  %v5231_v41 = vrot.slane %v5215_v49, 9 }
 0x1ed   : > { %v1694_v33 = vpop.f32.mrf.mxu3  ;;  %5359 = vmatmul.msk.bf16.gmra.mxu2 %vm695_vm4, %v5524_v37  ;;  %v2671_v19 = vpop.f32.mrf.mxu1 }
 0x1ee   : > { %v1728_v61 = vadd.f32 %v1694_v33, %v1441_v10  ;;  %v6729_v10 = vld [vmem:[%s5708_s29 + $0x94] sm:$0xf]  ;;  %v3520_v33 = vunpack.c.l.b16 %v3345_v46  ;;  %v2750_v35 = vadd.f32 %v2671_v19, %v6186_v42  ;;  %v3362_v46 = vrot.slane %v3360_v2, 5  ;;  %v6757_v19 = vld [vmem:[%s5708_s29 + $0x98] sm:$0x1] }
 0x1ef   : > { %v3366_v11 = vshll.u32 %v6729_v10, 16  ;;  %v3370_v3 = vshrl.u32 %v6729_v10, 16 }
 0x1f0   : > { %v2956_v47 = vpop.f32.mrf.mxu2  ;;  %v6723_v17 = vadd.f32 %v2348_v50, %v1728_v61  ;;  %v2519_v50 = vrot.slane %v5603_v8, 5  ;;  %v3521_v61 = vunpack.c.l.b16 %v3355_v14 }
 0x1f1   : > { %v3036_v63 = vadd.f32 %v2956_v47, %v2749_v16  ;;  %v3854_v16 = vrot.slane %v6710_v21, 5  ;;  %v3359_v47 = vrot.slane %v3357_v53, 4  ;;  %v3372_v42 = vrot.slane %v3370_v3, 4 }
 0x1f2   : > { %5424 = vmatmul.msk.bf16.gmra.mxu3 %vm695_vm4, %v3542_v59  ;;  %v5457_v59 = vrot.slane %v5441_v32, 9  ;;  %v2521_v43 = vrot.slane %v2519_v50, 4  ;;  %v6754_v32 = vrot.slane %v3366_v11, 5  ;;  %v2520_v8 = vsel %vm5894_vm7, %v5231_v41, %v2519_v50  ;;  %v5400_v50 = vld [vmem:[%s5708_s29 + $0x9c] sm:$0xf] }
 0x1f3   : > { %v3543_v49 = vpack.c.b16 %v3521_v61, %v3520_v33  ;;  %v3376_v3 = vshll.u32 %v6757_v19, 16 }
 0x1f4   : > { %v4008_v37 = vpop.f32.mrf.mxu0  ;;  %v3852_v21 = vsel %vm5894_vm7, %v5457_v59, %v3851_v26  ;;  %v3373_v11 = vor.u32 %v3372_v42, %v6754_v32 }
 0x1f5   : > { %v3610_v56 = vpop.f32.mrf.mxu3  ;;  %v2674_v0 = vpop.f32.mrf.mxu1  ;;  %v3918_v59 = vunpack.c.l.b16 %v3852_v21  ;;  %v3384_v21 = vshll.u32 %v5400_v50, 16 }
 0x1f6   : > { %v3690_v6 = vadd.f32 %v3610_v56, %v3036_v63  ;;  %v5604_v63 = vld [vmem:[%s5708_s29 + $0x8c] sm:$0x1] }
 0x1f7   : > { %5473 = vmatmul.msk.bf16.gmra.mxu0 %vm695_vm4, %v3940_v28  ;;  %v2522_v28 = vrot.slane %v5604_v63, 5  ;;  %v6779_v63 = vld [vmem:[%s5708_s29 + $0xa0] sm:$0xf] }
 0x1f8   : > { %v4088_v45 = vadd.f32 %v4008_v37, %v3690_v6  ;;  %v2958_v27 = vpop.f32.mrf.mxu2  ;;  %5247 = vmatmul.msk.bf16.gmra.mxu1 %vm695_vm4, %v2602_v39  ;;  %v3855_v39 = vsel %vm5894_vm7, %v3853_v22, %v3854_v16  ;;  %v3363_v6 = vor.u32 %v3362_v46, %v3359_v47  ;;  %v2581_v16 = vunpack.c.l.b16 %v2520_v8 }
 0x1f9   : > { %v3037_v37 = vadd.f32 %v2958_v27, %v2750_v35  ;;  %v2523_v2 = vsel %vm5894_vm7, %v2521_v43, %v2522_v28  ;;  %v3919_v22 = vunpack.c.l.b16 %v3855_v39  ;;  %v2751_v35 = vadd.f32 %v2674_v0, %v6199_v15 }
 0x1fa   : > { %v6752_v14 = vadd.f32 %v6740_v20, %v4088_v45  ;;  %v3364_v41 = vrot.slane %v3363_v6, 4  ;;  %v3374_v43 = vrot.slane %v3373_v11, 4  ;;  %v3378_v28 = vrot.slane %v3376_v3, 5  ;;  %v5216_v11 = vld [vmem:[%s5708_s29 + $0x90] sm:$0xe] }
 0x1fb   : > { %v3941_v46 = vpack.c.b16 %v3919_v22, %v3918_v59  ;;  %v3858_v15 = vrot.slane %v6729_v10, 5  ;;  %v3381_v0 = vshrl.u32 %v5400_v50, 16  ;;  %v3390_v39 = vshll.u32 %v6779_v63, 16  ;;  %v5605_v10 = vld [vmem:[%s5708_s29 + $0x94] sm:$0xf] }
 0x1fc   : > { %v4010_v56 = vpop.f32.mrf.mxu0  ;;  %4412 = vrot.lane.b32.xlu1 %v6752_v14, %s5640_s17  ;;  %4316 = vrot.lane.b32.xlu2 %v6752_v14, %s5641_s18  ;;  %v2526_v8 = vrot.slane %v5605_v10, 5  ;;  %v3861_v22 = vrot.slane %v6757_v19, 5  ;;  %v5526_v50 = vld [vmem:[%s5708_s29 + $0x90] sm:$0xff] }
 0x1fd   : > { %v3612_v53 = vpop.f32.mrf.mxu3  ;;  %4220 = vrot.lane.b32.xlu0 %v6752_v14, %s5642_s19  ;;  %5360 = vmatmul.msk.bf16.gmra.mxu2 %vm695_vm4, %v5525_v38  ;;  %v2582_v38 = vunpack.c.l.b16 %v2523_v2  ;;  %v2676_v61 = vpop.f32.mrf.mxu1  ;;  %v3394_v2 = vshrl.u32 %v6779_v63, 16  ;;  %v3860_v59 = vrot.slane %v3858_v15, 4 }
 0x1fe   : > { %v3691_v26 = vadd.f32 %v3612_v53, %v3037_v37 }
 0x1ff   : > { %v2603_v42 = vpack.c.b16 %v2582_v38, %v2581_v16  ;;  %v6806_v38 = vrot.slane %v3390_v39, 5 }
 0x200   : > { %v4089_v45 = vadd.f32 %v4010_v56, %v3691_v26  ;;  %v2961_v27 = vpop.f32.mrf.mxu2  ;;  %v5442_v56 = vld [vmem:[%s5708_s29 + $0x90] sm:$0xe]  ;;  %v3369_v26 = vsel %vm5720_vm3, %v3364_v41, %v6754_v32  ;;  %v3386_v32 = vrot.slane %v3384_v21, 5  ;;  %v5232_v41 = vrot.slane %v5216_v11, 9 }
 0x201   : > { %v3038_v33 = vadd.f32 %v2961_v27, %v2751_v35  ;;  %v5458_v3 = vrot.slane %v5442_v56, 9  ;;  %v2752_v27 = vadd.f32 %v2676_v61, %v6212_v13 }
 0x202   : > { %v6782_v47 = vadd.f32 %v6740_v20, %v4089_v45  ;;  %5425 = vmatmul.msk.bf16.gmra.mxu3 %vm695_vm4, %v3543_v49  ;;  %v3379_v49 = vsel %vm5720_vm3, %v3374_v43, %v3378_v28  ;;  %v3383_v45 = vrot.slane %v3381_v0, 4  ;;  %v5606_v43 = vld [vmem:[%s5708_s29 + $0x98] sm:$0x1]  ;;  %v3522_v0 = vunpack.c.l.b16 %v3369_v26 }
 0x203   : > { %v2529_v28 = vrot.slane %v5606_v43, 5  ;;  %v3859_v61 = vsel %vm5894_vm7, %v5458_v3, %v3858_v15 }
 0x204   : > { %v4013_v37 = vpop.f32.mrf.mxu0  ;;  %4510 = vrot.lane.b32.xlu1 %v6782_v47, %s5643_s20  ;;  %4414 = vrot.lane.b32.xlu2 %v6782_v47, %s5640_s17  ;;  %v3387_v21 = vor.u32 %v3386_v32, %v3383_v45  ;;  %v3920_v3 = vunpack.c.l.b16 %v3859_v61 }
 0x205   : > { %v3615_v53 = vpop.f32.mrf.mxu3  ;;  %4508 = vrot.lane.b32.xlu0 %v6752_v14, %s5643_s20  ;;  %v2679_v13 = vpop.f32.mrf.mxu1 }
 0x206   : > { %v3692_v6 = vadd.f32 %v3615_v53, %v3038_v33  ;;  %v2528_v33 = vrot.slane %v2526_v8, 4  ;;  %v6814_v53 = vld [vmem:[%s5708_s29 + $0xa4] sm:$0x1]  ;;  %v2753_v45 = vadd.f32 %v2679_v13, %v6225_v57  ;;  %v5403_v57 = vld [vmem:[%s5708_s29 + $0xa8] sm:$0xf] }
 0x207   : > { %5474 = vmatmul.msk.bf16.gmra.mxu0 %vm695_vm4, %v3941_v46  ;;  %v3396_v46 = vrot.slane %v3394_v2, 4  ;;  %v2527_v2 = vsel %vm5894_vm7, %v5232_v41, %v2526_v8  ;;  %v3400_v15 = vshll.u32 %v6814_v53, 16 }
 0x208   : > { %v4090_v35 = vadd.f32 %v4013_v37, %v3692_v6  ;;  %v2963_v16 = vpop.f32.mrf.mxu2  ;;  %5248 = vmatmul.msk.bf16.gmra.mxu1 %vm695_vm4, %v2603_v42  ;;  %v3523_v37 = vunpack.c.l.b16 %v3379_v49  ;;  %v3862_v42 = vsel %vm5894_vm7, %v3860_v59, %v3861_v22  ;;  %v2530_v6 = vsel %vm5894_vm7, %v2528_v33, %v2529_v28  ;;  %v5443_v28 = vld [vmem:[%s5708_s29 + $0x9c] sm:$0xe] }
 0x209   : > { %v3039_v19 = vadd.f32 %v2963_v16, %v2752_v27  ;;  %v3397_v26 = vor.u32 %v3396_v46, %v6806_v38  ;;  %v3921_v59 = vunpack.c.l.b16 %v3862_v42  ;;  %v2583_v27 = vunpack.c.l.b16 %v2527_v2  ;;  %v5607_v42 = vld [vmem:[%s5708_s29 + $0xa0] sm:$0xf]  ;;  %v5217_v2 = vld [vmem:[%s5708_s29 + $0x9c] sm:$0xe] }
 0x20a   : > { %v6811_v56 = vadd.f32 %v6740_v20, %v4090_v35  ;;  %v3544_v11 = vpack.c.b16 %v3523_v37, %v3522_v0  ;;  %v2584_v8 = vunpack.c.l.b16 %v2530_v6  ;;  %v3388_v16 = vrot.slane %v3387_v21, 4  ;;  %v6846_v0 = vld [vmem:[%s5708_s29 + $0xac] sm:$0xf] }
 0x20b   : > { %v3398_v32 = vrot.slane %v3397_v26, 4  ;;  %v3942_v43 = vpack.c.b16 %v3921_v59, %v3920_v3  ;;  %v3865_v46 = vrot.slane %v6779_v63, 5  ;;  %v2533_v21 = vrot.slane %v5607_v42, 5 }
 0x20c   : > { %4512 = vrot.lane.b32.xlu2 %v6811_v56, %s5643_s20  ;;  %4224 = vrot.lane.b32.xlu1 %v6811_v56, %s5642_s19  ;;  %v4015_v39 = vpop.f32.mrf.mxu0  ;;  %v3393_v61 = vsel %vm5720_vm3, %v3388_v16, %v6806_v38  ;;  %v3405_v6 = vshrl.u32 %v5403_v57, 16  ;;  %v3408_v26 = vshll.u32 %v5403_v57, 16  ;;  %v3418_v38 = vshrl.u32 %v6846_v0, 16  ;;  %v5608_v16 = vld [vmem:[%s5708_s29 + $0xa4] sm:$0x1] }
 0x20d   : > { %v3617_v10 = vpop.f32.mrf.mxu3  ;;  %4222 = vrot.lane.b32.xlu0 %v6782_v47, %s5642_s19  ;;  %5361 = vmatmul.msk.bf16.gmra.mxu2 %vm695_vm4, %v5526_v50  ;;  %v3402_v50 = vrot.slane %v3400_v15, 5  ;;  %v3867_v15 = vrot.slane %v3865_v46, 4  ;;  %v3524_v59 = vunpack.c.l.b16 %v3393_v61  ;;  %v6879_v61 = vld [vmem:[%s5708_s29 + $0xb0] sm:$0x1] }
 0x20e   : > { %v3693_v49 = vadd.f32 %v3617_v10, %v3039_v19  ;;  %v2604_v19 = vpack.c.b16 %v2584_v8, %v2583_v27  ;;  %v5459_v10 = vrot.slane %v5443_v28, 9  ;;  %v5233_v27 = vrot.slane %v5217_v2, 9 }
 0x20f   : > { %v3403_v63 = vsel %vm5720_vm3, %v3398_v32, %v3402_v50  ;;  %v2535_v8 = vrot.slane %v2533_v21, 4  ;;  %v2536_v32 = vrot.slane %v5608_v16, 5 }
 0x210   : > { %v4091_v22 = vadd.f32 %v4015_v39, %v3693_v49  ;;  %v2966_v35 = vpop.f32.mrf.mxu2  ;;  %v3868_v49 = vrot.slane %v6814_v53, 5  ;;  %v3407_v53 = vrot.slane %v3405_v6, 4  ;;  %v3866_v28 = vsel %vm5894_vm7, %v5459_v10, %v3865_v46 }
 0x211   : > { %v3040_v33 = vadd.f32 %v2966_v35, %v2753_v45  ;;  %v5527_v45 = vld [vmem:[%s5708_s29 + $0x9c] sm:$0xff]  ;;  %v3525_v35 = vunpack.c.l.b16 %v3403_v63  ;;  %v2534_v63 = vsel %vm5894_vm7, %v5233_v27, %v2533_v21 }
 0x212   : > { %v6835_v41 = vadd.f32 %v6740_v20, %v4091_v22  ;;  %5426 = vmatmul.msk.bf16.gmra.mxu3 %vm695_vm4, %v3544_v11  ;;  %v3414_v11 = vshll.u32 %v6846_v0, 16  ;;  %v2681_v22 = vpop.f32.mrf.mxu1  ;;  %v3869_v57 = vsel %vm5894_vm7, %v3867_v15, %v3868_v49  ;;  %v3424_v15 = vshll.u32 %v6879_v61, 16 }
 0x213   : > { %v3545_v46 = vpack.c.b16 %v3525_v35, %v3524_v59  ;;  %v3923_v10 = vunpack.c.l.b16 %v3869_v57  ;;  %v2585_v49 = vunpack.c.l.b16 %v2534_v63 }
 0x214   : > { %4320 = vrot.lane.b32.xlu1 %v6811_v56, %s5641_s18  ;;  %4322 = vrot.lane.b32.xlu2 %v6835_v41, %s5641_s18  ;;  %v4018_v13 = vpop.f32.mrf.mxu0  ;;  %v3426_v27 = vrot.slane %v3424_v15, 5 }
 0x215   : > { %4318 = vrot.lane.b32.xlu0 %v6782_v47, %s5641_s18  ;;  %v3620_v37 = vpop.f32.mrf.mxu3 }
 0x216   : > { %v3694_v39 = vadd.f32 %v3620_v37, %v3040_v33  ;;  %v3410_v33 = vrot.slane %v3408_v26, 5  ;;  %v3420_v37 = vrot.slane %v3418_v38, 4  ;;  %v5406_v38 = vld [vmem:[%s5708_s29 + $0xb4] sm:$0xf] }
 0x217   : > { %5475 = vmatmul.msk.bf16.gmra.mxu0 %vm695_vm4, %v3942_v43  ;;  %v3432_v16 = vshll.u32 %v5406_v38, 16 }
 0x218   : > { %v4092_v3 = vadd.f32 %v4018_v13, %v3694_v39  ;;  %5249 = vmatmul.msk.bf16.gmra.mxu1 %vm695_vm4, %v2604_v19  ;;  %v2968_v43 = vpop.f32.mrf.mxu2  ;;  %v6871_v19 = vrot.slane %v3414_v11, 5  ;;  %v2754_v13 = vadd.f32 %v2681_v22, %v6238_v54  ;;  %v2537_v54 = vsel %vm5894_vm7, %v2535_v8, %v2536_v32 }
 0x219   : > { %v3922_v39 = vunpack.c.l.b16 %v3866_v28  ;;  %v3411_v2 = vor.u32 %v3410_v33, %v3407_v53  ;;  %v2586_v11 = vunpack.c.l.b16 %v2537_v54  ;;  %v3429_v8 = vshrl.u32 %v5406_v38, 16  ;;  %v5444_v33 = vld [vmem:[%s5708_s29 + $0xa8] sm:$0xe] }
 0x21a   : > { %v6865_v50 = vadd.f32 %v6740_v20, %v4092_v3  ;;  %v3041_v42 = vadd.f32 %v2968_v43, %v2754_v13  ;;  %v3421_v26 = vor.u32 %v3420_v37, %v6871_v19  ;;  %v6892_v3 = vld [vmem:[%s5708_s29 + $0xb8] sm:$0xf]  ;;  %v2684_v32 = vpop.f32.mrf.mxu1  ;;  %v3872_v43 = vrot.slane %v6846_v0, 5  ;;  %v5609_v37 = vld [vmem:[%s5708_s29 + $0xac] sm:$0xf] }
 0x21b   : > { %v3943_v21 = vpack.c.b16 %v3923_v10, %v3922_v39  ;;  %v3412_v22 = vrot.slane %v3411_v2, 4  ;;  %v2605_v53 = vpack.c.b16 %v2586_v11, %v2585_v49  ;;  %v3438_v28 = vshll.u32 %v6892_v3, 16  ;;  %v5218_v54 = vld [vmem:[%s5708_s29 + $0xa8] sm:$0xe] }
 0x21c   : > { %4226 = vrot.lane.b32.xlu1 %v6835_v41, %s5642_s19  ;;  %4228 = vrot.lane.b32.xlu2 %v6865_v50, %s5642_s19  ;;  %v3422_v35 = vrot.slane %v3421_v26, 4  ;;  %v3442_v57 = vshrl.u32 %v6892_v3, 16  ;;  %v2540_v13 = vrot.slane %v5609_v37, 5  ;;  %v5460_v39 = vrot.slane %v5444_v33, 9 }
 0x21d   : > { %4416 = vrot.lane.b32.xlu0 %v6811_v56, %s5640_s17  ;;  %5362 = vmatmul.msk.bf16.gmra.mxu2 %vm695_vm4, %v5527_v45  ;;  %v3622_v6 = vpop.f32.mrf.mxu3  ;;  %v4020_v45 = vpop.f32.mrf.mxu0  ;;  %v3417_v63 = vsel %vm5720_vm3, %v3412_v22, %v6871_v19  ;;  %v3431_v10 = vrot.slane %v3429_v8, 4  ;;  %v3434_v2 = vrot.slane %v3432_v16, 5  ;;  %v3875_v26 = vrot.slane %v6879_v61, 5  ;;  %v5528_v19 = vld [vmem:[%s5708_s29 + $0xa8] sm:$0xff] }
 0x21e   : > { %v3695_v59 = vadd.f32 %v3622_v6, %v3041_v42  ;;  %v3427_v0 = vsel %vm5720_vm3, %v3422_v35, %v3426_v27  ;;  %v3874_v6 = vrot.slane %v3872_v43, 4  ;;  %v3440_v15 = vrot.slane %v3438_v28, 5 }
 0x21f   : > { %v3444_v49 = vrot.slane %v3442_v57, 4  ;;  %v5234_v11 = vrot.slane %v5218_v54, 9  ;;  %v2542_v38 = vrot.slane %v2540_v13, 4  ;;  %v3526_v35 = vunpack.c.l.b16 %v3417_v63 }
 0x220   : > { %v2971_v42 = vpop.f32.mrf.mxu2  ;;  %v3527_v27 = vunpack.c.l.b16 %v3427_v0  ;;  %v2755_v8 = vadd.f32 %v2684_v32, %v6250_v31  ;;  %v3873_v61 = vsel %vm5894_vm7, %v5460_v39, %v3872_v43  ;;  %v3876_v33 = vsel %vm5894_vm7, %v3874_v6, %v3875_v26 }
 0x221   : > { %v3445_v28 = vor.u32 %v3444_v49, %v3440_v15  ;;  %v2541_v31 = vsel %vm5894_vm7, %v5234_v11, %v2540_v13  ;;  %v3924_v54 = vunpack.c.l.b16 %v3873_v61  ;;  %v3925_v0 = vunpack.c.l.b16 %v3876_v33 }
 0x222   : > { %5427 = vmatmul.msk.bf16.gmra.mxu3 %vm695_vm4, %v3545_v46  ;;  %v4093_v46 = vadd.f32 %v4020_v45, %v3695_v59  ;;  %v5610_v59 = vld [vmem:[%s5708_s29 + $0xb0] sm:$0x1]  ;;  %v6918_v45 = vld [vmem:[%s5708_s29 + $0xbc] sm:$0x1]  ;;  %v3042_v37 = vadd.f32 %v2971_v42, %v2755_v8  ;;  %v2686_v43 = vpop.f32.mrf.mxu1 }
 0x223   : > { %v2543_v22 = vrot.slane %v5610_v59, 5  ;;  %v3448_v57 = vshll.u32 %v6918_v45, 16  ;;  %v3446_v6 = vrot.slane %v3445_v28, 4  ;;  %v2756_v42 = vadd.f32 %v2686_v43, %v6263_v44  ;;  %v6946_v59 = vld [vmem:[%s5708_s29 + $0xc4] sm:$0xf] }
 0x224   : > { %4418 = vrot.lane.b32.xlu1 %v6835_v41, %s5640_s17  ;;  %4420 = vrot.lane.b32.xlu2 %v6865_v50, %s5640_s17  ;;  %v3944_v11 = vpack.c.b16 %v3925_v0, %v3924_v54  ;;  %v3882_v0 = vrot.slane %v6918_v45, 5 }
 0x225   : > { %4514 = vrot.lane.b32.xlu0 %v6835_v41, %s5643_s20  ;;  %v3625_v16 = vpop.f32.mrf.mxu3  ;;  %v2544_v32 = vsel %vm5894_vm7, %v2542_v38, %v2543_v22  ;;  %v4023_v63 = vpop.f32.mrf.mxu0  ;;  %v3450_v26 = vrot.slane %v3448_v57, 5  ;;  %v5219_v57 = vld [vmem:[%s5708_s29 + $0xb4] sm:$0xe] }
 0x226   : > { %v3696_v13 = vadd.f32 %v3625_v16, %v3042_v37  ;;  %v5611_v16 = vld [vmem:[%s5708_s29 + $0xb8] sm:$0xf] }
 0x227   : > { %5476 = vmatmul.msk.bf16.gmra.mxu0 %vm695_vm4, %v3943_v21  ;;  %v6921_v21 = vadd.f32 %v6740_v20, %v4093_v46  ;;  %v3546_v46 = vpack.c.b16 %v3527_v27, %v3526_v35  ;;  %v3451_v35 = vsel %vm5720_vm3, %v3446_v6, %v3450_v26  ;;  %v3879_v27 = vrot.slane %v6892_v3, 5  ;;  %v5612_v26 = vld [vmem:[%s5708_s29 + $0xbc] sm:$0x1] }
 0x228   : > { %5250 = vmatmul.msk.bf16.gmra.mxu1 %vm695_vm4, %v2605_v53  ;;  %v3435_v53 = vor.u32 %v3434_v2, %v3431_v10  ;;  %v2587_v10 = vunpack.c.l.b16 %v2541_v31  ;;  %v2588_v2 = vunpack.c.l.b16 %v2544_v32  ;;  %v2973_v49 = vpop.f32.mrf.mxu2  ;;  %v4094_v33 = vadd.f32 %v4023_v63, %v3696_v13 }
 0x229   : > { %v3043_v28 = vadd.f32 %v2973_v49, %v2756_v42  ;;  %v3462_v31 = vshll.u32 %v6946_v59, 16  ;;  %v3466_v32 = vshrl.u32 %v6946_v59, 16  ;;  %v3529_v37 = vunpack.c.l.b16 %v3451_v35 }
 0x22a   : > { %v3436_v39 = vrot.slane %v3435_v53, 4  ;;  %v2606_v22 = vpack.c.b16 %v2588_v2, %v2587_v10  ;;  %v2547_v53 = vrot.slane %v5611_v16, 5  ;;  %v2689_v43 = vpop.f32.mrf.mxu1  ;;  %v3881_v54 = vrot.slane %v3879_v27, 4  ;;  %v5529_v10 = vld [vmem:[%s5708_s29 + $0xb4] sm:$0xff] }
 0x22b   : > { %v5235_v2 = vrot.slane %v5219_v57, 9  ;;  %v2550_v49 = vrot.slane %v5612_v26, 5  ;;  %v6968_v13 = vadd.f32 %v6740_v20, %v4094_v33  ;;  %v3886_v26 = vrot.slane %v6946_v59, 5 }
 0x22c   : > { %4516 = vrot.lane.b32.xlu1 %v6865_v50, %s5643_s20  ;;  %4230 = vrot.lane.b32.xlu2 %v6921_v21, %s5642_s19  ;;  %v3441_v38 = vsel %vm5720_vm3, %v3436_v39, %v3440_v15  ;;  %v5445_v15 = vld [vmem:[%s5708_s29 + $0xb4] sm:$0xe]  ;;  %v2549_v6 = vrot.slane %v2547_v53, 4 }
 0x22d   : > { %4324 = vrot.lane.b32.xlu0 %v6865_v50, %s5641_s18  ;;  %5363 = vmatmul.msk.bf16.gmra.mxu2 %vm695_vm4, %v5528_v19  ;;  %v5409_v19 = vld [vmem:[%s5708_s29 + $0xc0] sm:$0xf]  ;;  %v3627_v8 = vpop.f32.mrf.mxu3  ;;  %v3528_v3 = vunpack.c.l.b16 %v3441_v38  ;;  %v4025_v39 = vpop.f32.mrf.mxu0  ;;  %v3468_v38 = vrot.slane %v3466_v32, 4 }
 0x22e   : > { %v3453_v44 = vshrl.u32 %v5409_v19, 16  ;;  %v3456_v61 = vshll.u32 %v5409_v19, 16  ;;  %v3697_v42 = vadd.f32 %v3627_v8, %v3043_v28  ;;  %v3883_v8 = vsel %vm5894_vm7, %v3881_v54, %v3882_v0 }
 0x22f   : > { %v3547_v45 = vpack.c.b16 %v3529_v37, %v3528_v3  ;;  %v2551_v16 = vsel %vm5894_vm7, %v2549_v6, %v2550_v49  ;;  %v3927_v3 = vunpack.c.l.b16 %v3883_v8  ;;  %v5412_v49 = vld [vmem:[%s5708_s29 + $0xcc] sm:$0xf]  ;;  %v5220_v8 = vld [vmem:[%s5708_s29 + $0xc0] sm:$0xe] }
 0x230   : > { %v3455_v63 = vrot.slane %v3453_v44, 4  ;;  %v3458_v19 = vrot.slane %v3456_v61, 5  ;;  %v2976_v35 = vpop.f32.mrf.mxu2  ;;  %v4095_v33 = vadd.f32 %v4025_v39, %v3697_v42 }
 0x232   : > { %5428 = vmatmul.msk.bf16.gmra.mxu3 %vm695_vm4, %v3546_v46  ;;  %v5461_v46 = vrot.slane %v5445_v15, 9  ;;  %v6974_v15 = vld [vmem:[%s5708_s29 + $0xc8] sm:$0x1]  ;;  %v3459_v61 = vor.u32 %v3458_v19, %v3455_v63  ;;  %v7005_v19 = vld [vmem:[%s5708_s29 + $0xd0] sm:$0xf]  ;;  %v2691_v42 = vpop.f32.mrf.mxu1 }
 0x233   : > { %v3472_v57 = vshll.u32 %v6974_v15, 16 }
 0x234   : > { %4326 = vrot.lane.b32.xlu1 %v6921_v21, %s5641_s18  ;;  %4518 = vrot.lane.b32.xlu2 %v6921_v21, %s5643_s20  ;;  %v3880_v44 = vsel %vm5894_vm7, %v5461_v46, %v3879_v27  ;;  %v3460_v46 = vrot.slane %v3459_v61, 4  ;;  %v3480_v61 = vshll.u32 %v5412_v49, 16 }
 0x235   : > { %4422 = vrot.lane.b32.xlu0 %v6921_v21, %s5640_s17  ;;  %v3926_v32 = vunpack.c.l.b16 %v3880_v44  ;;  %v3474_v63 = vrot.slane %v3472_v57, 5  ;;  %v4028_v39 = vpop.f32.mrf.mxu0  ;;  %v5530_v57 = vld [vmem:[%s5708_s29 + $0xc0] sm:$0xff] }
 0x237   : > { %5477 = vmatmul.msk.bf16.gmra.mxu0 %vm695_vm4, %v3944_v11  ;;  %v6970_v11 = vrot.slane %v3462_v31, 5  ;;  %v3630_v31 = vpop.f32.mrf.mxu3 }
 0x238   : > { %5251 = vmatmul.msk.bf16.gmra.mxu1 %vm695_vm4, %v2606_v22  ;;  %v2757_v22 = vadd.f32 %v2689_v43, %v6277_v30  ;;  %v2548_v30 = vsel %vm5894_vm7, %v5235_v2, %v2547_v53  ;;  %v2590_v43 = vunpack.c.l.b16 %v2551_v16  ;;  %v6994_v53 = vadd.f32 %v6740_v20, %v4095_v33  ;;  %v5446_v2 = vld [vmem:[%s5708_s29 + $0xc0] sm:$0xe] }
 0x239   : > { %v3469_v27 = vor.u32 %v3468_v38, %v6970_v11  ;;  %v2589_v37 = vunpack.c.l.b16 %v2548_v30  ;;  %v5613_v38 = vld [vmem:[%s5708_s29 + $0xc4] sm:$0xf]  ;;  %v5462_v59 = vrot.slane %v5446_v2, 9  ;;  %v2978_v30 = vpop.f32.mrf.mxu2  ;;  %v3477_v16 = vshrl.u32 %v5412_v49, 16 }
 0x23a   : > { %v3044_v28 = vadd.f32 %v2976_v35, %v2757_v22  ;;  %v2554_v22 = vrot.slane %v5613_v38, 5  ;;  %v3486_v33 = vshll.u32 %v7005_v19, 16  ;;  %v5414_v38 = vld [vmem:[%s5708_s29 + $0xd4] sm:$0x1] }
 0x23b   : > { %v3470_v0 = vrot.slane %v3469_v27, 4  ;;  %v2607_v6 = vpack.c.b16 %v2590_v43, %v2589_v37  ;;  %v3888_v27 = vrot.slane %v3886_v26, 4 }
 0x23c   : > { %4424 = vrot.lane.b32.xlu1 %v6968_v13, %s5640_s17  ;;  %4328 = vrot.lane.b32.xlu2 %v6968_v13, %s5641_s18  ;;  %v3698_v54 = vadd.f32 %v3630_v31, %v3044_v28  ;;  %v3490_v28 = vshrl.u32 %v7005_v19, 16  ;;  %v5236_v31 = vrot.slane %v5220_v8, 9  ;;  %v3488_v2 = vrot.slane %v3486_v33, 5 }
 0x23d   : > { %4232 = vrot.lane.b32.xlu0 %v6968_v13, %s5642_s19  ;;  %5364 = vmatmul.msk.bf16.gmra.mxu2 %vm695_vm4, %v5529_v10  ;;  %v3945_v10 = vpack.c.b16 %v3927_v3, %v3926_v32  ;;  %v3475_v44 = vsel %vm5720_vm3, %v3470_v0, %v3474_v63  ;;  %v2556_v32 = vrot.slane %v2554_v22, 4  ;;  %v5614_v3 = vld [vmem:[%s5708_s29 + $0xc8] sm:$0x1]  ;;  %v3887_v0 = vsel %vm5894_vm7, %v5462_v59, %v3886_v26  ;;  %v4030_v59 = vpop.f32.mrf.mxu0 }
 0x23e   : > { %v4096_v35 = vadd.f32 %v4028_v39, %v3698_v54  ;;  %v2557_v37 = vrot.slane %v5614_v3, 5  ;;  %v3531_v54 = vunpack.c.l.b16 %v3475_v44  ;;  %v3479_v39 = vrot.slane %v3477_v16, 4  ;;  %v2694_v44 = vpop.f32.mrf.mxu1 }
 0x23f   : > { %v3632_v63 = vpop.f32.mrf.mxu3  ;;  %v2555_v26 = vsel %vm5894_vm7, %v5236_v31, %v2554_v22  ;;  %v3496_v33 = vshll.u32 %v5414_v38, 16 }
 0x240   : > { %v7024_v43 = vadd.f32 %v6740_v20, %v4096_v35 }
 0x242   : > { %5429 = vmatmul.msk.bf16.gmra.mxu3 %vm695_vm4, %v3547_v45  ;;  %v3465_v45 = vsel %vm5720_vm3, %v3460_v46, %v6970_v11  ;;  %v3889_v11 = vrot.slane %v6974_v15, 5  ;;  %v2758_v15 = vadd.f32 %v2691_v42, %v6290_v51  ;;  %v2558_v51 = vsel %vm5894_vm7, %v2556_v32, %v2557_v37 }
 0x243   : > { %v3530_v46 = vunpack.c.l.b16 %v3465_v45  ;;  %v3928_v45 = vunpack.c.l.b16 %v3887_v0  ;;  %v3498_v32 = vrot.slane %v3496_v33, 5  ;;  %v5447_v0 = vld [vmem:[%s5708_s29 + $0xcc] sm:$0xe] }
 0x244   : > { %4426 = vrot.lane.b32.xlu2 %v6994_v53, %s5640_s17  ;;  %4234 = vrot.lane.b32.xlu1 %v6994_v53, %s5642_s19  ;;  %v3890_v49 = vsel %vm5894_vm7, %v3888_v27, %v3889_v11  ;;  %v3045_v42 = vadd.f32 %v2978_v30, %v2758_v15  ;;  %v2592_v27 = vunpack.c.l.b16 %v2558_v51  ;;  %v2981_v11 = vpop.f32.mrf.mxu2  ;;  %v2759_v30 = vadd.f32 %v2694_v44, %v6306_v1 }
 0x245   : > { %4520 = vrot.lane.b32.xlu0 %v6968_v13, %s5643_s20  ;;  %v3548_v35 = vpack.c.b16 %v3531_v54, %v3530_v46  ;;  %v3929_v8 = vunpack.c.l.b16 %v3890_v49  ;;  %v3893_v46 = vrot.slane %v7005_v19, 5  ;;  %v5463_v19 = vrot.slane %v5447_v0, 9  ;;  %v4033_v51 = vpop.f32.mrf.mxu0 }
 0x246   : > { %v3896_v49 = vrot.slane %v5414_v38, 5 }
 0x247   : > { %5478 = vmatmul.msk.bf16.gmra.mxu0 %vm695_vm4, %v3945_v10  ;;  %v3482_v10 = vrot.slane %v3480_v61, 5  ;;  %v3946_v22 = vpack.c.b16 %v3929_v8, %v3928_v45  ;;  %v3635_v54 = vpop.f32.mrf.mxu3  ;;  %v3895_v15 = vrot.slane %v3893_v46, 4  ;;  %v3894_v36 = vsel %vm5894_vm7, %v5463_v19, %v3893_v46 }
 0x248   : > { %5252 = vmatmul.msk.bf16.gmra.mxu1 %vm695_vm4, %v2607_v6  ;;  %v3492_v6 = vrot.slane %v3490_v28, 4  ;;  %v2591_v28 = vunpack.c.l.b16 %v2555_v26  ;;  %v2696_v26 = vpop.f32.mrf.mxu1 }
 0x249   : > { %v3483_v16 = vor.u32 %v3482_v10, %v3479_v39  ;;  %v3046_v39 = vadd.f32 %v2981_v11, %v2759_v30  ;;  %v3897_v38 = vsel %vm5894_vm7, %v3895_v15, %v3896_v49 }
 0x24a   : > { %v3493_v61 = vor.u32 %v3492_v6, %v3488_v2  ;;  %v2608_v37 = vpack.c.b16 %v2592_v27, %v2591_v28 }
 0x24b   : > { %v3484_v31 = vrot.slane %v3483_v16, 4  ;;  %v3700_v45 = vadd.f32 %v3635_v54, %v3046_v39  ;;  %v7633_v16 = vld [vmem:[#allocation2_spill] sm:$0xff] }
 0x24c   : > { %4236 = vrot.lane.b32.xlu2 %v7024_v43, %s5642_s19  ;;  %4522 = vrot.lane.b32.xlu1 %v6994_v53, %s5643_s20  ;;  %v3494_v3 = vrot.slane %v3493_v61, 4  ;;  %v2983_v8 = vpop.f32.mrf.mxu2 }
 0x24d   : > { %4330 = vrot.lane.b32.xlu0 %v6994_v53, %s5641_s18  ;;  %5365 = vmatmul.msk.bf16.gmra.mxu2 %vm695_vm4, %v5530_v57  ;;  %v3699_v57 = vadd.f32 %v3632_v63, %v3045_v42  ;;  %v3489_v1 = vsel %vm5720_vm3, %v3484_v31, %v3488_v2  ;;  %v5531_v42 = vld [vmem:[%s5708_s29 + $0xcc] sm:$0xff]  ;;  %v2760_v2 = vadd.f32 %v2696_v26, %v7633_v16 }
 0x24e   : > { %v3499_v6 = vsel %vm5720_vm3, %v3494_v3, %v3498_v32  ;;  %v3532_v44 = vunpack.c.l.b16 %v3489_v1  ;;  %v4098_v61 = vadd.f32 %v4033_v51, %v3700_v45  ;;  %v4035_v32 = vpop.f32.mrf.mxu0 }
 0x24f   : > { %v4097_v63 = vadd.f32 %v4030_v59, %v3699_v57  ;;  %v3533_v59 = vunpack.c.l.b16 %v3499_v6  ;;  %v3047_v33 = vadd.f32 %v2983_v8, %v2760_v2  ;;  %v3637_v11 = vpop.f32.mrf.mxu3  ;;  %v3930_v57 = vunpack.c.l.b16 %v3894_v36 }
 0x250   : > { %v7078_v31 = vadd.f32 %v6740_v20, %v4098_v61  ;;  %v2699_v18 = vpop.f32.mrf.mxu1  ;;  %v4156_v36 = vmax.f32 %v6752_v14, 0.0 }
 0x251   : > { %v3549_v27 = vpack.c.b16 %v3533_v59, %v3532_v44  ;;  %v3701_v3 = vadd.f32 %v3637_v11, %v3047_v33  ;;  %v2761_v39 = vadd.f32 %v2699_v18, %v6342_v52  ;;  %v7634_v18 = vld [vmem:[#allocation3_spill] sm:$0xff] }
 0x252   : > { %5430 = vmatmul.msk.bf16.gmra.mxu3 %vm695_vm4, %v3548_v35  ;;  %v7061_v35 = vadd.f32 %v6740_v20, %v4097_v63 }
 0x254   : > { %4524 = vrot.lane.b32.xlu2 %v7024_v43, %s5643_s20  ;;  %4332 = vrot.lane.b32.xlu1 %v7024_v43, %s5641_s18  ;;  %v2986_v54 = vpop.f32.mrf.mxu2 }
 0x255   : > { %4428 = vrot.lane.b32.xlu0 %v7024_v43, %s5640_s17  ;;  %v3048_v6 = vadd.f32 %v2986_v54, %v2761_v39 }
 0x256   : > { %v4317_v10 = vpop.permute.xlu2 %4316  ;;  %v4038_v49 = vpop.f32.mrf.mxu0 }
 0x257   : > { %5479 = vmatmul.msk.bf16.gmra.mxu0 %vm695_vm4, %v3946_v22  ;;  %v3931_v22 = vunpack.c.l.b16 %v3897_v38  ;;  %v3640_v63 = vpop.f32.mrf.mxu3 }
 0x258   : > { %5253 = vmatmul.msk.bf16.gmra.mxu1 %vm695_vm4, %v2608_v37  ;;  %v4099_v37 = vadd.f32 %v4035_v32, %v3701_v3  ;;  %v2701_v1 = vpop.f32.mrf.mxu1  ;;  %v3702_v52 = vadd.f32 %v3640_v63, %v3048_v6 }
 0x259   : > { %v3947_v30 = vpack.c.b16 %v3931_v22, %v3930_v57 }
 0x25a   : > { %v7091_v0 = vadd.f32 %v6740_v20, %v4099_v37  ;;  %v4100_v59 = vadd.f32 %v4038_v49, %v3702_v52 }
 0x25c   : > { %4334 = vrot.lane.b32.xlu2 %v7061_v35, %s5641_s18  ;;  %4430 = vrot.lane.b32.xlu1 %v7061_v35, %s5640_s17  ;;  %v2988_v51 = vpop.f32.mrf.mxu2  ;;  %v7117_v11 = vadd.f32 %v6740_v20, %v4100_v59  ;;  %v4157_v59 = vmax.f32 %v6782_v47, 0.0 }
 0x25d   : > { %4238 = vrot.lane.b32.xlu0 %v7061_v35, %s5642_s19  ;;  %5366 = vmatmul.msk.bf16.gmra.mxu2 %vm695_vm4, %v5531_v42  ;;  %v2762_v42 = vadd.f32 %v2701_v1, %v6356_v60 }
 0x25e   : > { %v7075_v28 = vpop.permute.xlu2 %4414  ;;  %v4040_v33 = vpop.f32.mrf.mxu0 }
 0x25f   : > { %v3642_v44 = vpop.f32.mrf.mxu3  ;;  %v3049_v8 = vadd.f32 %v2988_v51, %v2762_v42 }
 0x260   : > { %v2704_v61 = vpop.f32.mrf.mxu1 }
 0x261   : > { %v3703_v57 = vadd.f32 %v3642_v44, %v3049_v8  ;;  %v2763_v14 = vadd.f32 %v2704_v61, %v7634_v18  ;;  %v7635_v61 = vld [vmem:[#allocation4_spill] sm:$0xff]  ;;  %v4158_v18 = vmax.f32 %v6811_v56, 0.0 }
 0x262   : > { %5431 = vmatmul.msk.bf16.gmra.mxu3 %vm695_vm4, %v3549_v27 }
 0x263   : > { %v4101_v32 = vadd.f32 %v4040_v33, %v3703_v57 }
 0x264   : > { %4432 = vrot.lane.b32.xlu2 %v7078_v31, %s5640_s17  ;;  %4240 = vrot.lane.b32.xlu1 %v7078_v31, %s5642_s19  ;;  %v2991_v22 = vpop.f32.mrf.mxu2 }
 0x265   : > { %4526 = vrot.lane.b32.xlu0 %v7061_v35, %s5643_s20  ;;  %v7136_v1 = vadd.f32 %v6740_v20, %v4101_v32 }
 0x266   : > { %v7087_v46 = vpop.permute.xlu2 %4512  ;;  %v4043_v49 = vpop.f32.mrf.mxu0 }
 0x267   : > { %5480 = vmatmul.msk.bf16.gmra.mxu0 %vm695_vm4, %v3947_v30  ;;  %v3050_v30 = vadd.f32 %v2991_v22, %v2763_v14  ;;  %v3645_v63 = vpop.f32.mrf.mxu3 }
 0x269   : > { %v3704_v6 = vadd.f32 %v3645_v63, %v3050_v30 }
 0x26c   : > { %4242 = vrot.lane.b32.xlu2 %v7091_v0, %s5642_s19  ;;  %4528 = vrot.lane.b32.xlu1 %v7078_v31, %s5643_s20  ;;  %v2993_v42 = vpop.f32.mrf.mxu2 }
 0x26d   : > { %4336 = vrot.lane.b32.xlu0 %v7078_v31, %s5641_s18 }
 0x26e   : > { %v4413_v19 = vpop.permute.xlu1 %4412  ;;  %v7100_v15 = vpop.permute.xlu2 %4322 }
 0x26f   : > { %v4221_v26 = vpop.permute.xlu0 %4220 }
 0x270   : > { %v4605_v45 = vsel %vm4604_vm8, %v4221_v26, %v4317_v10  ;;  %v4102_v26 = vadd.f32 %v4043_v49, %v3704_v6 }
 0x271   : > { %v4637_v60 = vsel %vm695_vm4, %v4605_v45, %v4413_v19  ;;  %v2706_v19 = vpop.f32.mrf.mxu1 }
 0x272   : > { %v2764_v33 = vadd.f32 %v2706_v19, %v7635_v61 }
 0x274   : > { %4530 = vrot.lane.b32.xlu2 %v7091_v0, %s5643_s20  ;;  %4338 = vrot.lane.b32.xlu1 %v7091_v0, %s5641_s18  ;;  %v2996_v32 = vpop.f32.mrf.mxu2 }
 0x275   : > { %4434 = vrot.lane.b32.xlu0 %v7091_v0, %s5640_s17 }
 0x276   : > { %v4511_v16 = vpop.permute.xlu1 %4510  ;;  %v7110_v2 = vpop.permute.xlu2 %4228 }
 0x277   : > { %v4509_v10 = vpop.permute.xlu0 %4508 }
 0x278   : > { %v4670_v38 = vsel %vm4669_vm9, %v4637_v60, %v4509_v10  ;;  %v7151_v60 = vadd.f32 %v6740_v20, %v4102_v26 }
 0x279   : > { %v4702_v27 = vadd.f32 %v4670_v38, %v4156_v36  ;;  %v3647_v36 = vpop.f32.mrf.mxu3  ;;  %v2709_v47 = vpop.f32.mrf.mxu1 }
 0x27a   : > { %v2765_v6 = vadd.f32 %v2709_v47, %v6417_v48 }
 0x27b   : > { %v4734_v3 = vpack.c.bf16 %v4702_v27, %v4702_v27 }
 0x27c   : > { %4340 = vrot.lane.b32.xlu2 %v7117_v11, %s5641_s18  ;;  %4436 = vrot.lane.b32.xlu1 %v7117_v11, %s5640_s17  ;;  %v3052_v49 = vadd.f32 %v2996_v32, %v2765_v6  ;;  %v2998_v61 = vpop.f32.mrf.mxu2 }
 0x27d   : > { %4767 = vst.msk [vmem:[%s7122_s24] sm:$0xf] %vm4766_vm10, %v4734_v3  ;;  %4244 = vrot.lane.b32.xlu0 %v7117_v11, %s5642_s19 }
 0x27e   : > { %v4225_v37 = vpop.permute.xlu1 %4224  ;;  %v7133_v54 = vpop.permute.xlu2 %4420 }
 0x27f   : > { %v4223_v39 = vpop.permute.xlu0 %4222 }
 0x284   : > { %4438 = vrot.lane.b32.xlu2 %v7136_v1, %s5640_s17  ;;  %4246 = vrot.lane.b32.xlu1 %v7136_v1, %s5642_s19 }
 0x285   : > { %4532 = vrot.lane.b32.xlu0 %v7117_v11, %s5643_s20 }
 0x286   : > { %v4321_v51 = vpop.permute.xlu1 %4320  ;;  %v7144_v52 = vpop.permute.xlu2 %4230 }
 0x287   : > { %v4319_v45 = vpop.permute.xlu0 %4318  ;;  %v4607_v22 = vsel %vm4604_vm8, %v4225_v37, %v4321_v51  ;;  %v3650_v37 = vpop.f32.mrf.mxu3 }
 0x288   : > { %v4606_v44 = vsel %vm4604_vm8, %v4223_v39, %v4319_v45 }
 0x289   : > { %v4638_v8 = vsel %vm695_vm4, %v4606_v44, %v7075_v28  ;;  %v3051_v28 = vadd.f32 %v2993_v42, %v2764_v33  ;;  %v4159_v42 = vmax.f32 %v6835_v41, 0.0 }
 0x28a   : > { %v4671_v10 = vsel %vm4669_vm9, %v4638_v8, %v4511_v16  ;;  %v4045_v16 = vpop.f32.mrf.mxu0 }
 0x28b   : > { %v4703_v38 = vadd.f32 %v4671_v10, %v4157_v59  ;;  %v3705_v63 = vadd.f32 %v3647_v36, %v3051_v28  ;;  %v2711_v59 = vpop.f32.mrf.mxu1  ;;  %v7189_v36 = vld [vmem:[%s7624_s2] ss:$0 sm:$0xff] }
 0x28c   : > { %4248 = vrot.lane.b32.xlu2 %v7151_v60, %s5642_s19  ;;  %4534 = vrot.lane.b32.xlu1 %v7136_v1, %s5643_s20  ;;  %v2766_v41 = vadd.f32 %v2711_v59, %v6434_v23 }
 0x28d   : > { %v4735_v27 = vpack.c.bf16 %v4703_v38, %v4703_v38  ;;  %4342 = vrot.lane.b32.xlu0 %v7136_v1, %s5641_s18  ;;  %v4103_v56 = vadd.f32 %v4045_v16, %v3705_v63  ;;  %v3706_v38 = vadd.f32 %v3650_v37, %v3052_v49  ;;  %v3001_v37 = vpop.f32.mrf.mxu2 }
 0x28e   : > { %v4227_v20 = vpop.permute.xlu1 %4226  ;;  %v7161_v57 = vpop.permute.xlu2 %4518 }
 0x28f   : > { %4768 = vst.msk [vmem:[%s7122_s24 + $0x4] sm:$0xf] %vm4766_vm10, %v4735_v27  ;;  %v4417_v3 = vpop.permute.xlu0 %4416  ;;  %v3053_v27 = vadd.f32 %v2998_v61, %v2766_v41  ;;  %v3652_v16 = vpop.f32.mrf.mxu3 }
 0x290   : > { %v4639_v14 = vsel %vm695_vm4, %v4607_v22, %v4417_v3  ;;  %v4160_v3 = vmax.f32 %v6865_v50, 0.0 }
 0x291   : > { %v4672_v30 = vsel %vm4669_vm9, %v4639_v14, %v7087_v46  ;;  %v4608_v46 = vsel %vm4604_vm8, %v4227_v20, %v7100_v15  ;;  %v7192_v15 = vadd.f32 %v7189_v36, %v4103_v56  ;;  %v3707_v32 = vadd.f32 %v3652_v16, %v3053_v27 }
 0x292   : > { %v4704_v39 = vadd.f32 %v4672_v30, %v4158_v18  ;;  %v4048_v8 = vpop.f32.mrf.mxu0 }
 0x293   : > { %v4104_v47 = vadd.f32 %v4048_v8, %v3706_v38  ;;  %v2714_v63 = vpop.f32.mrf.mxu1 }
 0x294   : > { %v4736_v19 = vpack.c.bf16 %v4704_v39, %v4704_v39  ;;  %4536 = vrot.lane.b32.xlu2 %v7151_v60, %s5643_s20  ;;  %4344 = vrot.lane.b32.xlu1 %v7151_v60, %s5641_s18  ;;  %v2767_v59 = vadd.f32 %v2714_v63, %v6456_v62 }
 0x295   : > { %4440 = vrot.lane.b32.xlu0 %v7151_v60, %s5640_s17  ;;  %v7211_v14 = vadd.f32 %v7189_v36, %v4104_v47 }
 0x296   : > { %4769 = vst.msk [vmem:[%s7122_s24 + $0x8] sm:$0xf] %vm4766_vm10, %v4736_v19  ;;  %v4419_v26 = vpop.permute.xlu1 %4418  ;;  %v7181_v48 = vpop.permute.xlu2 %4328 }
 0x297   : > { %v4515_v51 = vpop.permute.xlu0 %4514  ;;  %v4640_v45 = vsel %vm695_vm4, %v4608_v46, %v4419_v26  ;;  %v4161_v46 = vmax.f32 %v6921_v21, 0.0 }
 0x298   : > { %v4673_v44 = vsel %vm4669_vm9, %v4640_v45, %v4515_v51 }
 0x299   : > { %v4705_v10 = vadd.f32 %v4673_v44, %v4159_v42  ;;  %v3655_v44 = vpop.f32.mrf.mxu3 }
 0x29a   : > { %v4050_v39 = vpop.f32.mrf.mxu0 }
 0x29b   : > { %v4737_v33 = vpack.c.bf16 %v4705_v10, %v4705_v10  ;;  %v2716_v21 = vpop.f32.mrf.mxu1 }
 0x29c   : > { %4346 = vrot.lane.b32.xlu2 %v7192_v15, %s5641_s18  ;;  %4442 = vrot.lane.b32.xlu1 %v7192_v15, %s5640_s17  ;;  %v2768_v41 = vadd.f32 %v2716_v21, %v6476_v34 }
 0x29d   : > { %4770 = vst.msk [vmem:[%s7122_s24 + $0xc] sm:$0xf] %vm4766_vm10, %v4737_v33  ;;  %4250 = vrot.lane.b32.xlu0 %v7192_v15, %s5642_s19  ;;  %v3003_v33 = vpop.f32.mrf.mxu2 }
 0x29e   : > { %v4517_v28 = vpop.permute.xlu1 %4516  ;;  %v7203_v20 = vpop.permute.xlu2 %4426  ;;  %v3055_v16 = vadd.f32 %v3003_v33, %v2768_v41 }
 0x29f   : > { %v4325_v22 = vpop.permute.xlu0 %4324 }
 0x2a0   : > { %v4609_v23 = vsel %vm4604_vm8, %v7110_v2, %v4325_v22  ;;  %v4105_v2 = vadd.f32 %v4050_v39, %v3707_v32 }
 0x2a1   : > { %v4641_v18 = vsel %vm695_vm4, %v4609_v23, %v7133_v54  ;;  %v3657_v27 = vpop.f32.mrf.mxu3 }
 0x2a2   : > { %v4674_v30 = vsel %vm4669_vm9, %v4641_v18, %v4517_v28  ;;  %v7231_v42 = vadd.f32 %v7189_v36, %v4105_v2  ;;  %v4053_v38 = vpop.f32.mrf.mxu0 }
 0x2a3   : > { %v4706_v6 = vadd.f32 %v4674_v30, %v4160_v3  ;;  %v2719_v32 = vpop.f32.mrf.mxu1 }
 0x2a4   : > { %4444 = vrot.lane.b32.xlu2 %v7211_v14, %s5640_s17  ;;  %4252 = vrot.lane.b32.xlu1 %v7211_v14, %s5642_s19 }
 0x2a5   : > { %v4738_v50 = vpack.c.bf16 %v4706_v6, %v4706_v6  ;;  %4538 = vrot.lane.b32.xlu0 %v7192_v15, %s5643_s20  ;;  %v3709_v6 = vadd.f32 %v3657_v27, %v3055_v16 }
 0x2a6   : > { %v4327_v54 = vpop.permute.xlu1 %4326  ;;  %v7220_v19 = vpop.permute.xlu2 %4236 }
 0x2a7   : > { %4771 = vst.msk [vmem:[%s7122_s24 + $0x10] sm:$0xf] %vm4766_vm10, %v4738_v50  ;;  %v4423_v56 = vpop.permute.xlu0 %4422  ;;  %v4610_v49 = vsel %vm4604_vm8, %v7144_v52, %v4327_v54  ;;  %v3054_v52 = vadd.f32 %v3001_v37, %v2767_v59  ;;  %v3006_v50 = vpop.f32.mrf.mxu2  ;;  %v2769_v54 = vadd.f32 %v2719_v32, %v6499_v4 }
 0x2a8   : > { %v4642_v26 = vsel %vm695_vm4, %v4610_v49, %v4423_v56 }
 0x2a9   : > { %v4675_v51 = vsel %vm4669_vm9, %v4642_v26, %v7161_v57  ;;  %v3708_v62 = vadd.f32 %v3655_v44, %v3054_v52  ;;  %v3056_v37 = vadd.f32 %v3006_v50, %v2769_v54 }
 0x2aa   : > { %v4707_v45 = vadd.f32 %v4675_v51, %v4161_v46  ;;  %v4055_v30 = vpop.f32.mrf.mxu0  ;;  %v3660_v46 = vpop.f32.mrf.mxu3 }
 0x2ab   : > { %v4106_v28 = vadd.f32 %v4053_v38, %v3708_v62  ;;  %v3710_v59 = vadd.f32 %v3660_v46, %v3056_v37  ;;  %v2721_v21 = vpop.f32.mrf.mxu1 }
 0x2ac   : > { %v4739_v8 = vpack.c.bf16 %v4707_v45, %v4707_v45  ;;  %4254 = vrot.lane.b32.xlu2 %v7231_v42, %s5642_s19  ;;  %4540 = vrot.lane.b32.xlu1 %v7211_v14, %s5643_s20  ;;  %v4163_v45 = vmax.f32 %v6994_v53, 0.0 }
 0x2ad   : > { %4348 = vrot.lane.b32.xlu0 %v7211_v14, %s5641_s18  ;;  %v7257_v39 = vadd.f32 %v7189_v36, %v4106_v28 }
 0x2ae   : > { %4772 = vst.msk [vmem:[%s7122_s24 + $0x14] sm:$0xf] %vm4766_vm10, %v4739_v8  ;;  %v4425_v57 = vpop.permute.xlu1 %4424  ;;  %v4525_v10 = vpop.permute.xlu2 %4524 }
 0x2af   : > { %v4233_v61 = vpop.permute.xlu0 %4232  ;;  %v3008_v33 = vpop.f32.mrf.mxu2 }
 0x2b0   : > { %v4611_v47 = vsel %vm4604_vm8, %v4233_v61, %v7181_v48  ;;  %v4162_v48 = vmax.f32 %v6968_v13, 0.0  ;;  %v4107_v13 = vadd.f32 %v4055_v30, %v3709_v6 }
 0x2b1   : > { %v4643_v34 = vsel %vm695_vm4, %v4611_v47, %v4425_v57  ;;  %v4164_v47 = vmax.f32 %v7024_v43, 0.0 }
 0x2b2   : > { %v7275_v44 = vadd.f32 %v7189_v36, %v4107_v13  ;;  %v4058_v52 = vpop.f32.mrf.mxu0 }
 0x2b3   : > { %v4108_v53 = vadd.f32 %v4058_v52, %v3710_v59 }
 0x2b4   : > { %4542 = vrot.lane.b32.xlu2 %v7231_v42, %s5643_s20  ;;  %4350 = vrot.lane.b32.xlu1 %v7231_v42, %s5641_s18 }
 0x2b5   : > { %4446 = vrot.lane.b32.xlu0 %v7231_v42, %s5640_s17  ;;  %v7294_v16 = vadd.f32 %v7189_v36, %v4108_v53 }
 0x2b6   : > { %v7251_v22 = vpop.permute.xlu2 %4334  ;;  %v4235_v23 = vpop.permute.xlu1 %4234 }
 0x2b7   : > { %v4521_v3 = vpop.permute.xlu0 %4520 }
 0x2b8   : > { %v4676_v18 = vsel %vm4669_vm9, %v4643_v34, %v4521_v3  ;;  %v3662_v34 = vpop.f32.mrf.mxu3  ;;  %v2770_v3 = vadd.f32 %v2721_v21, %v6516_v58 }
 0x2b9   : > { %v4708_v63 = vadd.f32 %v4676_v18, %v4162_v48 }
 0x2ba   : > { %v3057_v43 = vadd.f32 %v3008_v33, %v2770_v3  ;;  %v4060_v32 = vpop.f32.mrf.mxu0 }
 0x2bb   : > { %v4740_v2 = vpack.c.bf16 %v4708_v63, %v4708_v63  ;;  %v3011_v63 = vpop.f32.mrf.mxu2 }
 0x2bc   : > { %4352 = vrot.lane.b32.xlu2 %v7257_v39, %s5641_s18  ;;  %4448 = vrot.lane.b32.xlu1 %v7257_v39, %s5640_s17  ;;  %v3711_v58 = vadd.f32 %v3662_v34, %v3057_v43 }
 0x2bd   : > { %4773 = vst.msk [vmem:[%s7122_s24 + $0x18] sm:$0xf] %vm4766_vm10, %v4740_v2  ;;  %4256 = vrot.lane.b32.xlu0 %v7257_v39, %s5642_s19 }
 0x2be   : > { %v7268_v56 = vpop.permute.xlu2 %4432  ;;  %v4523_v49 = vpop.permute.xlu1 %4522  ;;  %v4109_v54 = vadd.f32 %v4060_v32, %v3711_v58 }
 0x2bf   : > { %v4331_v26 = vpop.permute.xlu0 %4330 }
 0x2c0   : > { %v4612_v4 = vsel %vm4604_vm8, %v4235_v23, %v4331_v26  ;;  %v3665_v2 = vpop.f32.mrf.mxu3  ;;  %v7320_v59 = vadd.f32 %v7189_v36, %v4109_v54 }
 0x2c1   : > { %v4644_v51 = vsel %vm695_vm4, %v4612_v4, %v7203_v20 }
 0x2c2   : > { %v4677_v8 = vsel %vm4669_vm9, %v4644_v51, %v4523_v49  ;;  %v4063_v51 = vpop.f32.mrf.mxu0 }
 0x2c3   : > { %v4709_v57 = vadd.f32 %v4677_v8, %v4163_v45  ;;  %v3013_v21 = vpop.f32.mrf.mxu2 }
 0x2c4   : > { %4450 = vrot.lane.b32.xlu2 %v7275_v44, %s5640_s17  ;;  %4258 = vrot.lane.b32.xlu1 %v7275_v44, %s5642_s19 }
 0x2c5   : > { %v4741_v38 = vpack.c.bf16 %v4709_v57, %v4709_v57  ;;  %4544 = vrot.lane.b32.xlu0 %v7257_v39, %s5643_s20 }
 0x2c6   : > { %v7284_v20 = vpop.permute.xlu2 %4242  ;;  %v4333_v61 = vpop.permute.xlu1 %4332 }
 0x2c7   : > { %4774 = vst.msk [vmem:[%s7122_s24 + $0x1c] sm:$0xf] %vm4766_vm10, %v4741_v38  ;;  %v4429_v62 = vpop.permute.xlu0 %4428  ;;  %v4613_v41 = vsel %vm4604_vm8, %v7220_v19, %v4333_v61  ;;  %v2724_v19 = vpop.f32.mrf.mxu1 }
 0x2c8   : > { %v4645_v27 = vsel %vm695_vm4, %v4613_v41, %v4429_v62  ;;  %v2771_v6 = vadd.f32 %v2724_v19, %v6538_v24  ;;  %v3667_v33 = vpop.f32.mrf.mxu3 }
 0x2c9   : > { %v4678_v28 = vsel %vm4669_vm9, %v4645_v27, %v4525_v10 }
 0x2ca   : > { %v4710_v23 = vadd.f32 %v4678_v28, %v4164_v47  ;;  %v3058_v13 = vadd.f32 %v3011_v63, %v2771_v6  ;;  %v4166_v47 = vmax.f32 %v7078_v31, 0.0  ;;  %v4065_v3 = vpop.f32.mrf.mxu0  ;;  %v4167_v63 = vmax.f32 %v7091_v0, 0.0 }
 0x2cb   : > { %v3016_v19 = vpop.f32.mrf.mxu2 }
 0x2cc   : > { %v4742_v48 = vpack.c.bf16 %v4710_v23, %v4710_v23  ;;  %4260 = vrot.lane.b32.xlu2 %v7294_v16, %s5642_s19  ;;  %4546 = vrot.lane.b32.xlu1 %v7275_v44, %s5643_s20  ;;  %v3712_v8 = vadd.f32 %v3665_v2, %v3058_v13 }
 0x2cd   : > { %4354 = vrot.lane.b32.xlu0 %v7275_v44, %s5641_s18 }
 0x2ce   : > { %4775 = vst.msk [vmem:[%s7122_s24 + $0x20] sm:$0xf] %vm4766_vm10, %v4742_v48  ;;  %v4531_v10 = vpop.permute.xlu2 %4530  ;;  %v4431_v18 = vpop.permute.xlu1 %4430 }
 0x2cf   : > { %v4239_v30 = vpop.permute.xlu0 %4238  ;;  %v2726_v24 = vpop.f32.mrf.mxu1 }
 0x2d0   : > { %v4614_v50 = vsel %vm4604_vm8, %v4239_v30, %v7251_v22  ;;  %v4165_v22 = vmax.f32 %v7061_v35, 0.0  ;;  %v2772_v57 = vadd.f32 %v2726_v24, %v6558_v5  ;;  %v4110_v35 = vadd.f32 %v4063_v51, %v3712_v8  ;;  %v3670_v6 = vpop.f32.mrf.mxu3 }
 0x2d1   : > { %v4646_v46 = vsel %vm695_vm4, %v4614_v50, %v4431_v18 }
 0x2d2   : > { %v3059_v38 = vadd.f32 %v3013_v21, %v2772_v57  ;;  %v7338_v28 = vadd.f32 %v7189_v36, %v4110_v35  ;;  %v4068_v0 = vpop.f32.mrf.mxu0 }
 0x2d4   : > { %4548 = vrot.lane.b32.xlu2 %v7294_v16, %s5643_s20  ;;  %4356 = vrot.lane.b32.xlu1 %v7294_v16, %s5641_s18  ;;  %v3713_v23 = vadd.f32 %v3667_v33, %v3059_v38 }
 0x2d5   : > { %4452 = vrot.lane.b32.xlu0 %v7294_v16, %s5640_s17 }
 0x2d6   : > { %v7314_v37 = vpop.permute.xlu2 %4340  ;;  %v4241_v49 = vpop.permute.xlu1 %4240  ;;  %v4111_v31 = vadd.f32 %v4065_v3, %v3713_v23 }
 0x2d7   : > { %v4527_v26 = vpop.permute.xlu0 %4526  ;;  %v2729_v41 = vpop.f32.mrf.mxu1 }
 0x2d8   : > { %v4679_v4 = vsel %vm4669_vm9, %v4646_v46, %v4527_v26  ;;  %v7357_v2 = vadd.f32 %v7189_v36, %v4111_v31 }
 0x2d9   : > { %v4711_v45 = vadd.f32 %v4679_v4, %v4165_v22  ;;  %v3018_v22 = vpop.f32.mrf.mxu2 }
 0x2db   : > { %v4743_v52 = vpack.c.bf16 %v4711_v45, %v4711_v45 }
 0x2dc   : > { %4358 = vrot.lane.b32.xlu2 %v7320_v59, %s5641_s18  ;;  %4454 = vrot.lane.b32.xlu1 %v7320_v59, %s5640_s17 }
 0x2dd   : > { %4776 = vst.msk [vmem:[%s7122_s24 + $0x24] sm:$0xf] %vm4766_vm10, %v4743_v52  ;;  %4262 = vrot.lane.b32.xlu0 %v7320_v59, %s5642_s19 }
 0x2de   : > { %v7331_v53 = vpop.permute.xlu2 %4438  ;;  %v4529_v61 = vpop.permute.xlu1 %4528 }
 0x2df   : > { %v4337_v62 = vpop.permute.xlu0 %4336  ;;  %v2731_v13 = vpop.f32.mrf.mxu1 }
 0x2e0   : > { %v4615_v5 = vsel %vm4604_vm8, %v4241_v49, %v4337_v62  ;;  %v2773_v49 = vadd.f32 %v2729_v41, %v6581_v7  ;;  %v3672_v7 = vpop.f32.mrf.mxu3  ;;  %v2774_v51 = vadd.f32 %v2731_v13, %v6598_v55  ;;  %v4070_v55 = vpop.f32.mrf.mxu0 }
 0x2e1   : > { %v4647_v27 = vsel %vm695_vm4, %v4615_v5, %v7268_v56  ;;  %v3021_v62 = vpop.f32.mrf.mxu2 }
 0x2e2   : > { %v4680_v34 = vsel %vm4669_vm9, %v4647_v27, %v4529_v61  ;;  %v3061_v52 = vadd.f32 %v3018_v22, %v2774_v51 }
 0x2e3   : > { %v4712_v48 = vadd.f32 %v4680_v34, %v4166_v47 }
 0x2e4   : > { %4456 = vrot.lane.b32.xlu2 %v7338_v28, %s5640_s17  ;;  %4264 = vrot.lane.b32.xlu1 %v7338_v28, %s5642_s19  ;;  %v3715_v47 = vadd.f32 %v3672_v7, %v3061_v52 }
 0x2e5   : > { %v4744_v43 = vpack.c.bf16 %v4712_v48, %v4712_v48  ;;  %4550 = vrot.lane.b32.xlu0 %v7320_v59, %s5643_s20 }
 0x2e6   : > { %v7347_v56 = vpop.permute.xlu2 %4248  ;;  %v4339_v18 = vpop.permute.xlu1 %4338 }
 0x2e7   : > { %4777 = vst.msk [vmem:[%s7122_s24 + $0x28] sm:$0xf] %vm4766_vm10, %v4744_v43  ;;  %v4435_v32 = vpop.permute.xlu0 %4434  ;;  %v4616_v30 = vsel %vm4604_vm8, %v7284_v20, %v4339_v18  ;;  %v3060_v20 = vadd.f32 %v3016_v19, %v2773_v49  ;;  %v2734_v8 = vpop.f32.mrf.mxu1 }
 0x2e8   : > { %v4648_v58 = vsel %vm695_vm4, %v4616_v30, %v4435_v32  ;;  %v2775_v23 = vadd.f32 %v2734_v8, %v6620_v25  ;;  %v3675_v34 = vpop.f32.mrf.mxu3  ;;  %v4073_v18 = vpop.f32.mrf.mxu0  ;;  %v4169_v32 = vmax.f32 %v7136_v1, 0.0 }
 0x2e9   : > { %v4681_v50 = vsel %vm4669_vm9, %v4648_v58, %v4531_v10  ;;  %v3714_v4 = vadd.f32 %v3670_v6, %v3060_v20 }
 0x2ea   : > { %v4713_v54 = vadd.f32 %v4681_v50, %v4167_v63  ;;  %v3062_v3 = vadd.f32 %v3021_v62, %v2775_v23  ;;  %v3023_v50 = vpop.f32.mrf.mxu2 }
 0x2eb   : > { %v4112_v21 = vadd.f32 %v4068_v0, %v3714_v4 }
 0x2ec   : > { %v4745_v24 = vpack.c.bf16 %v4713_v54, %v4713_v54  ;;  %4266 = vrot.lane.b32.xlu2 %v7357_v2, %s5642_s19  ;;  %4552 = vrot.lane.b32.xlu1 %v7338_v28, %s5643_s20  ;;  %v3716_v58 = vadd.f32 %v3675_v34, %v3062_v3 }
 0x2ed   : > { %4360 = vrot.lane.b32.xlu0 %v7338_v28, %s5641_s18  ;;  %v7383_v41 = vadd.f32 %v7189_v36, %v4112_v21 }
 0x2ee   : > { %4778 = vst.msk [vmem:[%s7122_s24 + $0x2c] sm:$0xf] %vm4766_vm10, %v4745_v24  ;;  %v4537_v10 = vpop.permute.xlu2 %4536  ;;  %v4437_v46 = vpop.permute.xlu1 %4436  ;;  %v4114_v1 = vadd.f32 %v4073_v18, %v3716_v58 }
 0x2ef   : > { %v4245_v26 = vpop.permute.xlu0 %4244  ;;  %v2736_v43 = vpop.f32.mrf.mxu1 }
 0x2f0   : > { %v4617_v45 = vsel %vm4604_vm8, %v4245_v26, %v7314_v37  ;;  %v4168_v37 = vmax.f32 %v7117_v11, 0.0  ;;  %v4113_v11 = vadd.f32 %v4070_v55, %v3715_v47  ;;  %v3677_v24 = vpop.f32.mrf.mxu3  ;;  %v7420_v7 = vadd.f32 %v7189_v36, %v4114_v1 }
 0x2f1   : > { %v4649_v38 = vsel %vm695_vm4, %v4617_v45, %v4437_v46  ;;  %v4170_v46 = vmax.f32 %v7151_v60, 0.0  ;;  %v4075_v45 = vpop.f32.mrf.mxu0  ;;  %v2776_v8 = vadd.f32 %v2736_v43, %v6641_v29  ;;  %v4172_v1 = vmax.f32 %v7211_v14, 0.0 }
 0x2f2   : > { %v7401_v63 = vadd.f32 %v7189_v36, %v4113_v11  ;;  %v3026_v60 = vpop.f32.mrf.mxu2 }
 0x2f4   : > { %4554 = vrot.lane.b32.xlu2 %v7357_v2, %s5643_s20  ;;  %4362 = vrot.lane.b32.xlu1 %v7357_v2, %s5641_s18 }
 0x2f5   : > { %4458 = vrot.lane.b32.xlu0 %v7357_v2, %s5640_s17 }
 0x2f6   : > { %v7377_v57 = vpop.permute.xlu2 %4346  ;;  %v4247_v35 = vpop.permute.xlu1 %4246 }
 0x2f7   : > { %v4533_v61 = vpop.permute.xlu0 %4532  ;;  %v2739_v26 = vpop.f32.mrf.mxu1 }
 0x2f8   : > { %v4682_v33 = vsel %vm4669_vm9, %v4649_v38, %v4533_v61  ;;  %v3680_v55 = vpop.f32.mrf.mxu3 }
 0x2f9   : > { %v4714_v5 = vadd.f32 %v4682_v33, %v4168_v37  ;;  %v2777_v37 = vadd.f32 %v2739_v26, %v6664_v9  ;;  %v4078_v33 = vpop.f32.mrf.mxu0 }
 0x2fa   : > { %v3028_v9 = vpop.f32.mrf.mxu2 }
 0x2fb   : > { %v4746_v27 = vpack.c.bf16 %v4714_v5, %v4714_v5  ;;  %v3064_v5 = vadd.f32 %v3026_v60, %v2777_v37 }
 0x2fc   : > { %4364 = vrot.lane.b32.xlu2 %v7383_v41, %s5641_s18  ;;  %4460 = vrot.lane.b32.xlu1 %v7383_v41, %s5640_s17 }
 0x2fd   : > { %4779 = vst.msk [vmem:[%s7122_s24 + $0x30] sm:$0xf] %vm4766_vm10, %v4746_v27  ;;  %4268 = vrot.lane.b32.xlu0 %v7383_v41, %s5642_s19  ;;  %v3718_v43 = vadd.f32 %v3680_v55, %v3064_v5 }
 0x2fe   : > { %v7394_v48 = vpop.permute.xlu2 %4444  ;;  %v4535_v19 = vpop.permute.xlu1 %4534 }
 0x2ff   : > { %v4343_v31 = vpop.permute.xlu0 %4342  ;;  %v2741_v38 = vpop.f32.mrf.mxu1 }
 0x300   : > { %v4618_v25 = vsel %vm4604_vm8, %v4247_v35, %v4343_v31  ;;  %v3682_v31 = vpop.f32.mrf.mxu3  ;;  %v2778_v18 = vadd.f32 %v2741_v38, %v6687_v40 }
 0x301   : > { %v4650_v30 = vsel %vm695_vm4, %v4618_v25, %v7331_v53 }
 0x302   : > { %v4683_v6 = vsel %vm4669_vm9, %v4650_v30, %v4535_v19  ;;  %v3065_v30 = vadd.f32 %v3028_v9, %v2778_v18 }
 0x303   : > { %v4715_v54 = vadd.f32 %v4683_v6, %v4169_v32 }
 0x304   : > { %4462 = vrot.lane.b32.xlu2 %v7401_v63, %s5640_s17  ;;  %4270 = vrot.lane.b32.xlu1 %v7401_v63, %s5642_s19 }
 0x305   : > { %v4747_v13 = vpack.c.bf16 %v4715_v54, %v4715_v54  ;;  %4556 = vrot.lane.b32.xlu0 %v7383_v41, %s5643_s20 }
 0x306   : > { %v7410_v53 = vpop.permute.xlu2 %4254  ;;  %v4345_v49 = vpop.permute.xlu1 %4344 }
 0x307   : > { %4780 = vst.msk [vmem:[%s7122_s24 + $0x34] sm:$0xf] %vm4766_vm10, %v4747_v13  ;;  %v4441_v0 = vpop.permute.xlu0 %4440  ;;  %v4619_v20 = vsel %vm4604_vm8, %v7347_v56, %v4345_v49  ;;  %v3063_v56 = vadd.f32 %v3023_v50, %v2776_v8  ;;  %v2744_v32 = vpop.f32.mrf.mxu1 }
 0x308   : > { %v4651_v22 = vsel %vm695_vm4, %v4619_v20, %v4441_v0  ;;  %v4080_v50 = vpop.f32.mrf.mxu0  ;;  %v3031_v13 = vpop.f32.mrf.mxu2  ;;  %v3719_v0 = vadd.f32 %v3682_v31, %v3065_v30  ;;  %v4174_v31 = vmax.f32 %v7257_v39, 0.0 }
 0x309   : > { %v4684_v4 = vsel %vm4669_vm9, %v4651_v22, %v4537_v10  ;;  %v3717_v29 = vadd.f32 %v3677_v24, %v3063_v56  ;;  %v2779_v22 = vadd.f32 %v2744_v32, %v6706_v12  ;;  %v3685_v14 = vpop.f32.mrf.mxu3 }
 0x30a   : > { %v4716_v51 = vadd.f32 %v4684_v4, %v4170_v46 }
 0x30b   : > { %v4115_v62 = vadd.f32 %v4075_v45, %v3717_v29  ;;  %v3066_v4 = vadd.f32 %v3031_v13, %v2779_v22 }
 0x30c   : > { %v4748_v21 = vpack.c.bf16 %v4716_v51, %v4716_v51  ;;  %4272 = vrot.lane.b32.xlu2 %v7420_v7, %s5642_s19  ;;  %4558 = vrot.lane.b32.xlu1 %v7401_v63, %s5643_s20 }
 0x30d   : > { %4366 = vrot.lane.b32.xlu0 %v7401_v63, %s5641_s18  ;;  %v7448_v19 = vadd.f32 %v7189_v36, %v4115_v62  ;;  %v3720_v29 = vadd.f32 %v3685_v14, %v3066_v4 }
 0x30e   : > { %4781 = vst.msk [vmem:[%s7122_s24 + $0x38] sm:$0xf] %vm4766_vm10, %v4748_v21  ;;  %v7431_v10 = vpop.permute.xlu2 %4542  ;;  %v4443_v52 = vpop.permute.xlu1 %4442  ;;  %v4173_v21 = vmax.f32 %v7231_v42, 0.0 }
 0x30f   : > { %v4251_v35 = vpop.permute.xlu0 %4250  ;;  %v2746_v56 = vpop.f32.mrf.mxu1 }
 0x310   : > { %v4620_v61 = vsel %vm4604_vm8, %v4251_v35, %v7377_v57  ;;  %v4171_v57 = vmax.f32 %v7192_v15, 0.0  ;;  %v4116_v15 = vadd.f32 %v4078_v33, %v3718_v43  ;;  %v3033_v37 = vpop.f32.mrf.mxu2 }
 0x311   : > { %v4652_v23 = vsel %vm695_vm4, %v4620_v61, %v4443_v52  ;;  %v4083_v52 = vpop.f32.mrf.mxu0  ;;  %v2780_v61 = vadd.f32 %v2746_v56, %v6723_v17  ;;  %v3687_v5 = vpop.f32.mrf.mxu3 }
 0x312   : > { %v7466_v24 = vadd.f32 %v7189_v36, %v4116_v15  ;;  %v4118_v42 = vadd.f32 %v4083_v52, %v3720_v29 }
 0x314   : > { %4560 = vrot.lane.b32.xlu2 %v7420_v7, %s5643_s20  ;;  %4368 = vrot.lane.b32.xlu1 %v7420_v7, %s5641_s18  ;;  %v7499_v17 = vadd.f32 %v7189_v36, %v4118_v42 }
 0x315   : > { %4464 = vrot.lane.b32.xlu0 %v7420_v7, %s5640_s17 }
 0x316   : > { %v7442_v47 = vpop.permute.xlu2 %4352  ;;  %v4253_v27 = vpop.permute.xlu1 %4252 }
 0x317   : > { %v4539_v34 = vpop.permute.xlu0 %4538 }
 0x318   : > { %v4685_v11 = vsel %vm4669_vm9, %v4652_v23, %v4539_v34 }
 0x319   : > { %v4717_v3 = vadd.f32 %v4685_v11, %v4171_v57  ;;  %v4085_v23 = vpop.f32.mrf.mxu0 }
 0x31b   : > { %v4749_v25 = vpack.c.bf16 %v4717_v3, %v4717_v3 }
 0x31c   : > { %4370 = vrot.lane.b32.xlu2 %v7448_v19, %s5641_s18  ;;  %4466 = vrot.lane.b32.xlu1 %v7448_v19, %s5640_s17 }
 0x31d   : > { %4782 = vst.msk [vmem:[%s7122_s24 + $0x3c] sm:$0xf] %vm4766_vm10, %v4749_v25  ;;  %4274 = vrot.lane.b32.xlu0 %v7448_v19, %s5642_s19 }
 0x31e   : > { %v7459_v58 = vpop.permute.xlu2 %4450  ;;  %v4541_v6 = vpop.permute.xlu1 %4540 }
 0x31f   : > { %v4349_v54 = vpop.permute.xlu0 %4348 }
 0x320   : > { %v4621_v40 = vsel %vm4604_vm8, %v4253_v27, %v4349_v54 }
 0x321   : > { %v4653_v49 = vsel %vm695_vm4, %v4621_v40, %v7394_v48  ;;  %v4117_v48 = vadd.f32 %v4080_v50, %v3719_v0 }
 0x322   : > { %v4686_v20 = vsel %vm4669_vm9, %v4653_v49, %v4541_v6 }
 0x323   : > { %v4718_v46 = vadd.f32 %v4686_v20, %v4172_v1  ;;  %v7487_v55 = vadd.f32 %v7189_v36, %v4117_v48  ;;  %v4176_v20 = vmax.f32 %v7294_v16, 0.0 }
 0x324   : > { %4468 = vrot.lane.b32.xlu2 %v7466_v24, %s5640_s17  ;;  %4276 = vrot.lane.b32.xlu1 %v7466_v24, %s5642_s19 }
 0x325   : > { %v4750_v26 = vpack.c.bf16 %v4718_v46, %v4718_v46  ;;  %4562 = vrot.lane.b32.xlu0 %v7448_v19, %s5643_s20 }
 0x326   : > { %v7476_v51 = vpop.permute.xlu2 %4260  ;;  %v4351_v45 = vpop.permute.xlu1 %4350 }
 0x327   : > { %4783 = vst.msk [vmem:[%s7122_s24 + $0x40] sm:$0xf] %vm4766_vm10, %v4750_v26  ;;  %v4447_v8 = vpop.permute.xlu0 %4446  ;;  %v4622_v12 = vsel %vm4604_vm8, %v7410_v53, %v4351_v45  ;;  %v3067_v53 = vadd.f32 %v3033_v37, %v2780_v61 }
 0x328   : > { %v4654_v60 = vsel %vm695_vm4, %v4622_v12, %v4447_v8 }
 0x329   : > { %v4687_v35 = vsel %vm4669_vm9, %v4654_v60, %v7431_v10  ;;  %v3721_v9 = vadd.f32 %v3687_v5, %v3067_v53 }
 0x32a   : > { %v4719_v38 = vadd.f32 %v4687_v35, %v4173_v21  ;;  %v4177_v21 = vmax.f32 %v7320_v59, 0.0 }
 0x32b   : > { %v4119_v34 = vadd.f32 %v4085_v23, %v3721_v9  ;;  %v4179_v23 = vmax.f32 %v7357_v2, 0.0  ;;  %v4180_v2 = vmax.f32 %v7383_v41, 0.0 }
 0x32c   : > { %v4751_v33 = vpack.c.bf16 %v4719_v38, %v4719_v38  ;;  %4278 = vrot.lane.b32.xlu2 %v7487_v55, %s5642_s19  ;;  %4564 = vrot.lane.b32.xlu1 %v7466_v24, %s5643_s20 }
 0x32d   : > { %4372 = vrot.lane.b32.xlu0 %v7466_v24, %s5641_s18  ;;  %v7513_v32 = vadd.f32 %v7189_v36, %v4119_v34  ;;  %v4175_v36 = vmax.f32 %v7275_v44, 0.0 }
 0x32e   : > { %4784 = vst.msk [vmem:[%s7122_s24 + $0x44] sm:$0xf] %vm4766_vm10, %v4751_v33  ;;  %v4549_v10 = vpop.permute.xlu2 %4548  ;;  %v4449_v62 = vpop.permute.xlu1 %4448  ;;  %v4178_v33 = vmax.f32 %v7338_v28, 0.0 }
 0x32f   : > { %v4257_v27 = vpop.permute.xlu0 %4256 }
 0x330   : > { %v4623_v57 = vsel %vm4604_vm8, %v4257_v27, %v7442_v47 }
 0x331   : > { %v4655_v43 = vsel %vm695_vm4, %v4623_v57, %v4449_v62 }
 0x334   : > { %4376 = vrot.lane.b32.xlu2 %v7499_v17, %s5641_s18  ;;  %4374 = vrot.lane.b32.xlu1 %v7487_v55, %s5641_s18 }
 0x335   : > { %4470 = vrot.lane.b32.xlu0 %v7487_v55, %s5640_s17 }
 0x336   : > { %v4359_v11 = vpop.permute.xlu2 %4358  ;;  %v4259_v3 = vpop.permute.xlu1 %4258 }
 0x337   : > { %v4545_v25 = vpop.permute.xlu0 %4544 }
 0x338   : > { %v4688_v47 = vsel %vm4669_vm9, %v4655_v43, %v4545_v25 }
 0x339   : > { %v4720_v18 = vadd.f32 %v4688_v47, %v4174_v31 }
 0x33b   : > { %v4752_v15 = vpack.c.bf16 %v4720_v18, %v4720_v18 }
 0x33c   : > { %4474 = vrot.lane.b32.xlu2 %v7513_v32, %s5640_s17  ;;  %4472 = vrot.lane.b32.xlu1 %v7499_v17, %s5640_s17 }
 0x33d   : > { %4785 = vst.msk [vmem:[%s7122_s24 + $0x48] sm:$0xf] %vm4766_vm10, %v4752_v15  ;;  %4280 = vrot.lane.b32.xlu0 %v7499_v17, %s5642_s19 }
 0x33e   : > { %v4457_v39 = vpop.permute.xlu2 %4456  ;;  %v4547_v30 = vpop.permute.xlu1 %4546 }
 0x33f   : > { %v4355_v6 = vpop.permute.xlu0 %4354 }
 0x340   : > { %v4624_v50 = vsel %vm4604_vm8, %v4259_v3, %v4355_v6 }
 0x341   : > { %v4656_v54 = vsel %vm695_vm4, %v4624_v50, %v7459_v58 }
 0x342   : > { %v4689_v40 = vsel %vm4669_vm9, %v4656_v54, %v4547_v30 }
 0x343   : > { %v4721_v13 = vadd.f32 %v4689_v40, %v4175_v36 }
 0x344   : > { %4566 = vrot.lane.b32.xlu2 %v7487_v55, %s5643_s20  ;;  %4282 = vrot.lane.b32.xlu1 %v7513_v32, %s5642_s19 }
 0x345   : > { %v4753_v1 = vpack.c.bf16 %v4721_v13, %v4721_v13  ;;  %4378 = vrot.lane.b32.xlu0 %v7513_v32, %s5641_s18 }
 0x346   : > { %v4267_v49 = vpop.permute.xlu2 %4266  ;;  %v4357_v0 = vpop.permute.xlu1 %4356 }
 0x347   : > { %4786 = vst.msk [vmem:[%s7122_s24 + $0x4c] sm:$0xf] %vm4766_vm10, %v4753_v1  ;;  %v4453_v44 = vpop.permute.xlu0 %4452  ;;  %v4625_v58 = vsel %vm4604_vm8, %v7476_v51, %v4357_v0  ;;  %v4181_v1 = vmax.f32 %v7401_v63, 0.0 }
 0x348   : > { %v4657_v46 = vsel %vm695_vm4, %v4625_v58, %v4453_v44 }
 0x349   : > { %v4690_v22 = vsel %vm4669_vm9, %v4657_v46, %v4549_v10 }
 0x34a   : > { %v4722_v14 = vadd.f32 %v4690_v22, %v4176_v20  ;;  %v4182_v22 = vmax.f32 %v7420_v7, 0.0  ;;  %v4183_v7 = vmax.f32 %v7448_v19, 0.0 }
 0x34c   : > { %v4754_v26 = vpack.c.bf16 %v4722_v14, %v4722_v14  ;;  %4570 = vrot.lane.b32.xlu1 %v7513_v32, %s5643_s20 }
 0x34d   : > { %4568 = vrot.lane.b32.xlu0 %v7499_v17, %s5643_s20 }
 0x34e   : > { %4787 = vst.msk [vmem:[%s7122_s24 + $0x50] sm:$0xf] %vm4766_vm10, %v4754_v26  ;;  %v4555_v48 = vpop.permute.xlu2 %4554  ;;  %v4455_v4 = vpop.permute.xlu1 %4454 }
 0x34f   : > { %v4263_v51 = vpop.permute.xlu0 %4262 }
 0x350   : > { %v4626_v16 = vsel %vm4604_vm8, %v4263_v51, %v4359_v11 }
 0x351   : > { %v4658_v12 = vsel %vm695_vm4, %v4626_v16, %v4455_v4 }
 0x356   : > { %v4365_v45 = vpop.permute.xlu2 %4364  ;;  %v4265_v8 = vpop.permute.xlu1 %4264 }
 0x357   : > { %v4551_v60 = vpop.permute.xlu0 %4550 }
 0x358   : > { %v4691_v56 = vsel %vm4669_vm9, %v4658_v12, %v4551_v60 }
 0x359   : > { %v4723_v52 = vadd.f32 %v4691_v56, %v4177_v21 }
 0x35b   : > { %v4755_v35 = vpack.c.bf16 %v4723_v52, %v4723_v52 }
 0x35d   : > { %4788 = vst.msk [vmem:[%s7122_s24 + $0x54] sm:$0xf] %vm4766_vm10, %v4755_v35 }
 0x35e   : > { %v4463_v29 = vpop.permute.xlu2 %4462  ;;  %v4553_v38 = vpop.permute.xlu1 %4552 }
 0x35f   : > { %v4361_v37 = vpop.permute.xlu0 %4360 }
 0x360   : > { %v4627_v61 = vsel %vm4604_vm8, %v4265_v8, %v4361_v37 }
 0x361   : > { %v4659_v42 = vsel %vm695_vm4, %v4627_v61, %v4457_v39 }
 0x362   : > { %v4692_v59 = vsel %vm4669_vm9, %v4659_v42, %v4553_v38 }
 0x363   : > { %v4724_v53 = vadd.f32 %v4692_v59, %v4178_v33  ;;  %v4184_v33 = vmax.f32 %v7466_v24, 0.0 }
 0x365   : > { %v4756_v10 = vpack.c.bf16 %v4724_v53, %v4724_v53 }
 0x366   : > { %v4273_v62 = vpop.permute.xlu2 %4272  ;;  %v4363_v5 = vpop.permute.xlu1 %4362 }
 0x367   : > { %4789 = vst.msk [vmem:[%s7122_s24 + $0x58] sm:$0xf] %vm4766_vm10, %v4756_v10  ;;  %v4459_v27 = vpop.permute.xlu0 %4458  ;;  %v4628_v9 = vsel %vm4604_vm8, %v4267_v49, %v4363_v5 }
 0x368   : > { %v4660_v57 = vsel %vm695_vm4, %v4628_v9, %v4459_v27  ;;  %v4185_v9 = vmax.f32 %v7487_v55, 0.0  ;;  %v4187_v55 = vmax.f32 %v7513_v32, 0.0 }
 0x369   : > { %v4693_v34 = vsel %vm4669_vm9, %v4660_v57, %v4555_v48 }
 0x36a   : > { %v4725_v28 = vadd.f32 %v4693_v34, %v4179_v23 }
 0x36c   : > { %v4757_v11 = vpack.c.bf16 %v4725_v28, %v4725_v28 }
 0x36e   : > { %4790 = vst.msk [vmem:[%s7122_s24 + $0x5c] sm:$0xf] %vm4766_vm10, %v4757_v11  ;;  %v4561_v3 = vpop.permute.xlu2 %4560  ;;  %v4461_v43 = vpop.permute.xlu1 %4460 }
 0x36f   : > { %v4269_v31 = vpop.permute.xlu0 %4268 }
 0x370   : > { %v4629_v25 = vsel %vm4604_vm8, %v4269_v31, %v4365_v45 }
 0x371   : > { %v4661_v15 = vsel %vm695_vm4, %v4629_v25, %v4461_v43 }
 0x376   : > { %v4371_v47 = vpop.permute.xlu2 %4370  ;;  %v4271_v18 = vpop.permute.xlu1 %4270 }
 0x377   : > { %v4557_v39 = vpop.permute.xlu0 %4556 }
 0x378   : > { %v4694_v30 = vsel %vm4669_vm9, %v4661_v15, %v4557_v39 }
 0x379   : > { %v4726_v6 = vadd.f32 %v4694_v30, %v4180_v2  ;;  %v4186_v2 = vmax.f32 %v7499_v17, 0.0 }
 0x37b   : > { %v4758_v50 = vpack.c.bf16 %v4726_v6, %v4726_v6 }
 0x37d   : > { %4791 = vst.msk [vmem:[%s7122_s24 + $0x60] sm:$0xf] %vm4766_vm10, %v4758_v50 }
 0x37e   : > { %v4559_v36 = vpop.permute.xlu1 %4558  ;;  %v4469_v40 = vpop.permute.xlu2 %4468 }
 0x37f   : > { %v4367_v54 = vpop.permute.xlu0 %4366 }
 0x380   : > { %v4630_v13 = vsel %vm4604_vm8, %v4271_v18, %v4367_v54 }
 0x381   : > { %v4662_v49 = vsel %vm695_vm4, %v4630_v13, %v4463_v29 }
 0x382   : > { %v4695_v41 = vsel %vm4669_vm9, %v4662_v49, %v4559_v36 }
 0x383   : > { %v4727_v0 = vadd.f32 %v4695_v41, %v4181_v1 }
 0x385   : > { %v4759_v44 = vpack.c.bf16 %v4727_v0, %v4727_v0 }
 0x386   : > { %v4369_v58 = vpop.permute.xlu1 %4368  ;;  %v4279_v63 = vpop.permute.xlu2 %4278 }
 0x387   : > { %4792 = vst.msk [vmem:[%s7122_s24 + $0x64] sm:$0xf] %vm4766_vm10, %v4759_v44  ;;  %v4465_v20 = vpop.permute.xlu0 %4464  ;;  %v4631_v46 = vsel %vm4604_vm8, %v4273_v62, %v4369_v58 }
 0x388   : > { %v4663_v14 = vsel %vm695_vm4, %v4631_v46, %v4465_v20 }
 0x389   : > { %v4696_v26 = vsel %vm4669_vm9, %v4663_v14, %v4561_v3 }
 0x38a   : > { %v4728_v48 = vadd.f32 %v4696_v26, %v4182_v22 }
 0x38c   : > { %v4760_v4 = vpack.c.bf16 %v4728_v48, %v4728_v48 }
 0x38e   : > { %4793 = vst.msk [vmem:[%s7122_s24 + $0x68] sm:$0xf] %vm4766_vm10, %v4760_v4  ;;  %v4467_v51 = vpop.permute.xlu1 %4466  ;;  %v4377_v45 = vpop.permute.xlu2 %4376 }
 0x38f   : > { %v4275_v16 = vpop.permute.xlu0 %4274 }
 0x390   : > { %v4632_v8 = vsel %vm4604_vm8, %v4275_v16, %v4371_v47 }
 0x391   : > { %v4664_v21 = vsel %vm695_vm4, %v4632_v8, %v4467_v51 }
 0x396   : > { %v4277_v12 = vpop.permute.xlu1 %4276  ;;  %v4475_v29 = vpop.permute.xlu2 %4474 }
 0x397   : > { %v4563_v60 = vpop.permute.xlu0 %4562 }
 0x398   : > { %v4697_v56 = vsel %vm4669_vm9, %v4664_v21, %v4563_v60 }
 0x399   : > { %v4729_v52 = vadd.f32 %v4697_v56, %v4183_v7 }
 0x39b   : > { %v4761_v35 = vpack.c.bf16 %v4729_v52, %v4729_v52 }
 0x39d   : > { %4794 = vst.msk [vmem:[%s7122_s24 + $0x6c] sm:$0xf] %vm4766_vm10, %v4761_v35 }
 0x39e   : > { %v4565_v38 = vpop.permute.xlu1 %4564  ;;  %v4567_v27 = vpop.permute.xlu2 %4566 }
 0x39f   : > { %v4373_v37 = vpop.permute.xlu0 %4372 }
 0x3a0   : > { %v4633_v61 = vsel %vm4604_vm8, %v4277_v12, %v4373_v37 }
 0x3a1   : > { %v4665_v42 = vsel %vm695_vm4, %v4633_v61, %v4469_v40 }
 0x3a2   : > { %v4698_v19 = vsel %vm4669_vm9, %v4665_v42, %v4565_v38 }
 0x3a3   : > { %v4730_v59 = vadd.f32 %v4698_v19, %v4184_v33 }
 0x3a5   : > { %v4762_v53 = vpack.c.bf16 %v4730_v59, %v4730_v59 }
 0x3a6   : > { %v4375_v10 = vpop.permute.xlu1 %4374 }
 0x3a7   : > { %4795 = vst.msk [vmem:[%s7122_s24 + $0x70] sm:$0xf] %vm4766_vm10, %v4762_v53  ;;  %v4471_v62 = vpop.permute.xlu0 %4470  ;;  %v4634_v5 = vsel %vm4604_vm8, %v4279_v63, %v4375_v10 }
 0x3a8   : > { %v4666_v23 = vsel %vm695_vm4, %v4634_v5, %v4471_v62 }
 0x3a9   : > { %v4699_v57 = vsel %vm4669_vm9, %v4666_v23, %v4567_v27 }
 0x3aa   : > { %v4731_v24 = vadd.f32 %v4699_v57, %v4185_v9 }
 0x3ac   : > { %v4763_v34 = vpack.c.bf16 %v4731_v24, %v4731_v24 }
 0x3ae   : > { %4796 = vst.msk [vmem:[%s7122_s24 + $0x74] sm:$0xf] %vm4766_vm10, %v4763_v34  ;;  %v4473_v28 = vpop.permute.xlu1 %4472 }
 0x3af   : > { %v4281_v11 = vpop.permute.xlu0 %4280 }
 0x3b0   : > { %v4635_v25 = vsel %vm4604_vm8, %v4281_v11, %v4377_v45 }
 0x3b1   : > { %v4667_v15 = vsel %vm695_vm4, %v4635_v25, %v4473_v28 }
 0x3b6   : > { %v4283_v3 = vpop.permute.xlu1 %4282 }
 0x3b7   : > { %v4379_v43 = vpop.permute.xlu0 %4378 }
 0x3b8   : > { %v4636_v31 = vsel %vm4604_vm8, %v4283_v3, %v4379_v43 }
 0x3b9   : > { %v4668_v47 = vsel %vm695_vm4, %v4636_v31, %v4475_v29 }
 0x3be   : > { %v4571_v18 = vpop.permute.xlu1 %4570 }
 0x3bf   : > { %v4569_v39 = vpop.permute.xlu0 %4568  ;;  %v4701_v30 = vsel %vm4669_vm9, %v4668_v47, %v4571_v18 }
 0x3c0   : > { %v4700_v6 = vsel %vm4669_vm9, %v4667_v15, %v4569_v39  ;;  %v4733_v50 = vadd.f32 %v4701_v30, %v4187_v55 }
 0x3c1   : > { %v4732_v36 = vadd.f32 %v4700_v6, %v4186_v2 }
 0x3c2   : > { %v4765_v54 = vpack.c.bf16 %v4733_v50, %v4733_v50 }
 0x3c3   : > { %v4764_v40 = vpack.c.bf16 %v4732_v36, %v4732_v36 }
 0x3c4   : > { %4798 = vst.msk [vmem:[%s7122_s24 + $0x7c] sm:$0xf] %vm4766_vm10, %v4765_v54 }
 0x3c5   : > { %4797 = vst.msk [vmem:[%s7122_s24 + $0x78] sm:$0xf] %vm4766_vm10, %v4764_v40 }
 0x3c6 PF: > { %s13_s14 = sadd.s32 1, %s5638_s14   ;;  %s7636_s12 = smov %s5634_s13 }
 0x3c7   : > { %p10_p5 = scmp.ge.s32.totalorder %s13_s14, 4   ;;  %s7637_s13 = smov %s7639_s15 }
 0x3c9   :  { %12 = sbr.rel (!%p10_p5) target bundleno = 2 (0x2), region = 72 }

</bundles_post_ra>
